<compile_context>
chip_gen: v7x
topology: tpu7x:2x2x1
jax: 0.10.0
libtpu: 0.0.40
codegen_flags: <defaults>
</compile_context>

<pallas_src>
import math
import functools

import jax
import jax.numpy as jnp
from jax.experimental import pallas as pl
from jax.experimental.pallas import tpu as pltpu

NUM_HEADS = 8
KERNEL_SIZE = 31
ACT_DTYPE = jnp.bfloat16          # dtype of intermediate activations in HBM


def _compute_vmem_limit():
    # Generation-aware scoped-VMEM budget: ~80% of physical per-TC VMEM
    # (v7x 64 MiB -> ~51 MiB, v5e/v6e 128 MiB -> ~102 MiB).  Safe fallback.
    try:
        info = pltpu.get_tpu_info()
        cap = getattr(info, "vmem_capacity_bytes", None)
        if cap:
            return int(cap * 0.8)
    except Exception:
        pass
    return 48 * 1024 * 1024


_VMEM_LIMIT = _compute_vmem_limit()


# ------------------------------ tiling helper -------------------------------

def _pick_tile(dim, target, align, prefer_two=False, min_half=256):
    """Largest tile <= target that is a multiple of `align` and divides `dim`
    (falls back to the full dim, always a legal full-extent block).  prefer_two
    splits the axis into >=2 blocks (v7x megacore / deeper pipelining) only when
    both halves stay >= min_half, so small problems don't pay per-grid-step
    overhead for nothing (single-TC v5e/v6e, tiny M)."""
    if prefer_two and dim >= 2 * min_half and dim % align == 0:
        target = min(target, max(align, (dim // 2) // align * align))
    if dim <= target:
        return dim
    t = (target // align) * align
    while t >= align:
        if dim % t == 0:
            return t
        t -= align
    return dim


# ------------------- fused (LN ->) matmul (-> epilogue) kernel ---------------

def _fused_matmul_kernel(*refs, has_ln_in, has_res, activation, post,
                         res_coeff, out_coeff, single_k):
    n_in = (3 + (2 if has_ln_in else 0) + (1 if has_res else 0)
            + (2 if post == "ln" else 0))
    in_refs = refs[:n_in]
    o_ref = refs[n_in]
    acc_ref = None if single_k else refs[n_in + 1]

    it = iter(in_refs)
    x_ref = next(it)
    w_ref = next(it)
    b_ref = next(it)
    lng_ref = lnb_ref = res_ref = png_ref = pnb_ref = None
    if has_ln_in:
        lng_ref = next(it)
        lnb_ref = next(it)
    if has_res:
        res_ref = next(it)
    if post == "ln":
        png_ref = next(it)
        pnb_ref = next(it)

    def partial_dot():
        if has_ln_in:  # LayerNorm prologue (tk == K in this mode)
            xv = x_ref[...].astype(jnp.float32)
            mean = jnp.mean(xv, axis=-1, keepdims=True)
            var = jnp.mean(jnp.square(xv - mean), axis=-1, keepdims=True)
            xv = (xv - mean) * jax.lax.rsqrt(var + 1e-5) * lng_ref[...] + lnb_ref[...]
            xmat = xv.astype(jnp.bfloat16)
        else:
            xmat = x_ref[...].astype(jnp.bfloat16)
        return jnp.dot(xmat, w_ref[...], preferred_element_type=jnp.float32)

    def epilogue(y):
        y = y + b_ref[...]
        if activation == "silu":
            y = y * jax.nn.sigmoid(y)
        elif activation == "relu":
            y = jnp.maximum(y, 0.0)
        if has_res:
            y = res_coeff * res_ref[...].astype(jnp.float32) + out_coeff * y
        if post == "ln":           # fused output LayerNorm (requires full N)
            mean = jnp.mean(y, axis=-1, keepdims=True)
            var = jnp.mean(jnp.square(y - mean), axis=-1, keepdims=True)
            y = (y - mean) * jax.lax.rsqrt(var + 1e-5) * png_ref[...] + pnb_ref[...]
        elif post == "logsoftmax":  # fused log_softmax (requires full N)
            m = jnp.max(y, axis=-1, keepdims=True)
            s = y - m
            y = s - jnp.log(jnp.sum(jnp.exp(s), axis=-1, keepdims=True))
        o_ref[...] = y.astype(o_ref.dtype)

    if single_k:
        # Single K tile: no f32 accumulator scratch, no pl.when phases.
        epilogue(partial_dot())
    else:
        k_idx = pl.program_id(2)

        @pl.when(k_idx == 0)
        def _init():
            acc_ref[...] = jnp.zeros_like(acc_ref)

        acc_ref[...] += partial_dot()

        @pl.when(k_idx == pl.num_programs(2) - 1)
        def _fin():
            epilogue(acc_ref[...])


def fused_linear(x, w, b, *, ln=None, residual=None, res_coeff=1.0, out_coeff=1.0,
                 activation="none", post="none", post_ln=None, out_dtype=ACT_DTYPE):
    """out = post( res_coeff*residual + out_coeff * act( LN?(x) @ W + b ) )."""
    M, K = x.shape
    K2, N = w.shape
    assert K == K2
    tm_target = 128 if post == "logsoftmax" else 512   # bound tm*vocab f32 on v7x
    tm = _pick_tile(M, tm_target, 8, prefer_two=True)
    tk = K if ln is not None else _pick_tile(K, 512, 128)   # LN prologue needs full K
    tn = N if post != "none" else _pick_tile(N, 512, 128)   # LN/logsoftmax need full N
    single_k = (K // tk) == 1
    grid = (M // tm, N // tn, K // tk)

    in_specs = [
        pl.BlockSpec((tm, tk), lambda i, j, k: (i, k)),
        pl.BlockSpec((tk, tn), lambda i, j, k: (k, j)),
        pl.BlockSpec((1, tn), lambda i, j, k: (0, j)),
    ]
    inputs = [x, w, b.reshape(1, N)]
    if ln is not None:
        g, bb = ln
        in_specs += [pl.BlockSpec((1, K), lambda i, j, k: (0, 0)),
                     pl.BlockSpec((1, K), lambda i, j, k: (0, 0))]
        inputs += [g.reshape(1, K), bb.reshape(1, K)]
    if residual is not None:
        in_specs.append(pl.BlockSpec((tm, tn), lambda i, j, k: (i, j)))
        inputs.append(residual)
    if post == "ln":
        g2, b2 = post_ln
        in_specs += [pl.BlockSpec((1, tn), lambda i, j, k: (0, j)),
                     pl.BlockSpec((1, tn), lambda i, j, k: (0, j))]
        inputs += [g2.reshape(1, N), b2.reshape(1, N)]

    kernel = functools.partial(
        _fused_matmul_kernel, has_ln_in=ln is not None,
        has_res=residual is not None, activation=activation, post=post,
        res_coeff=res_coeff, out_coeff=out_coeff, single_k=single_k)

    return pl.pallas_call(
        kernel,
        grid=grid,
        in_specs=in_specs,
        out_specs=pl.BlockSpec((tm, tn), lambda i, j, k: (i, j)),
        out_shape=jax.ShapeDtypeStruct((M, N), out_dtype),
        scratch_shapes=[] if single_k else [pltpu.VMEM((tm, tn), jnp.float32)],
        compiler_params=pltpu.CompilerParams(
            dimension_semantics=("parallel", "parallel", "arbitrary"),
            vmem_limit_bytes=_VMEM_LIMIT),
    )(*inputs)


# ----------------- whole FF half-step module in a single kernel --------------

def _ff_module_kernel(x_ref, w1_ref, b1_ref, w2_ref, b2_ref, lng_ref, lnb_ref,
                      *rest, has_post_ln):
    if has_post_ln:
        png_ref, pnb_ref, o_ref = rest
    else:
        (o_ref,) = rest
    x = x_ref[...].astype(jnp.float32)
    mean = jnp.mean(x, axis=-1, keepdims=True)
    var = jnp.mean(jnp.square(x - mean), axis=-1, keepdims=True)
    xn = (x - mean) * jax.lax.rsqrt(var + 1e-5) * lng_ref[...] + lnb_ref[...]
    h = jnp.dot(xn.astype(jnp.bfloat16), w1_ref[...],
                preferred_element_type=jnp.float32) + b1_ref[...]
    h = h * jax.nn.sigmoid(h)                                  # SiLU, stays in VMEM
    y = jnp.dot(h.astype(jnp.bfloat16), w2_ref[...],
                preferred_element_type=jnp.float32) + b2_ref[...]
    y = x + 0.5 * y                                            # half-step residual
    if has_post_ln:                                            # block's final LayerNorm
        mean = jnp.mean(y, axis=-1, keepdims=True)
        var = jnp.mean(jnp.square(y - mean), axis=-1, keepdims=True)
        y = (y - mean) * jax.lax.rsqrt(var + 1e-5) * png_ref[...] + pnb_ref[...]
    o_ref[...] = y.astype(o_ref.dtype)


def ff_module(x, ln_g, ln_b, w1, b1, w2, b2, *, post_ln=None, out_dtype=ACT_DTYPE):
    """out = [final_LN]( x + 0.5 * (silu(LN(x)@W1+b1) @ W2 + b2) ), one kernel;
    the (tm, dff) intermediate never round-trips HBM."""
    M, D = x.shape
    dff = w1.shape[1]
    tm = _pick_tile(M, 512, 8, prefer_two=True)
    grid = (M // tm,)
    vec = lambda a, n: a.reshape(1, n)
    in_specs = [
        pl.BlockSpec((tm, D), lambda i: (i, 0)),
        pl.BlockSpec((D, dff), lambda i: (0, 0)),
        pl.BlockSpec((1, dff), lambda i: (0, 0)),
        pl.BlockSpec((dff, D), lambda i: (0, 0)),
        pl.BlockSpec((1, D), lambda i: (0, 0)),
        pl.BlockSpec((1, D), lambda i: (0, 0)),
        pl.BlockSpec((1, D), lambda i: (0, 0)),
    ]
    inputs = [x, w1, vec(b1, dff), w2, vec(b2, D), vec(ln_g, D), vec(ln_b, D)]
    has_post_ln = post_ln is not None
    if has_post_ln:
        in_specs += [pl.BlockSpec((1, D), lambda i: (0, 0)),
                     pl.BlockSpec((1, D), lambda i: (0, 0))]
        inputs += [vec(post_ln[0], D), vec(post_ln[1], D)]
    return pl.pallas_call(
        functools.partial(_ff_module_kernel, has_post_ln=has_post_ln),
        grid=grid,
        in_specs=in_specs,
        out_specs=pl.BlockSpec((tm, D), lambda i: (i, 0)),
        out_shape=jax.ShapeDtypeStruct((M, D), out_dtype),
        compiler_params=pltpu.CompilerParams(
            dimension_semantics=("parallel",),
            vmem_limit_bytes=_VMEM_LIMIT),
    )(*inputs)


# ---------------- whole Conformer conv module in a single kernel -------------

def _conv_module_kernel(x_ref, lng_ref, lnb_ref, wa_ref, ba_ref, wg_ref, bg_ref,
                        dww_ref, dwb_ref, bns_ref, bnsh_ref, w2_ref, b2_ref,
                        o_ref, hp_ref, *, T, K, pad, res_coeff):
    x = x_ref[0].astype(jnp.float32)                           # (T, D)
    mean = jnp.mean(x, axis=-1, keepdims=True)
    var = jnp.mean(jnp.square(x - mean), axis=-1, keepdims=True)
    xn = (x - mean) * jax.lax.rsqrt(var + 1e-5) * lng_ref[...] + lnb_ref[...]
    xb = xn.astype(jnp.bfloat16)
    a = jnp.dot(xb, wa_ref[...], preferred_element_type=jnp.float32) + ba_ref[...]
    g = jnp.dot(xb, wg_ref[...], preferred_element_type=jnp.float32) + bg_ref[...]
    h = a * jax.nn.sigmoid(g)                                  # GLU, (T, D) f32

    # Depthwise conv ('same' padding): halo lives in a VMEM scratch (no HBM pad copy),
    # taps are statically unrolled slices so the scheduler sees them.
    hp_ref[...] = jnp.zeros_like(hp_ref)
    hp_ref[pad:pad + T, :] = h
    acc = jnp.zeros_like(h)
    for j in range(K):
        acc = acc + hp_ref[j:j + T, :] * dww_ref[j:j + 1, :]
    acc = (acc + dwb_ref[...]) * bns_ref[...] + bnsh_ref[...]  # eval-mode BatchNorm1d
    acc = acc * jax.nn.sigmoid(acc)                            # SiLU

    y = jnp.dot(acc.astype(jnp.bfloat16), w2_ref[...],
                preferred_element_type=jnp.float32) + b2_ref[...]
    # Module residual + block residual: block does x + (inner(x) + x) = 2*x + inner(x).
    o_ref[0] = (res_coeff * x + y).astype(o_ref.dtype)


def conv_module(x, c, kernel_size=KERNEL_SIZE, res_coeff=2.0, out_dtype=ACT_DTYPE):
    # TODO(synk): for very long T, tile the time axis with a (K-1) halo instead of one
    # full-T block per batch element.
    B, T, D = x.shape
    pad = (kernel_size - 1) // 2
    vec = lambda a: a.reshape(1, D)
    kernel = functools.partial(_conv_module_kernel, T=T, K=kernel_size, pad=pad,
                               res_coeff=res_coeff)
    return pl.pallas_call(
        kernel,
        grid=(B,),
        in_specs=[
            pl.BlockSpec((1, T, D), lambda b: (b, 0, 0)),
            pl.BlockSpec((1, D), lambda b: (0, 0)),            # ln_g
            pl.BlockSpec((1, D), lambda b: (0, 0)),            # ln_b
            pl.BlockSpec((D, D), lambda b: (0, 0)),            # conv1 wa
            pl.BlockSpec((1, D), lambda b: (0, 0)),            # conv1 ba
            pl.BlockSpec((D, D), lambda b: (0, 0)),            # conv1 wg
            pl.BlockSpec((1, D), lambda b: (0, 0)),            # conv1 bg
            pl.BlockSpec((kernel_size, D), lambda b: (0, 0)),  # dw taps
            pl.BlockSpec((1, D), lambda b: (0, 0)),            # dw bias
            pl.BlockSpec((1, D), lambda b: (0, 0)),            # bn scale
            pl.BlockSpec((1, D), lambda b: (0, 0)),            # bn shift
            pl.BlockSpec((D, D), lambda b: (0, 0)),            # conv2 w
            pl.BlockSpec((1, D), lambda b: (0, 0)),            # conv2 b
        ],
        out_specs=pl.BlockSpec((1, T, D), lambda b: (b, 0, 0)),
        out_shape=jax.ShapeDtypeStruct((B, T, D), out_dtype),
        scratch_shapes=[pltpu.VMEM((T + 2 * pad, D), jnp.float32)],
        compiler_params=pltpu.CompilerParams(
            dimension_semantics=("parallel",),
            vmem_limit_bytes=_VMEM_LIMIT),
    )(x, vec(c["ln_g"]), vec(c["ln_b"]), c["conv1_wa"], vec(c["conv1_ba"]),
      c["conv1_wg"], vec(c["conv1_bg"]), c["dw_w"], vec(c["dw_b"]),
      vec(c["bn_scale"]), vec(c["bn_shift"]), c["conv2_w"], vec(c["conv2_b"]))


# ----------------- flash-style multi-head self-attention ---------------------

def _flash_attn_kernel(q_ref, kv_ref, o_ref, m_sc, l_sc, acc_sc, *, D, H, scale):
    Dh = D // H
    ki = pl.program_id(2)

    @pl.when(ki == 0)
    def _init():
        m_sc[...] = jnp.full_like(m_sc, -jnp.inf)
        l_sc[...] = jnp.zeros_like(l_sc)
        acc_sc[...] = jnp.zeros_like(acc_sc)

    q = (q_ref[0, :, 0:D].astype(jnp.float32) * scale).astype(jnp.bfloat16)  # (tq, D)
    k = kv_ref[0, :, D:2 * D].astype(jnp.bfloat16)                            # (tk, D)
    v = kv_ref[0, :, 2 * D:3 * D].astype(jnp.bfloat16)                        # (tk, D)

    for h in range(H):  # static per-head 2-D matmuls (no in-kernel head transpose)
        sl = slice(h * Dh, (h + 1) * Dh)
        s = jax.lax.dot_general(q[:, sl], k[:, sl], (((1,), (1,)), ((), ())),
                                preferred_element_type=jnp.float32)          # (tq, tk)
        m_prev = m_sc[:, h:h + 1]
        m_new = jnp.maximum(m_prev, jnp.max(s, axis=-1, keepdims=True))
        alpha = jnp.exp(m_prev - m_new)
        p = jnp.exp(s - m_new)
        l_sc[:, h:h + 1] = alpha * l_sc[:, h:h + 1] + jnp.sum(p, axis=-1, keepdims=True)
        acc_sc[:, sl] = alpha * acc_sc[:, sl] + jnp.dot(
            p.astype(jnp.bfloat16), v[:, sl], preferred_element_type=jnp.float32)
        m_sc[:, h:h + 1] = m_new

    @pl.when(ki == pl.num_programs(2) - 1)
    def _finalize():
        inv_l = pl.reciprocal(l_sc[...], approx=True)        # (tq, H)
        for h in range(H):
            sl = slice(h * Dh, (h + 1) * Dh)
            o_ref[0, :, sl] = (acc_sc[:, sl] * inv_l[:, h:h + 1]).astype(o_ref.dtype)


def mha_core(qkv, num_heads, out_dtype=ACT_DTYPE):
    # qkv: (B, T, 3*D) with [q | k | v] along the last dim -> lane-dense (B, T, D) out.
    B, T, D3 = qkv.shape
    D = D3 // 3
    H = num_heads
    scale = 1.0 / math.sqrt(D // H)
    tq = _pick_tile(T, 256, 8)
    tk = _pick_tile(T, 256, 8)
    grid = (B, T // tq, T // tk)
    kernel = functools.partial(_flash_attn_kernel, D=D, H=H, scale=scale)
    return pl.pallas_call(
        kernel,
        grid=grid,
        in_specs=[
            pl.BlockSpec((1, tq, D3), lambda b, qi, ki: (b, qi, 0)),
            pl.BlockSpec((1, tk, D3), lambda b, qi, ki: (b, ki, 0)),
        ],
        out_specs=pl.BlockSpec((1, tq, D), lambda b, qi, ki: (b, qi, 0)),
        out_shape=jax.ShapeDtypeStruct((B, T, D), out_dtype),
        scratch_shapes=[pltpu.VMEM((tq, H), jnp.float32),
                        pltpu.VMEM((tq, H), jnp.float32),
                        pltpu.VMEM((tq, D), jnp.float32)],
        compiler_params=pltpu.CompilerParams(
            dimension_semantics=("parallel", "parallel", "arbitrary"),
            vmem_limit_bytes=_VMEM_LIMIT),
    )(qkv, qkv)


# ------------------------------ model glue -----------------------------------

def rel_positional_encoding(x, d_model):
    # x * sqrt(d_model) + absolute PE (offset=0); dropout identity (eval mode);
    # the relative PE tensor returned by the reference module is unused downstream.
    T = x.shape[1]
    position = jnp.arange(T, dtype=jnp.float32)[:, None]
    div_term = jnp.exp(jnp.arange(0, d_model, 2, dtype=jnp.float32)
                       * (-(math.log(10000.0) / d_model)))
    pe = jnp.zeros((T, d_model), jnp.float32)
    pe = pe.at[:, 0::2].set(jnp.sin(position * div_term))
    pe = pe.at[:, 1::2].set(jnp.cos(position * div_term))
    y = x.astype(jnp.float32) * math.sqrt(d_model) + pe[None, :, :]
    return y.astype(ACT_DTYPE)


def conformer_block(x, p, num_heads):
    B, T, D = x.shape
    x2 = x.reshape(B * T, D)
    # FF1 (half-step): whole module (LN, W1, SiLU, W2, +0.5 residual) in one kernel.
    x2 = ff_module(x2, p["ff1_norm_g"], p["ff1_norm_b"],
                   p["ff1_w1"], p["ff1_b1"], p["ff1_w2"], p["ff1_b2"])
    # MHSA: LN fused into the QKV projection, residual fused into the out-projection.
    qkv = fused_linear(x2, p["attn_in_w"], p["attn_in_b"],
                       ln=(p["attn_norm_g"], p["attn_norm_b"]))
    attn = mha_core(qkv.reshape(B, T, 3 * D), num_heads)          # (B, T, D)
    x2 = fused_linear(attn.reshape(B * T, D), p["attn_out_w"], p["attn_out_b"],
                      residual=x2)
    # Conv module: whole ConformerConvModule incl. its residual AND the block residual
    # (x + conv(x) with conv(x) = inner + x  =>  2*x + inner) in one kernel.
    x2 = conv_module(x2.reshape(B, T, D), p["conv"]).reshape(B * T, D)
    # FF2 (half-step) with the block's final LayerNorm fused in.
    x2 = ff_module(x2, p["ff2_norm_g"], p["ff2_norm_b"],
                   p["ff2_w1"], p["ff2_b1"], p["ff2_w2"], p["ff2_b2"],
                   post_ln=(p["final_norm_g"], p["final_norm_b"]))
    return x2.reshape(B, T, D)


def ctc_loss_sum(log_probs_tbv, targets, input_lengths, target_lengths, blank):
    # TODO(synk): CTC forward DP is inherently sequential over time; implemented as a
    # vectorized lax.scan in plain JAX (no clean Pallas equivalent at these tiny sizes).
    T, B, V = log_probs_tbv.shape
    S = targets.shape[1]
    L = 2 * S + 1
    NEG = jnp.float32(-1e30)

    ext = jnp.full((B, L), blank, jnp.int32).at[:, 1::2].set(targets)
    pos = jnp.arange(L)
    valid = pos[None, :] < (2 * target_lengths[:, None] + 1)
    ext_m2 = jnp.concatenate([jnp.full((B, 2), blank, jnp.int32), ext[:, :-2]], axis=1)
    can_skip = (pos[None, :] >= 2) & (ext != blank) & (ext != ext_m2)

    emit = jnp.take_along_axis(
        log_probs_tbv, jnp.broadcast_to(ext[None, :, :], (T, B, L)), axis=2)

    def lse2(a, b_):
        m = jnp.maximum(a, b_)
        return m + jnp.log(jnp.exp(a - m) + jnp.exp(b_ - m))

    alpha0 = jnp.full((B, L), NEG)
    alpha0 = alpha0.at[:, 0].set(emit[0, :, 0])
    alpha0 = alpha0.at[:, 1].set(jnp.where(target_lengths >= 1, emit[0, :, 1], NEG))
    alpha0 = jnp.where(valid, alpha0, NEG)

    def step(alpha, xs):
        t, emit_t = xs
        a1 = jnp.concatenate([jnp.full((B, 1), NEG), alpha[:, :-1]], axis=1)
        a2 = jnp.concatenate([jnp.full((B, 2), NEG), alpha[:, :-2]], axis=1)
        s = lse2(alpha, a1)
        s = jnp.where(can_skip, lse2(s, a2), s)
        new = jnp.where(valid, s + emit_t, NEG)
        active = (t < input_lengths)[:, None]
        return jnp.where(active, new, alpha), None

    alpha, _ = jax.lax.scan(step, alpha0, (jnp.arange(1, T), emit[1:]))

    iL = 2 * target_lengths
    aL = jnp.take_along_axis(alpha, iL[:, None], axis=1)[:, 0]
    aL1 = jnp.take_along_axis(alpha, jnp.maximum(iL - 1, 0)[:, None], axis=1)[:, 0]
    aL1 = jnp.where(target_lengths >= 1, aL1, NEG)
    ll = lse2(aL, aL1)
    loss = -ll
    loss = jnp.where(jnp.isfinite(loss) & (loss < 1e29), loss, 0.0)   # zero_infinity
    return jnp.sum(loss)


@functools.partial(jax.jit, static_argnames=("blank_id",))
def _forward_jit(params, x, enc_lens, targets, tlens, blank_id):
    # TODO(synk): `Subsampling` class was not provided in the reference; approximated
    # as stack-8-frames + Linear + ReLU (Pallas matmul), out_lens = audio_lens // 8.
    B, T, F = x.shape
    T8 = T // 8
    xs = x[:, : T8 * 8, :].reshape(B * T8, 8 * F)
    h = fused_linear(xs, params["sub_w"], params["sub_b"],
                     activation="relu").reshape(B, T8, -1)

    h = rel_positional_encoding(h, h.shape[-1])

    for blk in params["blocks"]:
        h = conformer_block(h, blk, NUM_HEADS)

    D = h.shape[-1]
    # fc_out + log_softmax fused into one kernel (f32 output for the CTC DP).
    logp = fused_linear(h.reshape(B * T8, D), params["fc_w"], params["fc_b"],
                        post="logsoftmax",
                        out_dtype=jnp.float32).reshape(B, T8, -1)

    logp_tbv = jnp.transpose(logp, (1, 0, 2))                         # (T8, B, V)
    loss = ctc_loss_sum(logp_tbv, targets, enc_lens, tlens, blank_id)
    loss = loss / logp_tbv.shape[1]                                   # / batch size
    return logp, loss


def ctc_model_forward(params, x, audio_lens, text, text_lens, blank_id):
    enc_lens = jnp.asarray([int(l) // 8 for l in audio_lens], jnp.int32)
    targets = jnp.asarray(text, jnp.int32)
    tlens = jnp.asarray(text_lens, jnp.int32)
    logp, loss = _forward_jit(params, x, enc_lens, targets, tlens, blank_id)
    return logp, loss, enc_lens


# --------------------------- deterministic params ----------------------------

def make_params(key, in_dim, d_model, vocab, num_layers, num_heads,
                ff_expansion=4, conv_expansion=2, kernel_size=31):
    counter = [0]

    def nxt(shape, scale=0.05, dtype=jnp.float32):
        counter[0] += 1
        k = jax.random.fold_in(key, counter[0])
        return (scale * jax.random.normal(k, shape, jnp.float32)).astype(dtype)

    ones = lambda s: jnp.ones(s, jnp.float32)
    zeros = lambda s: jnp.zeros(s, jnp.float32)
    bf = jnp.bfloat16

    D = d_model
    dff = D * ff_expansion
    bn_eps = 1e-5
    assert conv_expansion == 2  # GLU halves == D

    params = {
        "sub_w": nxt((8 * in_dim, D), dtype=bf), "sub_b": zeros((D,)),
        "fc_w": nxt((D, vocab), dtype=bf), "fc_b": zeros((vocab,)),
        "blocks": [],
    }
    for _ in range(num_layers):
        blk = {
            "ff1_norm_g": ones((D,)), "ff1_norm_b": zeros((D,)),
            "ff1_w1": nxt((D, dff), dtype=bf), "ff1_b1": zeros((dff,)),
            "ff1_w2": nxt((dff, D), dtype=bf), "ff1_b2": zeros((D,)),
            "attn_norm_g": ones((D,)), "attn_norm_b": zeros((D,)),
            "attn_in_w": nxt((D, 3 * D), dtype=bf), "attn_in_b": zeros((3 * D,)),
            "attn_out_w": nxt((D, D), dtype=bf), "attn_out_b": zeros((D,)),
            "conv": {
                "ln_g": ones((D,)), "ln_b": zeros((D,)),
                # pointwise conv1 (1x1, D -> 2D) split into the two GLU halves
                "conv1_wa": nxt((D, D), dtype=bf), "conv1_ba": zeros((D,)),
                "conv1_wg": nxt((D, D), dtype=bf), "conv1_bg": zeros((D,)),
                "dw_w": nxt((kernel_size, D)), "dw_b": zeros((D,)),
                # eval-mode BatchNorm1d with default running stats (mean=0, var=1)
                "bn_scale": ones((D,)) / jnp.sqrt(1.0 + bn_eps),
                "bn_shift": zeros((D,)),
                "conv2_w": nxt((D, D), dtype=bf), "conv2_b": zeros((D,)),
            },
            "ff2_norm_g": ones((D,)), "ff2_norm_b": zeros((D,)),
            "ff2_w1": nxt((D, dff), dtype=bf), "ff2_b1": zeros((dff,)),
            "ff2_w2": nxt((dff, D), dtype=bf), "ff2_b2": zeros((D,)),
            "final_norm_g": ones((D,)), "final_norm_b": zeros((D,)),
        }
        params["blocks"].append(blk)
    return params


# ----------------------------------- main ------------------------------------

if __name__ == "__main__":
    IN_DIM = 16       # input feature dim
    D_MODEL = 32      # output_size (divisible by num_heads=8)
    VOCAB = 16
    BLANK = 0
    NUM_LAYERS = 3
    B = 2
    T_AUDIO = 64      # subsamples by 8 -> encoder length 8

    key = jax.random.PRNGKey(0)
    k_x, k_p = jax.random.split(key, 2)

    params = make_params(k_p, IN_DIM, D_MODEL, VOCAB, NUM_LAYERS, NUM_HEADS)
    x = jax.random.normal(k_x, (B, T_AUDIO, IN_DIM), jnp.float32)
    audio_lens = [64, 48]
    text = [[3, 5, 7, 2], [4, 9, 1, 0]]
    text_lens = [4, 3]

    predict, loss, out_lens = ctc_model_forward(params, x, audio_lens, text,
                                                text_lens, BLANK)
    jax.block_until_ready(predict)
    jax.block_until_ready(loss)
    jax.block_until_ready(out_lens)
    print("KERNEL_OK")
</pallas_src>

<mosaic_0001>
module attributes {stable_mosaic.version = 11 : i64} {
  func.func @_fused_matmul_kernel(%arg0: i32, %arg1: i32, %arg2: i32, %arg3: memref<16x128xf32, #tpu.memory_space<vmem>>, %arg4: memref<128x32xbf16, #tpu.memory_space<vmem>>, %arg5: memref<1x32xf32, #tpu.memory_space<vmem>>, %arg6: memref<16x32xbf16, #tpu.memory_space<vmem>>) attributes {dimension_semantics = [#tpu.dimension_semantics<parallel>, #tpu.dimension_semantics<parallel>, #tpu.dimension_semantics<arbitrary>], iteration_bounds = array<i64: 1, 1, 1>, scalar_prefetch = 0 : i64, scratch_operands = 0 : i64, tpu.core_type = #tpu.core_type<tc>, window_params = [{transform_indices = @transform_0, window_bounds = array<i64: 16, 128>}, {transform_indices = @transform_1, window_bounds = array<i64: 128, 32>}, {transform_indices = @transform_2, window_bounds = array<i64: 1, 32>}, {transform_indices = @transform_3, window_bounds = array<i64: 16, 32>}]} {
    %c0 = arith.constant 0 : index
    %c0_0 = arith.constant 0 : index
    %0 = vector.load %arg3[%c0, %c0_0] : memref<16x128xf32, #tpu.memory_space<vmem>>, vector<16x128xf32>
    %1 = arith.truncf %0 : vector<16x128xf32> to vector<16x128xbf16>
    %c0_1 = arith.constant 0 : index
    %c0_2 = arith.constant 0 : index
    %2 = vector.load %arg4[%c0_1, %c0_2] : memref<128x32xbf16, #tpu.memory_space<vmem>>, vector<128x32xbf16>
    %cst = arith.constant dense<0.000000e+00> : vector<16x32xf32>
    %3 = tpu.matmul %1, %2, %cst {dimension_numbers = #tpu.dot_dimension_numbers<[1], [0], [0], [1], [0, 0, 1, 1], [], []>} : vector<16x128xbf16>, vector<128x32xbf16>, vector<16x32xf32> -> vector<16x32xf32>
    %c0_3 = arith.constant 0 : index
    %c0_4 = arith.constant 0 : index
    %4 = vector.load %arg5[%c0_3, %c0_4] : memref<1x32xf32, #tpu.memory_space<vmem>>, vector<1x32xf32>
    %5 = vector.broadcast %4 : vector<1x32xf32> to vector<16x32xf32>
    %6 = arith.addf %3, %5 : vector<16x32xf32>
    %cst_5 = arith.constant 0.000000e+00 : f32
    %7 = vector.broadcast %cst_5 : f32 to vector<16x32xf32>
    %8 = arith.maximumf %6, %7 : vector<16x32xf32>
    %9 = arith.truncf %8 : vector<16x32xf32> to vector<16x32xbf16>
    %c0_6 = arith.constant 0 : index
    %c0_7 = arith.constant 0 : index
    %10 = vector.load %arg6[%c0_6, %c0_7] : memref<16x32xbf16, #tpu.memory_space<vmem>>, vector<16x32xbf16>
    tpu.vector_store %arg6[%c0_6, %c0_7], %9 {strides = array<i32>} : memref<16x32xbf16, #tpu.memory_space<vmem>>, vector<16x32xbf16>,
    return
  }
  func.func @transform_0(%arg0: i32, %arg1: i32, %arg2: i32) -> (i32, i32) {
    %c0_i32 = arith.constant 0 : i32
    return %arg0, %arg2 : i32, i32
  }
  func.func @transform_1(%arg0: i32, %arg1: i32, %arg2: i32) -> (i32, i32) {
    %c0_i32 = arith.constant 0 : i32
    return %arg2, %arg1 : i32, i32
  }
  func.func @transform_2(%arg0: i32, %arg1: i32, %arg2: i32) -> (i32, i32) {
    %c0_i32 = arith.constant 0 : i32
    %c0_i32_0 = arith.constant 0 : i32
    return %c0_i32, %arg1 : i32, i32
  }
  func.func @transform_3(%arg0: i32, %arg1: i32, %arg2: i32) -> (i32, i32) {
    %c0_i32 = arith.constant 0 : i32
    return %arg0, %arg1 : i32, i32
  }
}

module attributes {stable_mosaic.version = 11 : i64} {
  func.func @_fused_matmul_kernel(%arg0: i32, %arg1: i32, %arg2: i32, %arg3: memref<16x32xbf16, #tpu.memory_space<vmem>>, %arg4: memref<32x96xbf16, #tpu.memory_space<vmem>>, %arg5: memref<1x96xf32, #tpu.memory_space<vmem>>, %arg6: memref<1x32xf32, #tpu.memory_space<vmem>>, %arg7: memref<1x32xf32, #tpu.memory_space<vmem>>, %arg8: memref<16x96xbf16, #tpu.memory_space<vmem>>) attributes {dimension_semantics = [#tpu.dimension_semantics<parallel>, #tpu.dimension_semantics<parallel>, #tpu.dimension_semantics<arbitrary>], iteration_bounds = array<i64: 1, 1, 1>, scalar_prefetch = 0 : i64, scratch_operands = 0 : i64, tpu.core_type = #tpu.core_type<tc>, window_params = [{transform_indices = @transform_0, window_bounds = array<i64: 16, 32>}, {transform_indices = @transform_1, window_bounds = array<i64: 32, 96>}, {transform_indices = @transform_2, window_bounds = array<i64: 1, 96>}, {pipeline_mode = #tpu.pipeline_mode<synchronous>, transform_indices = @transform_3, window_bounds = array<i64: 1, 32>}, {pipeline_mode = #tpu.pipeline_mode<synchronous>, transform_indices = @transform_4, window_bounds = array<i64: 1, 32>}, {transform_indices = @transform_5, window_bounds = array<i64: 16, 96>}]} {
    %c0 = arith.constant 0 : index
    %c0_0 = arith.constant 0 : index
    %0 = vector.load %arg3[%c0, %c0_0] : memref<16x32xbf16, #tpu.memory_space<vmem>>, vector<16x32xbf16>
    %1 = arith.extf %0 : vector<16x32xbf16> to vector<16x32xf32>
    %cst = arith.constant dense<0.000000e+00> : vector<16xf32>
    %2 = vector.multi_reduction <add>, %1, %cst [1] : vector<16x32xf32> to vector<16xf32>
    %3 = vector.shape_cast %2 : vector<16xf32> to vector<16x1xf32>
    %cst_1 = arith.constant 3.200000e+01 : f32
    %4 = vector.broadcast %cst_1 : f32 to vector<16x1xf32>
    %5 = arith.divf %3, %4 : vector<16x1xf32>
    %6 = vector.broadcast %5 : vector<16x1xf32> to vector<16x32xf32>
    %7 = arith.subf %1, %6 : vector<16x32xf32>
    %8 = arith.mulf %7, %7 : vector<16x32xf32>
    %cst_2 = arith.constant dense<0.000000e+00> : vector<16xf32>
    %9 = vector.multi_reduction <add>, %8, %cst_2 [1] : vector<16x32xf32> to vector<16xf32>
    %10 = vector.shape_cast %9 : vector<16xf32> to vector<16x1xf32>
    %cst_3 = arith.constant 3.200000e+01 : f32
    %11 = vector.broadcast %cst_3 : f32 to vector<16x1xf32>
    %12 = arith.divf %10, %11 : vector<16x1xf32>
    %13 = vector.broadcast %5 : vector<16x1xf32> to vector<16x32xf32>
    %14 = arith.subf %1, %13 : vector<16x32xf32>
    %cst_4 = arith.constant 9.99999974E-6 : f32
    %15 = vector.broadcast %cst_4 : f32 to vector<16x1xf32>
    %16 = arith.addf %12, %15 : vector<16x1xf32>
    %17 = math.rsqrt %16 : vector<16x1xf32>
    %18 = vector.broadcast %17 : vector<16x1xf32> to vector<16x32xf32>
    %19 = arith.mulf %14, %18 : vector<16x32xf32>
    %c0_5 = arith.constant 0 : index
    %c0_6 = arith.constant 0 : index
    %20 = vector.load %arg6[%c0_5, %c0_6] : memref<1x32xf32, #tpu.memory_space<vmem>>, vector<1x32xf32>
    %21 = vector.broadcast %20 : vector<1x32xf32> to vector<16x32xf32>
    %22 = arith.mulf %19, %21 : vector<16x32xf32>
    %c0_7 = arith.constant 0 : index
    %c0_8 = arith.constant 0 : index
    %23 = vector.load %arg7[%c0_7, %c0_8] : memref<1x32xf32, #tpu.memory_space<vmem>>, vector<1x32xf32>
    %24 = vector.broadcast %23 : vector<1x32xf32> to vector<16x32xf32>
    %25 = arith.addf %22, %24 : vector<16x32xf32>
    %26 = arith.truncf %25 : vector<16x32xf32> to vector<16x32xbf16>
    %c0_9 = arith.constant 0 : index
    %c0_10 = arith.constant 0 : index
    %27 = vector.load %arg4[%c0_9, %c0_10] : memref<32x96xbf16, #tpu.memory_space<vmem>>, vector<32x96xbf16>
    %cst_11 = arith.constant dense<0.000000e+00> : vector<16x96xf32>
    %28 = tpu.matmul %26, %27, %cst_11 {dimension_numbers = #tpu.dot_dimension_numbers<[1], [0], [0], [1], [0, 0, 1, 1], [], []>} : vector<16x32xbf16>, vector<32x96xbf16>, vector<16x96xf32> -> vector<16x96xf32>
    %c0_12 = arith.constant 0 : index
    %c0_13 = arith.constant 0 : index
    %29 = vector.load %arg5[%c0_12, %c0_13] : memref<1x96xf32, #tpu.memory_space<vmem>>, vector<1x96xf32>
    %30 = vector.broadcast %29 : vector<1x96xf32> to vector<16x96xf32>
    %31 = arith.addf %28, %30 : vector<16x96xf32>
    %32 = arith.truncf %31 : vector<16x96xf32> to vector<16x96xbf16>
    %c0_14 = arith.constant 0 : index
    %c0_15 = arith.constant 0 : index
    %33 = vector.load %arg8[%c0_14, %c0_15] : memref<16x96xbf16, #tpu.memory_space<vmem>>, vector<16x96xbf16>
    tpu.vector_store %arg8[%c0_14, %c0_15], %32 {strides = array<i32>} : memref<16x96xbf16, #tpu.memory_space<vmem>>, vector<16x96xbf16>,
    return
  }
  func.func @transform_0(%arg0: i32, %arg1: i32, %arg2: i32) -> (i32, i32) {
    %c0_i32 = arith.constant 0 : i32
    return %arg0, %arg2 : i32, i32
  }
  func.func @transform_1(%arg0: i32, %arg1: i32, %arg2: i32) -> (i32, i32) {
    %c0_i32 = arith.constant 0 : i32
    return %arg2, %arg1 : i32, i32
  }
  func.func @transform_2(%arg0: i32, %arg1: i32, %arg2: i32) -> (i32, i32) {
    %c0_i32 = arith.constant 0 : i32
    %c0_i32_0 = arith.constant 0 : i32
    return %c0_i32, %arg1 : i32, i32
  }
  func.func @transform_3(%arg0: i32, %arg1: i32, %arg2: i32) -> (i32, i32) {
    %c0_i32 = arith.constant 0 : i32
    %c0_i32_0 = arith.constant 0 : i32
    %c0_i32_1 = arith.constant 0 : i32
    return %c0_i32, %c0_i32_0 : i32, i32
  }
  func.func @transform_4(%arg0: i32, %arg1: i32, %arg2: i32) -> (i32, i32) {
    %c0_i32 = arith.constant 0 : i32
    %c0_i32_0 = arith.constant 0 : i32
    %c0_i32_1 = arith.constant 0 : i32
    return %c0_i32, %c0_i32_0 : i32, i32
  }
  func.func @transform_5(%arg0: i32, %arg1: i32, %arg2: i32) -> (i32, i32) {
    %c0_i32 = arith.constant 0 : i32
    return %arg0, %arg1 : i32, i32
  }
}

module attributes {stable_mosaic.version = 11 : i64} {
  func.func @_ff_module_kernel(%arg0: i32, %arg1: memref<16x32xbf16, #tpu.memory_space<vmem>>, %arg2: memref<32x128xbf16, #tpu.memory_space<vmem>>, %arg3: memref<1x128xf32, #tpu.memory_space<vmem>>, %arg4: memref<128x32xbf16, #tpu.memory_space<vmem>>, %arg5: memref<1x32xf32, #tpu.memory_space<vmem>>, %arg6: memref<1x32xf32, #tpu.memory_space<vmem>>, %arg7: memref<1x32xf32, #tpu.memory_space<vmem>>, %arg8: memref<16x32xbf16, #tpu.memory_space<vmem>>) attributes {dimension_semantics = [#tpu.dimension_semantics<parallel>], iteration_bounds = array<i64: 1>, scalar_prefetch = 0 : i64, scratch_operands = 0 : i64, tpu.core_type = #tpu.core_type<tc>, window_params = [{transform_indices = @transform_0, window_bounds = array<i64: 16, 32>}, {pipeline_mode = #tpu.pipeline_mode<synchronous>, transform_indices = @transform_1, window_bounds = array<i64: 32, 128>}, {pipeline_mode = #tpu.pipeline_mode<synchronous>, transform_indices = @transform_2, window_bounds = array<i64: 1, 128>}, {pipeline_mode = #tpu.pipeline_mode<synchronous>, transform_indices = @transform_3, window_bounds = array<i64: 128, 32>}, {pipeline_mode = #tpu.pipeline_mode<synchronous>, transform_indices = @transform_4, window_bounds = array<i64: 1, 32>}, {pipeline_mode = #tpu.pipeline_mode<synchronous>, transform_indices = @transform_5, window_bounds = array<i64: 1, 32>}, {pipeline_mode = #tpu.pipeline_mode<synchronous>, transform_indices = @transform_6, window_bounds = array<i64: 1, 32>}, {transform_indices = @transform_7, window_bounds = array<i64: 16, 32>}]} {
    %c0 = arith.constant 0 : index
    %c0_0 = arith.constant 0 : index
    %0 = vector.load %arg1[%c0, %c0_0] : memref<16x32xbf16, #tpu.memory_space<vmem>>, vector<16x32xbf16>
    %1 = arith.extf %0 : vector<16x32xbf16> to vector<16x32xf32>
    %cst = arith.constant dense<0.000000e+00> : vector<16xf32>
    %2 = vector.multi_reduction <add>, %1, %cst [1] : vector<16x32xf32> to vector<16xf32>
    %3 = vector.shape_cast %2 : vector<16xf32> to vector<16x1xf32>
    %cst_1 = arith.constant 3.200000e+01 : f32
    %4 = vector.broadcast %cst_1 : f32 to vector<16x1xf32>
    %5 = arith.divf %3, %4 : vector<16x1xf32>
    %6 = vector.broadcast %5 : vector<16x1xf32> to vector<16x32xf32>
    %7 = arith.subf %1, %6 : vector<16x32xf32>
    %8 = arith.mulf %7, %7 : vector<16x32xf32>
    %cst_2 = arith.constant dense<0.000000e+00> : vector<16xf32>
    %9 = vector.multi_reduction <add>, %8, %cst_2 [1] : vector<16x32xf32> to vector<16xf32>
    %10 = vector.shape_cast %9 : vector<16xf32> to vector<16x1xf32>
    %cst_3 = arith.constant 3.200000e+01 : f32
    %11 = vector.broadcast %cst_3 : f32 to vector<16x1xf32>
    %12 = arith.divf %10, %11 : vector<16x1xf32>
    %13 = vector.broadcast %5 : vector<16x1xf32> to vector<16x32xf32>
    %14 = arith.subf %1, %13 : vector<16x32xf32>
    %cst_4 = arith.constant 9.99999974E-6 : f32
    %15 = vector.broadcast %cst_4 : f32 to vector<16x1xf32>
    %16 = arith.addf %12, %15 : vector<16x1xf32>
    %17 = math.rsqrt %16 : vector<16x1xf32>
    %18 = vector.broadcast %17 : vector<16x1xf32> to vector<16x32xf32>
    %19 = arith.mulf %14, %18 : vector<16x32xf32>
    %c0_5 = arith.constant 0 : index
    %c0_6 = arith.constant 0 : index
    %20 = vector.load %arg6[%c0_5, %c0_6] : memref<1x32xf32, #tpu.memory_space<vmem>>, vector<1x32xf32>
    %21 = vector.broadcast %20 : vector<1x32xf32> to vector<16x32xf32>
    %22 = arith.mulf %19, %21 : vector<16x32xf32>
    %c0_7 = arith.constant 0 : index
    %c0_8 = arith.constant 0 : index
    %23 = vector.load %arg7[%c0_7, %c0_8] : memref<1x32xf32, #tpu.memory_space<vmem>>, vector<1x32xf32>
    %24 = vector.broadcast %23 : vector<1x32xf32> to vector<16x32xf32>
    %25 = arith.addf %22, %24 : vector<16x32xf32>
    %26 = arith.truncf %25 : vector<16x32xf32> to vector<16x32xbf16>
    %c0_9 = arith.constant 0 : index
    %c0_10 = arith.constant 0 : index
    %27 = vector.load %arg2[%c0_9, %c0_10] : memref<32x128xbf16, #tpu.memory_space<vmem>>, vector<32x128xbf16>
    %cst_11 = arith.constant dense<0.000000e+00> : vector<16x128xf32>
    %28 = tpu.matmul %26, %27, %cst_11 {dimension_numbers = #tpu.dot_dimension_numbers<[1], [0], [0], [1], [0, 0, 1, 1], [], []>} : vector<16x32xbf16>, vector<32x128xbf16>, vector<16x128xf32> -> vector<16x128xf32>
    %c0_12 = arith.constant 0 : index
    %c0_13 = arith.constant 0 : index
    %29 = vector.load %arg3[%c0_12, %c0_13] : memref<1x128xf32, #tpu.memory_space<vmem>>, vector<1x128xf32>
    %30 = vector.broadcast %29 : vector<1x128xf32> to vector<16x128xf32>
    %31 = arith.addf %28, %30 : vector<16x128xf32>
    %32 = arith.negf %31 : vector<16x128xf32>
    %33 = math.exp %32 : vector<16x128xf32>
    %cst_14 = arith.constant 1.000000e+00 : f32
    %34 = vector.broadcast %cst_14 : f32 to vector<16x128xf32>
    %35 = arith.addf %34, %33 : vector<16x128xf32>
    %36 = arith.divf %34, %35 : vector<16x128xf32>
    %37 = arith.mulf %31, %36 : vector<16x128xf32>
    %38 = arith.truncf %37 : vector<16x128xf32> to vector<16x128xbf16>
    %c0_15 = arith.constant 0 : index
    %c0_16 = arith.constant 0 : index
    %39 = vector.load %arg4[%c0_15, %c0_16] : memref<128x32xbf16, #tpu.memory_space<vmem>>, vector<128x32xbf16>
    %cst_17 = arith.constant dense<0.000000e+00> : vector<16x32xf32>
    %40 = tpu.matmul %38, %39, %cst_17 {dimension_numbers = #tpu.dot_dimension_numbers<[1], [0], [0], [1], [0, 0, 1, 1], [], []>} : vector<16x128xbf16>, vector<128x32xbf16>, vector<16x32xf32> -> vector<16x32xf32>
    %c0_18 = arith.constant 0 : index
    %c0_19 = arith.constant 0 : index
    %41 = vector.load %arg5[%c0_18, %c0_19] : memref<1x32xf32, #tpu.memory_space<vmem>>, vector<1x32xf32>
    %42 = vector.broadcast %41 : vector<1x32xf32> to vector<16x32xf32>
    %43 = arith.addf %40, %42 : vector<16x32xf32>
    %cst_20 = arith.constant 5.000000e-01 : f32
    %44 = vector.broadcast %cst_20 : f32 to vector<16x32xf32>
    %45 = arith.mulf %44, %43 : vector<16x32xf32>
    %46 = arith.addf %1, %45 : vector<16x32xf32>
    %47 = arith.truncf %46 : vector<16x32xf32> to vector<16x32xbf16>
    %c0_21 = arith.constant 0 : index
    %c0_22 = arith.constant 0 : index
    %48 = vector.load %arg8[%c0_21, %c0_22] : memref<16x32xbf16, #tpu.memory_space<vmem>>, vector<16x32xbf16>
    tpu.vector_store %arg8[%c0_21, %c0_22], %47 {strides = array<i32>} : memref<16x32xbf16, #tpu.memory_space<vmem>>, vector<16x32xbf16>,
    return
  }
  func.func @transform_0(%arg0: i32) -> (i32, i32) {
    %c0_i32 = arith.constant 0 : i32
    %c0_i32_0 = arith.constant 0 : i32
    return %arg0, %c0_i32 : i32, i32
  }
  func.func @transform_1(%arg0: i32) -> (i32, i32) {
    %c0_i32 = arith.constant 0 : i32
    %c0_i32_0 = arith.constant 0 : i32
    %c0_i32_1 = arith.constant 0 : i32
    return %c0_i32, %c0_i32_0 : i32, i32
  }
  func.func @transform_2(%arg0: i32) -> (i32, i32) {
    %c0_i32 = arith.constant 0 : i32
    %c0_i32_0 = arith.constant 0 : i32
    %c0_i32_1 = arith.constant 0 : i32
    return %c0_i32, %c0_i32_0 : i32, i32
  }
  func.func @transform_3(%arg0: i32) -> (i32, i32) {
    %c0_i32 = arith.constant 0 : i32
    %c0_i32_0 = arith.constant 0 : i32
    %c0_i32_1 = arith.constant 0 : i32
    return %c0_i32, %c0_i32_0 : i32, i32
  }
  func.func @transform_4(%arg0: i32) -> (i32, i32) {
    %c0_i32 = arith.constant 0 : i32
    %c0_i32_0 = arith.constant 0 : i32
    %c0_i32_1 = arith.constant 0 : i32
    return %c0_i32, %c0_i32_0 : i32, i32
  }
  func.func @transform_5(%arg0: i32) -> (i32, i32) {
    %c0_i32 = arith.constant 0 : i32
    %c0_i32_0 = arith.constant 0 : i32
    %c0_i32_1 = arith.constant 0 : i32
    return %c0_i32, %c0_i32_0 : i32, i32
  }
  func.func @transform_6(%arg0: i32) -> (i32, i32) {
    %c0_i32 = arith.constant 0 : i32
    %c0_i32_0 = arith.constant 0 : i32
    %c0_i32_1 = arith.constant 0 : i32
    return %c0_i32, %c0_i32_0 : i32, i32
  }
  func.func @transform_7(%arg0: i32) -> (i32, i32) {
    %c0_i32 = arith.constant 0 : i32
    %c0_i32_0 = arith.constant 0 : i32
    return %arg0, %c0_i32 : i32, i32
  }
}

module attributes {stable_mosaic.version = 11 : i64} {
  func.func @_flash_attn_kernel(%arg0: i32, %arg1: i32, %arg2: i32, %arg3: memref<1x8x96xbf16, #tpu.memory_space<vmem>>, %arg4: memref<1x8x96xbf16, #tpu.memory_space<vmem>>, %arg5: memref<1x8x32xbf16, #tpu.memory_space<vmem>>, %arg6: memref<8x8xf32, #tpu.memory_space<vmem>>, %arg7: memref<8x8xf32, #tpu.memory_space<vmem>>, %arg8: memref<8x32xf32, #tpu.memory_space<vmem>>) attributes {dimension_semantics = [#tpu.dimension_semantics<parallel>, #tpu.dimension_semantics<parallel>, #tpu.dimension_semantics<arbitrary>], iteration_bounds = array<i64: 2, 1, 1>, scalar_prefetch = 0 : i64, scratch_operands = 3 : i64, tpu.core_type = #tpu.core_type<tc>, window_params = [{transform_indices = @transform_0, window_bounds = array<i64: 1, 8, 96>}, {transform_indices = @transform_1, window_bounds = array<i64: 1, 8, 96>}, {transform_indices = @transform_2, window_bounds = array<i64: 1, 8, 32>}]} {
    %c0_i32 = arith.constant 0 : i32
    %0 = arith.cmpi eq, %arg2, %c0_i32 : i32
    %1 = arith.extui %0 : i1 to i32
    %c0_i32_0 = arith.constant 0 : i32
    %2 = arith.cmpi ne, %1, %c0_i32_0 : i32
    scf.if %2 {
      %cst_124 = arith.constant 0xFF800000 : f32
      %232 = vector.broadcast %cst_124 : f32 to vector<8x8xf32>
      %c0_125 = arith.constant 0 : index
      %c0_126 = arith.constant 0 : index
      %233 = vector.load %arg6[%c0_125, %c0_126] : memref<8x8xf32, #tpu.memory_space<vmem>>, vector<8x8xf32>
      tpu.vector_store %arg6[%c0_125, %c0_126], %232 {strides = array<i32>} : memref<8x8xf32, #tpu.memory_space<vmem>>, vector<8x8xf32>,
      %cst_127 = arith.constant 0.000000e+00 : f32
      %234 = vector.broadcast %cst_127 : f32 to vector<8x8xf32>
      %c0_128 = arith.constant 0 : index
      %c0_129 = arith.constant 0 : index
      %235 = vector.load %arg7[%c0_128, %c0_129] : memref<8x8xf32, #tpu.memory_space<vmem>>, vector<8x8xf32>
      tpu.vector_store %arg7[%c0_128, %c0_129], %234 {strides = array<i32>} : memref<8x8xf32, #tpu.memory_space<vmem>>, vector<8x8xf32>,
      %cst_130 = arith.constant 0.000000e+00 : f32
      %236 = vector.broadcast %cst_130 : f32 to vector<8x32xf32>
      %c0_131 = arith.constant 0 : index
      %c0_132 = arith.constant 0 : index
      %237 = vector.load %arg8[%c0_131, %c0_132] : memref<8x32xf32, #tpu.memory_space<vmem>>, vector<8x32xf32>
      tpu.vector_store %arg8[%c0_131, %c0_132], %236 {strides = array<i32>} : memref<8x32xf32, #tpu.memory_space<vmem>>, vector<8x32xf32>,
    } else {
    }
    %c0 = arith.constant 0 : index
    %c0_1 = arith.constant 0 : index
    %c0_2 = arith.constant 0 : index
    %3 = vector.load %arg3[%c0, %c0_1, %c0_2] : memref<1x8x96xbf16, #tpu.memory_space<vmem>>, vector<1x8x32xbf16>
    %4 = vector.shape_cast %3 : vector<1x8x32xbf16> to vector<8x32xbf16>
    %5 = arith.extf %4 : vector<8x32xbf16> to vector<8x32xf32>
    %cst = arith.constant 5.000000e-01 : f32
    %6 = vector.broadcast %cst : f32 to vector<8x32xf32>
    %7 = arith.mulf %5, %6 : vector<8x32xf32>
    %8 = arith.truncf %7 : vector<8x32xf32> to vector<8x32xbf16>
    %c0_3 = arith.constant 0 : index
    %c0_4 = arith.constant 0 : index
    %c32 = arith.constant 32 : index
    %9 = vector.load %arg4[%c0_3, %c0_4, %c32] : memref<1x8x96xbf16, #tpu.memory_space<vmem>>, vector<1x8x32xbf16>
    %10 = vector.shape_cast %9 : vector<1x8x32xbf16> to vector<8x32xbf16>
    %c0_5 = arith.constant 0 : index
    %c0_6 = arith.constant 0 : index
    %c64 = arith.constant 64 : index
    %11 = vector.load %arg4[%c0_5, %c0_6, %c64] : memref<1x8x96xbf16, #tpu.memory_space<vmem>>, vector<1x8x32xbf16>
    %12 = vector.shape_cast %11 : vector<1x8x32xbf16> to vector<8x32xbf16>
    %13 = vector.extract_strided_slice %8 {offsets = [0, 0], sizes = [8, 4], strides = [1, 1]} : vector<8x32xbf16> to vector<8x4xbf16>
    %14 = vector.extract_strided_slice %10 {offsets = [0, 0], sizes = [8, 4], strides = [1, 1]} : vector<8x32xbf16> to vector<8x4xbf16>
    %cst_7 = arith.constant dense<0.000000e+00> : vector<8x8xf32>
    %15 = tpu.matmul %13, %14, %cst_7 {dimension_numbers = #tpu.dot_dimension_numbers<[1], [1], [0], [0], [0, 0, 1, 0], [], []>} : vector<8x4xbf16>, vector<8x4xbf16>, vector<8x8xf32> -> vector<8x8xf32>
    %c0_8 = arith.constant 0 : index
    %c0_9 = arith.constant 0 : index
    %16 = vector.load %arg6[%c0_8, %c0_9] : memref<8x8xf32, #tpu.memory_space<vmem>>, vector<8x1xf32>
    %cst_10 = arith.constant dense<0xFF800000> : vector<8xf32>
    %17 = vector.multi_reduction <maximumf>, %15, %cst_10 [1] : vector<8x8xf32> to vector<8xf32>
    %18 = vector.shape_cast %17 : vector<8xf32> to vector<8x1xf32>
    %19 = arith.maximumf %16, %18 : vector<8x1xf32>
    %20 = arith.subf %16, %19 : vector<8x1xf32>
    %21 = math.exp %20 : vector<8x1xf32>
    %22 = vector.broadcast %19 : vector<8x1xf32> to vector<8x8xf32>
    %23 = arith.subf %15, %22 : vector<8x8xf32>
    %24 = math.exp %23 : vector<8x8xf32>
    %c0_11 = arith.constant 0 : index
    %c0_12 = arith.constant 0 : index
    %25 = vector.load %arg7[%c0_11, %c0_12] : memref<8x8xf32, #tpu.memory_space<vmem>>, vector<8x1xf32>
    %26 = arith.mulf %21, %25 : vector<8x1xf32>
    %cst_13 = arith.constant dense<0.000000e+00> : vector<8xf32>
    %27 = vector.multi_reduction <add>, %24, %cst_13 [1] : vector<8x8xf32> to vector<8xf32>
    %28 = vector.shape_cast %27 : vector<8xf32> to vector<8x1xf32>
    %29 = arith.addf %26, %28 : vector<8x1xf32>
    %c0_14 = arith.constant 0 : index
    %c0_15 = arith.constant 0 : index
    %30 = vector.load %arg7[%c0_14, %c0_15] : memref<8x8xf32, #tpu.memory_space<vmem>>, vector<8x1xf32>
    tpu.vector_store %arg7[%c0_14, %c0_15], %29 {strides = array<i32>} : memref<8x8xf32, #tpu.memory_space<vmem>>, vector<8x1xf32>,
    %c0_16 = arith.constant 0 : index
    %c0_17 = arith.constant 0 : index
    %31 = vector.load %arg8[%c0_16, %c0_17] : memref<8x32xf32, #tpu.memory_space<vmem>>, vector<8x4xf32>
    %32 = vector.broadcast %21 : vector<8x1xf32> to vector<8x4xf32>
    %33 = arith.mulf %32, %31 : vector<8x4xf32>
    %34 = arith.truncf %24 : vector<8x8xf32> to vector<8x8xbf16>
    %35 = vector.extract_strided_slice %12 {offsets = [0, 0], sizes = [8, 4], strides = [1, 1]} : vector<8x32xbf16> to vector<8x4xbf16>
    %cst_18 = arith.constant dense<0.000000e+00> : vector<8x4xf32>
    %36 = tpu.matmul %34, %35, %cst_18 {dimension_numbers = #tpu.dot_dimension_numbers<[1], [0], [0], [1], [0, 0, 1, 1], [], []>} : vector<8x8xbf16>, vector<8x4xbf16>, vector<8x4xf32> -> vector<8x4xf32>
    %37 = arith.addf %33, %36 : vector<8x4xf32>
    %c0_19 = arith.constant 0 : index
    %c0_20 = arith.constant 0 : index
    %38 = vector.load %arg8[%c0_19, %c0_20] : memref<8x32xf32, #tpu.memory_space<vmem>>, vector<8x4xf32>
    tpu.vector_store %arg8[%c0_19, %c0_20], %37 {strides = array<i32>} : memref<8x32xf32, #tpu.memory_space<vmem>>, vector<8x4xf32>,
    %c0_21 = arith.constant 0 : index
    %c0_22 = arith.constant 0 : index
    %39 = vector.load %arg6[%c0_21, %c0_22] : memref<8x8xf32, #tpu.memory_space<vmem>>, vector<8x1xf32>
    tpu.vector_store %arg6[%c0_21, %c0_22], %19 {strides = array<i32>} : memref<8x8xf32, #tpu.memory_space<vmem>>, vector<8x1xf32>,
    %40 = vector.extract_strided_slice %8 {offsets = [0, 4], sizes = [8, 4], strides = [1, 1]} : vector<8x32xbf16> to vector<8x4xbf16>
    %41 = vector.extract_strided_slice %10 {offsets = [0, 4], sizes = [8, 4], strides = [1, 1]} : vector<8x32xbf16> to vector<8x4xbf16>
    %cst_23 = arith.constant dense<0.000000e+00> : vector<8x8xf32>
    %42 = tpu.matmul %40, %41, %cst_23 {dimension_numbers = #tpu.dot_dimension_numbers<[1], [1], [0], [0], [0, 0, 1, 0], [], []>} : vector<8x4xbf16>, vector<8x4xbf16>, vector<8x8xf32> -> vector<8x8xf32>
    %c0_24 = arith.constant 0 : index
    %c1 = arith.constant 1 : index
    %43 = vector.load %arg6[%c0_24, %c1] : memref<8x8xf32, #tpu.memory_space<vmem>>, vector<8x1xf32>
    %cst_25 = arith.constant dense<0xFF800000> : vector<8xf32>
    %44 = vector.multi_reduction <maximumf>, %42, %cst_25 [1] : vector<8x8xf32> to vector<8xf32>
    %45 = vector.shape_cast %44 : vector<8xf32> to vector<8x1xf32>
    %46 = arith.maximumf %43, %45 : vector<8x1xf32>
    %47 = arith.subf %43, %46 : vector<8x1xf32>
    %48 = math.exp %47 : vector<8x1xf32>
    %49 = vector.broadcast %46 : vector<8x1xf32> to vector<8x8xf32>
    %50 = arith.subf %42, %49 : vector<8x8xf32>
    %51 = math.exp %50 : vector<8x8xf32>
    %c0_26 = arith.constant 0 : index
    %c1_27 = arith.constant 1 : index
    %52 = vector.load %arg7[%c0_26, %c1_27] : memref<8x8xf32, #tpu.memory_space<vmem>>, vector<8x1xf32>
    %53 = arith.mulf %48, %52 : vector<8x1xf32>
    %cst_28 = arith.constant dense<0.000000e+00> : vector<8xf32>
    %54 = vector.multi_reduction <add>, %51, %cst_28 [1] : vector<8x8xf32> to vector<8xf32>
    %55 = vector.shape_cast %54 : vector<8xf32> to vector<8x1xf32>
    %56 = arith.addf %53, %55 : vector<8x1xf32>
    %c0_29 = arith.constant 0 : index
    %c1_30 = arith.constant 1 : index
    %57 = vector.load %arg7[%c0_29, %c1_30] : memref<8x8xf32, #tpu.memory_space<vmem>>, vector<8x1xf32>
    tpu.vector_store %arg7[%c0_29, %c1_30], %56 {strides = array<i32>} : memref<8x8xf32, #tpu.memory_space<vmem>>, vector<8x1xf32>,
    %c0_31 = arith.constant 0 : index
    %c4 = arith.constant 4 : index
    %58 = vector.load %arg8[%c0_31, %c4] : memref<8x32xf32, #tpu.memory_space<vmem>>, vector<8x4xf32>
    %59 = vector.broadcast %48 : vector<8x1xf32> to vector<8x4xf32>
    %60 = arith.mulf %59, %58 : vector<8x4xf32>
    %61 = arith.truncf %51 : vector<8x8xf32> to vector<8x8xbf16>
    %62 = vector.extract_strided_slice %12 {offsets = [0, 4], sizes = [8, 4], strides = [1, 1]} : vector<8x32xbf16> to vector<8x4xbf16>
    %cst_32 = arith.constant dense<0.000000e+00> : vector<8x4xf32>
    %63 = tpu.matmul %61, %62, %cst_32 {dimension_numbers = #tpu.dot_dimension_numbers<[1], [0], [0], [1], [0, 0, 1, 1], [], []>} : vector<8x8xbf16>, vector<8x4xbf16>, vector<8x4xf32> -> vector<8x4xf32>
    %64 = arith.addf %60, %63 : vector<8x4xf32>
    %c0_33 = arith.constant 0 : index
    %c4_34 = arith.constant 4 : index
    %65 = vector.load %arg8[%c0_33, %c4_34] : memref<8x32xf32, #tpu.memory_space<vmem>>, vector<8x4xf32>
    tpu.vector_store %arg8[%c0_33, %c4_34], %64 {strides = array<i32>} : memref<8x32xf32, #tpu.memory_space<vmem>>, vector<8x4xf32>,
    %c0_35 = arith.constant 0 : index
    %c1_36 = arith.constant 1 : index
    %66 = vector.load %arg6[%c0_35, %c1_36] : memref<8x8xf32, #tpu.memory_space<vmem>>, vector<8x1xf32>
    tpu.vector_store %arg6[%c0_35, %c1_36], %46 {strides = array<i32>} : memref<8x8xf32, #tpu.memory_space<vmem>>, vector<8x1xf32>,
    %67 = vector.extract_strided_slice %8 {offsets = [0, 8], sizes = [8, 4], strides = [1, 1]} : vector<8x32xbf16> to vector<8x4xbf16>
    %68 = vector.extract_strided_slice %10 {offsets = [0, 8], sizes = [8, 4], strides = [1, 1]} : vector<8x32xbf16> to vector<8x4xbf16>
    %cst_37 = arith.constant dense<0.000000e+00> : vector<8x8xf32>
    %69 = tpu.matmul %67, %68, %cst_37 {dimension_numbers = #tpu.dot_dimension_numbers<[1], [1], [0], [0], [0, 0, 1, 0], [], []>} : vector<8x4xbf16>, vector<8x4xbf16>, vector<8x8xf32> -> vector<8x8xf32>
    %c0_38 = arith.constant 0 : index
    %c2 = arith.constant 2 : index
    %70 = vector.load %arg6[%c0_38, %c2] : memref<8x8xf32, #tpu.memory_space<vmem>>, vector<8x1xf32>
    %cst_39 = arith.constant dense<0xFF800000> : vector<8xf32>
    %71 = vector.multi_reduction <maximumf>, %69, %cst_39 [1] : vector<8x8xf32> to vector<8xf32>
    %72 = vector.shape_cast %71 : vector<8xf32> to vector<8x1xf32>
    %73 = arith.maximumf %70, %72 : vector<8x1xf32>
    %74 = arith.subf %70, %73 : vector<8x1xf32>
    %75 = math.exp %74 : vector<8x1xf32>
    %76 = vector.broadcast %73 : vector<8x1xf32> to vector<8x8xf32>
    %77 = arith.subf %69, %76 : vector<8x8xf32>
    %78 = math.exp %77 : vector<8x8xf32>
    %c0_40 = arith.constant 0 : index
    %c2_41 = arith.constant 2 : index
    %79 = vector.load %arg7[%c0_40, %c2_41] : memref<8x8xf32, #tpu.memory_space<vmem>>, vector<8x1xf32>
    %80 = arith.mulf %75, %79 : vector<8x1xf32>
    %cst_42 = arith.constant dense<0.000000e+00> : vector<8xf32>
    %81 = vector.multi_reduction <add>, %78, %cst_42 [1] : vector<8x8xf32> to vector<8xf32>
    %82 = vector.shape_cast %81 : vector<8xf32> to vector<8x1xf32>
    %83 = arith.addf %80, %82 : vector<8x1xf32>
    %c0_43 = arith.constant 0 : index
    %c2_44 = arith.constant 2 : index
    %84 = vector.load %arg7[%c0_43, %c2_44] : memref<8x8xf32, #tpu.memory_space<vmem>>, vector<8x1xf32>
    tpu.vector_store %arg7[%c0_43, %c2_44], %83 {strides = array<i32>} : memref<8x8xf32, #tpu.memory_space<vmem>>, vector<8x1xf32>,
    %c0_45 = arith.constant 0 : index
    %c8 = arith.constant 8 : index
    %85 = vector.load %arg8[%c0_45, %c8] : memref<8x32xf32, #tpu.memory_space<vmem>>, vector<8x4xf32>
    %86 = vector.broadcast %75 : vector<8x1xf32> to vector<8x4xf32>
    %87 = arith.mulf %86, %85 : vector<8x4xf32>
    %88 = arith.truncf %78 : vector<8x8xf32> to vector<8x8xbf16>
    %89 = vector.extract_strided_slice %12 {offsets = [0, 8], sizes = [8, 4], strides = [1, 1]} : vector<8x32xbf16> to vector<8x4xbf16>
    %cst_46 = arith.constant dense<0.000000e+00> : vector<8x4xf32>
    %90 = tpu.matmul %88, %89, %cst_46 {dimension_numbers = #tpu.dot_dimension_numbers<[1], [0], [0], [1], [0, 0, 1, 1], [], []>} : vector<8x8xbf16>, vector<8x4xbf16>, vector<8x4xf32> -> vector<8x4xf32>
    %91 = arith.addf %87, %90 : vector<8x4xf32>
    %c0_47 = arith.constant 0 : index
    %c8_48 = arith.constant 8 : index
    %92 = vector.load %arg8[%c0_47, %c8_48] : memref<8x32xf32, #tpu.memory_space<vmem>>, vector<8x4xf32>
    tpu.vector_store %arg8[%c0_47, %c8_48], %91 {strides = array<i32>} : memref<8x32xf32, #tpu.memory_space<vmem>>, vector<8x4xf32>,
    %c0_49 = arith.constant 0 : index
    %c2_50 = arith.constant 2 : index
    %93 = vector.load %arg6[%c0_49, %c2_50] : memref<8x8xf32, #tpu.memory_space<vmem>>, vector<8x1xf32>
    tpu.vector_store %arg6[%c0_49, %c2_50], %73 {strides = array<i32>} : memref<8x8xf32, #tpu.memory_space<vmem>>, vector<8x1xf32>,
    %94 = vector.extract_strided_slice %8 {offsets = [0, 12], sizes = [8, 4], strides = [1, 1]} : vector<8x32xbf16> to vector<8x4xbf16>
    %95 = vector.extract_strided_slice %10 {offsets = [0, 12], sizes = [8, 4], strides = [1, 1]} : vector<8x32xbf16> to vector<8x4xbf16>
    %cst_51 = arith.constant dense<0.000000e+00> : vector<8x8xf32>
    %96 = tpu.matmul %94, %95, %cst_51 {dimension_numbers = #tpu.dot_dimension_numbers<[1], [1], [0], [0], [0, 0, 1, 0], [], []>} : vector<8x4xbf16>, vector<8x4xbf16>, vector<8x8xf32> -> vector<8x8xf32>
    %c0_52 = arith.constant 0 : index
    %c3 = arith.constant 3 : index
    %97 = vector.load %arg6[%c0_52, %c3] : memref<8x8xf32, #tpu.memory_space<vmem>>, vector<8x1xf32>
    %cst_53 = arith.constant dense<0xFF800000> : vector<8xf32>
    %98 = vector.multi_reduction <maximumf>, %96, %cst_53 [1] : vector<8x8xf32> to vector<8xf32>
    %99 = vector.shape_cast %98 : vector<8xf32> to vector<8x1xf32>
    %100 = arith.maximumf %97, %99 : vector<8x1xf32>
    %101 = arith.subf %97, %100 : vector<8x1xf32>
    %102 = math.exp %101 : vector<8x1xf32>
    %103 = vector.broadcast %100 : vector<8x1xf32> to vector<8x8xf32>
    %104 = arith.subf %96, %103 : vector<8x8xf32>
    %105 = math.exp %104 : vector<8x8xf32>
    %c0_54 = arith.constant 0 : index
    %c3_55 = arith.constant 3 : index
    %106 = vector.load %arg7[%c0_54, %c3_55] : memref<8x8xf32, #tpu.memory_space<vmem>>, vector<8x1xf32>
    %107 = arith.mulf %102, %106 : vector<8x1xf32>
    %cst_56 = arith.constant dense<0.000000e+00> : vector<8xf32>
    %108 = vector.multi_reduction <add>, %105, %cst_56 [1] : vector<8x8xf32> to vector<8xf32>
    %109 = vector.shape_cast %108 : vector<8xf32> to vector<8x1xf32>
    %110 = arith.addf %107, %109 : vector<8x1xf32>
    %c0_57 = arith.constant 0 : index
    %c3_58 = arith.constant 3 : index
    %111 = vector.load %arg7[%c0_57, %c3_58] : memref<8x8xf32, #tpu.memory_space<vmem>>, vector<8x1xf32>
    tpu.vector_store %arg7[%c0_57, %c3_58], %110 {strides = array<i32>} : memref<8x8xf32, #tpu.memory_space<vmem>>, vector<8x1xf32>,
    %c0_59 = arith.constant 0 : index
    %c12 = arith.constant 12 : index
    %112 = vector.load %arg8[%c0_59, %c12] : memref<8x32xf32, #tpu.memory_space<vmem>>, vector<8x4xf32>
    %113 = vector.broadcast %102 : vector<8x1xf32> to vector<8x4xf32>
    %114 = arith.mulf %113, %112 : vector<8x4xf32>
    %115 = arith.truncf %105 : vector<8x8xf32> to vector<8x8xbf16>
    %116 = vector.extract_strided_slice %12 {offsets = [0, 12], sizes = [8, 4], strides = [1, 1]} : vector<8x32xbf16> to vector<8x4xbf16>
    %cst_60 = arith.constant dense<0.000000e+00> : vector<8x4xf32>
    %117 = tpu.matmul %115, %116, %cst_60 {dimension_numbers = #tpu.dot_dimension_numbers<[1], [0], [0], [1], [0, 0, 1, 1], [], []>} : vector<8x8xbf16>, vector<8x4xbf16>, vector<8x4xf32> -> vector<8x4xf32>
    %118 = arith.addf %114, %117 : vector<8x4xf32>
    %c0_61 = arith.constant 0 : index
    %c12_62 = arith.constant 12 : index
    %119 = vector.load %arg8[%c0_61, %c12_62] : memref<8x32xf32, #tpu.memory_space<vmem>>, vector<8x4xf32>
    tpu.vector_store %arg8[%c0_61, %c12_62], %118 {strides = array<i32>} : memref<8x32xf32, #tpu.memory_space<vmem>>, vector<8x4xf32>,
    %c0_63 = arith.constant 0 : index
    %c3_64 = arith.constant 3 : index
    %120 = vector.load %arg6[%c0_63, %c3_64] : memref<8x8xf32, #tpu.memory_space<vmem>>, vector<8x1xf32>
    tpu.vector_store %arg6[%c0_63, %c3_64], %100 {strides = array<i32>} : memref<8x8xf32, #tpu.memory_space<vmem>>, vector<8x1xf32>,
    %121 = vector.extract_strided_slice %8 {offsets = [0, 16], sizes = [8, 4], strides = [1, 1]} : vector<8x32xbf16> to vector<8x4xbf16>
    %122 = vector.extract_strided_slice %10 {offsets = [0, 16], sizes = [8, 4], strides = [1, 1]} : vector<8x32xbf16> to vector<8x4xbf16>
    %cst_65 = arith.constant dense<0.000000e+00> : vector<8x8xf32>
    %123 = tpu.matmul %121, %122, %cst_65 {dimension_numbers = #tpu.dot_dimension_numbers<[1], [1], [0], [0], [0, 0, 1, 0], [], []>} : vector<8x4xbf16>, vector<8x4xbf16>, vector<8x8xf32> -> vector<8x8xf32>
    %c0_66 = arith.constant 0 : index
    %c4_67 = arith.constant 4 : index
    %124 = vector.load %arg6[%c0_66, %c4_67] : memref<8x8xf32, #tpu.memory_space<vmem>>, vector<8x1xf32>
    %cst_68 = arith.constant dense<0xFF800000> : vector<8xf32>
    %125 = vector.multi_reduction <maximumf>, %123, %cst_68 [1] : vector<8x8xf32> to vector<8xf32>
    %126 = vector.shape_cast %125 : vector<8xf32> to vector<8x1xf32>
    %127 = arith.maximumf %124, %126 : vector<8x1xf32>
    %128 = arith.subf %124, %127 : vector<8x1xf32>
    %129 = math.exp %128 : vector<8x1xf32>
    %130 = vector.broadcast %127 : vector<8x1xf32> to vector<8x8xf32>
    %131 = arith.subf %123, %130 : vector<8x8xf32>
    %132 = math.exp %131 : vector<8x8xf32>
    %c0_69 = arith.constant 0 : index
    %c4_70 = arith.constant 4 : index
    %133 = vector.load %arg7[%c0_69, %c4_70] : memref<8x8xf32, #tpu.memory_space<vmem>>, vector<8x1xf32>
    %134 = arith.mulf %129, %133 : vector<8x1xf32>
    %cst_71 = arith.constant dense<0.000000e+00> : vector<8xf32>
    %135 = vector.multi_reduction <add>, %132, %cst_71 [1] : vector<8x8xf32> to vector<8xf32>
    %136 = vector.shape_cast %135 : vector<8xf32> to vector<8x1xf32>
    %137 = arith.addf %134, %136 : vector<8x1xf32>
    %c0_72 = arith.constant 0 : index
    %c4_73 = arith.constant 4 : index
    %138 = vector.load %arg7[%c0_72, %c4_73] : memref<8x8xf32, #tpu.memory_space<vmem>>, vector<8x1xf32>
    tpu.vector_store %arg7[%c0_72, %c4_73], %137 {strides = array<i32>} : memref<8x8xf32, #tpu.memory_space<vmem>>, vector<8x1xf32>,
    %c0_74 = arith.constant 0 : index
    %c16 = arith.constant 16 : index
    %139 = vector.load %arg8[%c0_74, %c16] : memref<8x32xf32, #tpu.memory_space<vmem>>, vector<8x4xf32>
    %140 = vector.broadcast %129 : vector<8x1xf32> to vector<8x4xf32>
    %141 = arith.mulf %140, %139 : vector<8x4xf32>
    %142 = arith.truncf %132 : vector<8x8xf32> to vector<8x8xbf16>
    %143 = vector.extract_strided_slice %12 {offsets = [0, 16], sizes = [8, 4], strides = [1, 1]} : vector<8x32xbf16> to vector<8x4xbf16>
    %cst_75 = arith.constant dense<0.000000e+00> : vector<8x4xf32>
    %144 = tpu.matmul %142, %143, %cst_75 {dimension_numbers = #tpu.dot_dimension_numbers<[1], [0], [0], [1], [0, 0, 1, 1], [], []>} : vector<8x8xbf16>, vector<8x4xbf16>, vector<8x4xf32> -> vector<8x4xf32>
    %145 = arith.addf %141, %144 : vector<8x4xf32>
    %c0_76 = arith.constant 0 : index
    %c16_77 = arith.constant 16 : index
    %146 = vector.load %arg8[%c0_76, %c16_77] : memref<8x32xf32, #tpu.memory_space<vmem>>, vector<8x4xf32>
    tpu.vector_store %arg8[%c0_76, %c16_77], %145 {strides = array<i32>} : memref<8x32xf32, #tpu.memory_space<vmem>>, vector<8x4xf32>,
    %c0_78 = arith.constant 0 : index
    %c4_79 = arith.constant 4 : index
    %147 = vector.load %arg6[%c0_78, %c4_79] : memref<8x8xf32, #tpu.memory_space<vmem>>, vector<8x1xf32>
    tpu.vector_store %arg6[%c0_78, %c4_79], %127 {strides = array<i32>} : memref<8x8xf32, #tpu.memory_space<vmem>>, vector<8x1xf32>,
    %148 = vector.extract_strided_slice %8 {offsets = [0, 20], sizes = [8, 4], strides = [1, 1]} : vector<8x32xbf16> to vector<8x4xbf16>
    %149 = vector.extract_strided_slice %10 {offsets = [0, 20], sizes = [8, 4], strides = [1, 1]} : vector<8x32xbf16> to vector<8x4xbf16>
    %cst_80 = arith.constant dense<0.000000e+00> : vector<8x8xf32>
    %150 = tpu.matmul %148, %149, %cst_80 {dimension_numbers = #tpu.dot_dimension_numbers<[1], [1], [0], [0], [0, 0, 1, 0], [], []>} : vector<8x4xbf16>, vector<8x4xbf16>, vector<8x8xf32> -> vector<8x8xf32>
    %c0_81 = arith.constant 0 : index
    %c5 = arith.constant 5 : index
    %151 = vector.load %arg6[%c0_81, %c5] : memref<8x8xf32, #tpu.memory_space<vmem>>, vector<8x1xf32>
    %cst_82 = arith.constant dense<0xFF800000> : vector<8xf32>
    %152 = vector.multi_reduction <maximumf>, %150, %cst_82 [1] : vector<8x8xf32> to vector<8xf32>
    %153 = vector.shape_cast %152 : vector<8xf32> to vector<8x1xf32>
    %154 = arith.maximumf %151, %153 : vector<8x1xf32>
    %155 = arith.subf %151, %154 : vector<8x1xf32>
    %156 = math.exp %155 : vector<8x1xf32>
    %157 = vector.broadcast %154 : vector<8x1xf32> to vector<8x8xf32>
    %158 = arith.subf %150, %157 : vector<8x8xf32>
    %159 = math.exp %158 : vector<8x8xf32>
    %c0_83 = arith.constant 0 : index
    %c5_84 = arith.constant 5 : index
    %160 = vector.load %arg7[%c0_83, %c5_84] : memref<8x8xf32, #tpu.memory_space<vmem>>, vector<8x1xf32>
    %161 = arith.mulf %156, %160 : vector<8x1xf32>
    %cst_85 = arith.constant dense<0.000000e+00> : vector<8xf32>
    %162 = vector.multi_reduction <add>, %159, %cst_85 [1] : vector<8x8xf32> to vector<8xf32>
    %163 = vector.shape_cast %162 : vector<8xf32> to vector<8x1xf32>
    %164 = arith.addf %161, %163 : vector<8x1xf32>
    %c0_86 = arith.constant 0 : index
    %c5_87 = arith.constant 5 : index
    %165 = vector.load %arg7[%c0_86, %c5_87] : memref<8x8xf32, #tpu.memory_space<vmem>>, vector<8x1xf32>
    tpu.vector_store %arg7[%c0_86, %c5_87], %164 {strides = array<i32>} : memref<8x8xf32, #tpu.memory_space<vmem>>, vector<8x1xf32>,
    %c0_88 = arith.constant 0 : index
    %c20 = arith.constant 20 : index
    %166 = vector.load %arg8[%c0_88, %c20] : memref<8x32xf32, #tpu.memory_space<vmem>>, vector<8x4xf32>
    %167 = vector.broadcast %156 : vector<8x1xf32> to vector<8x4xf32>
    %168 = arith.mulf %167, %166 : vector<8x4xf32>
    %169 = arith.truncf %159 : vector<8x8xf32> to vector<8x8xbf16>
    %170 = vector.extract_strided_slice %12 {offsets = [0, 20], sizes = [8, 4], strides = [1, 1]} : vector<8x32xbf16> to vector<8x4xbf16>
    %cst_89 = arith.constant dense<0.000000e+00> : vector<8x4xf32>
    %171 = tpu.matmul %169, %170, %cst_89 {dimension_numbers = #tpu.dot_dimension_numbers<[1], [0], [0], [1], [0, 0, 1, 1], [], []>} : vector<8x8xbf16>, vector<8x4xbf16>, vector<8x4xf32> -> vector<8x4xf32>
    %172 = arith.addf %168, %171 : vector<8x4xf32>
    %c0_90 = arith.constant 0 : index
    %c20_91 = arith.constant 20 : index
    %173 = vector.load %arg8[%c0_90, %c20_91] : memref<8x32xf32, #tpu.memory_space<vmem>>, vector<8x4xf32>
    tpu.vector_store %arg8[%c0_90, %c20_91], %172 {strides = array<i32>} : memref<8x32xf32, #tpu.memory_space<vmem>>, vector<8x4xf32>,
    %c0_92 = arith.constant 0 : index
    %c5_93 = arith.constant 5 : index
    %174 = vector.load %arg6[%c0_92, %c5_93] : memref<8x8xf32, #tpu.memory_space<vmem>>, vector<8x1xf32>
    tpu.vector_store %arg6[%c0_92, %c5_93], %154 {strides = array<i32>} : memref<8x8xf32, #tpu.memory_space<vmem>>, vector<8x1xf32>,
    %175 = vector.extract_strided_slice %8 {offsets = [0, 24], sizes = [8, 4], strides = [1, 1]} : vector<8x32xbf16> to vector<8x4xbf16>
    %176 = vector.extract_strided_slice %10 {offsets = [0, 24], sizes = [8, 4], strides = [1, 1]} : vector<8x32xbf16> to vector<8x4xbf16>
    %cst_94 = arith.constant dense<0.000000e+00> : vector<8x8xf32>
    %177 = tpu.matmul %175, %176, %cst_94 {dimension_numbers = #tpu.dot_dimension_numbers<[1], [1], [0], [0], [0, 0, 1, 0], [], []>} : vector<8x4xbf16>, vector<8x4xbf16>, vector<8x8xf32> -> vector<8x8xf32>
    %c0_95 = arith.constant 0 : index
    %c6 = arith.constant 6 : index
    %178 = vector.load %arg6[%c0_95, %c6] : memref<8x8xf32, #tpu.memory_space<vmem>>, vector<8x1xf32>
    %cst_96 = arith.constant dense<0xFF800000> : vector<8xf32>
    %179 = vector.multi_reduction <maximumf>, %177, %cst_96 [1] : vector<8x8xf32> to vector<8xf32>
    %180 = vector.shape_cast %179 : vector<8xf32> to vector<8x1xf32>
    %181 = arith.maximumf %178, %180 : vector<8x1xf32>
    %182 = arith.subf %178, %181 : vector<8x1xf32>
    %183 = math.exp %182 : vector<8x1xf32>
    %184 = vector.broadcast %181 : vector<8x1xf32> to vector<8x8xf32>
    %185 = arith.subf %177, %184 : vector<8x8xf32>
    %186 = math.exp %185 : vector<8x8xf32>
    %c0_97 = arith.constant 0 : index
    %c6_98 = arith.constant 6 : index
    %187 = vector.load %arg7[%c0_97, %c6_98] : memref<8x8xf32, #tpu.memory_space<vmem>>, vector<8x1xf32>
    %188 = arith.mulf %183, %187 : vector<8x1xf32>
    %cst_99 = arith.constant dense<0.000000e+00> : vector<8xf32>
    %189 = vector.multi_reduction <add>, %186, %cst_99 [1] : vector<8x8xf32> to vector<8xf32>
    %190 = vector.shape_cast %189 : vector<8xf32> to vector<8x1xf32>
    %191 = arith.addf %188, %190 : vector<8x1xf32>
    %c0_100 = arith.constant 0 : index
    %c6_101 = arith.constant 6 : index
    %192 = vector.load %arg7[%c0_100, %c6_101] : memref<8x8xf32, #tpu.memory_space<vmem>>, vector<8x1xf32>
    tpu.vector_store %arg7[%c0_100, %c6_101], %191 {strides = array<i32>} : memref<8x8xf32, #tpu.memory_space<vmem>>, vector<8x1xf32>,
    %c0_102 = arith.constant 0 : index
    %c24 = arith.constant 24 : index
    %193 = vector.load %arg8[%c0_102, %c24] : memref<8x32xf32, #tpu.memory_space<vmem>>, vector<8x4xf32>
    %194 = vector.broadcast %183 : vector<8x1xf32> to vector<8x4xf32>
    %195 = arith.mulf %194, %193 : vector<8x4xf32>
    %196 = arith.truncf %186 : vector<8x8xf32> to vector<8x8xbf16>
    %197 = vector.extract_strided_slice %12 {offsets = [0, 24], sizes = [8, 4], strides = [1, 1]} : vector<8x32xbf16> to vector<8x4xbf16>
    %cst_103 = arith.constant dense<0.000000e+00> : vector<8x4xf32>
    %198 = tpu.matmul %196, %197, %cst_103 {dimension_numbers = #tpu.dot_dimension_numbers<[1], [0], [0], [1], [0, 0, 1, 1], [], []>} : vector<8x8xbf16>, vector<8x4xbf16>, vector<8x4xf32> -> vector<8x4xf32>
    %199 = arith.addf %195, %198 : vector<8x4xf32>
    %c0_104 = arith.constant 0 : index
    %c24_105 = arith.constant 24 : index
    %200 = vector.load %arg8[%c0_104, %c24_105] : memref<8x32xf32, #tpu.memory_space<vmem>>, vector<8x4xf32>
    tpu.vector_store %arg8[%c0_104, %c24_105], %199 {strides = array<i32>} : memref<8x32xf32, #tpu.memory_space<vmem>>, vector<8x4xf32>,
    %c0_106 = arith.constant 0 : index
    %c6_107 = arith.constant 6 : index
    %201 = vector.load %arg6[%c0_106, %c6_107] : memref<8x8xf32, #tpu.memory_space<vmem>>, vector<8x1xf32>
    tpu.vector_store %arg6[%c0_106, %c6_107], %181 {strides = array<i32>} : memref<8x8xf32, #tpu.memory_space<vmem>>, vector<8x1xf32>,
    %202 = vector.extract_strided_slice %8 {offsets = [0, 28], sizes = [8, 4], strides = [1, 1]} : vector<8x32xbf16> to vector<8x4xbf16>
    %203 = vector.extract_strided_slice %10 {offsets = [0, 28], sizes = [8, 4], strides = [1, 1]} : vector<8x32xbf16> to vector<8x4xbf16>
    %cst_108 = arith.constant dense<0.000000e+00> : vector<8x8xf32>
    %204 = tpu.matmul %202, %203, %cst_108 {dimension_numbers = #tpu.dot_dimension_numbers<[1], [1], [0], [0], [0, 0, 1, 0], [], []>} : vector<8x4xbf16>, vector<8x4xbf16>, vector<8x8xf32> -> vector<8x8xf32>
    %c0_109 = arith.constant 0 : index
    %c7 = arith.constant 7 : index
    %205 = vector.load %arg6[%c0_109, %c7] : memref<8x8xf32, #tpu.memory_space<vmem>>, vector<8x1xf32>
    %cst_110 = arith.constant dense<0xFF800000> : vector<8xf32>
    %206 = vector.multi_reduction <maximumf>, %204, %cst_110 [1] : vector<8x8xf32> to vector<8xf32>
    %207 = vector.shape_cast %206 : vector<8xf32> to vector<8x1xf32>
    %208 = arith.maximumf %205, %207 : vector<8x1xf32>
    %209 = arith.subf %205, %208 : vector<8x1xf32>
    %210 = math.exp %209 : vector<8x1xf32>
    %211 = vector.broadcast %208 : vector<8x1xf32> to vector<8x8xf32>
    %212 = arith.subf %204, %211 : vector<8x8xf32>
    %213 = math.exp %212 : vector<8x8xf32>
    %c0_111 = arith.constant 0 : index
    %c7_112 = arith.constant 7 : index
    %214 = vector.load %arg7[%c0_111, %c7_112] : memref<8x8xf32, #tpu.memory_space<vmem>>, vector<8x1xf32>
    %215 = arith.mulf %210, %214 : vector<8x1xf32>
    %cst_113 = arith.constant dense<0.000000e+00> : vector<8xf32>
    %216 = vector.multi_reduction <add>, %213, %cst_113 [1] : vector<8x8xf32> to vector<8xf32>
    %217 = vector.shape_cast %216 : vector<8xf32> to vector<8x1xf32>
    %218 = arith.addf %215, %217 : vector<8x1xf32>
    %c0_114 = arith.constant 0 : index
    %c7_115 = arith.constant 7 : index
    %219 = vector.load %arg7[%c0_114, %c7_115] : memref<8x8xf32, #tpu.memory_space<vmem>>, vector<8x1xf32>
    tpu.vector_store %arg7[%c0_114, %c7_115], %218 {strides = array<i32>} : memref<8x8xf32, #tpu.memory_space<vmem>>, vector<8x1xf32>,
    %c0_116 = arith.constant 0 : index
    %c28 = arith.constant 28 : index
    %220 = vector.load %arg8[%c0_116, %c28] : memref<8x32xf32, #tpu.memory_space<vmem>>, vector<8x4xf32>
    %221 = vector.broadcast %210 : vector<8x1xf32> to vector<8x4xf32>
    %222 = arith.mulf %221, %220 : vector<8x4xf32>
    %223 = arith.truncf %213 : vector<8x8xf32> to vector<8x8xbf16>
    %224 = vector.extract_strided_slice %12 {offsets = [0, 28], sizes = [8, 4], strides = [1, 1]} : vector<8x32xbf16> to vector<8x4xbf16>
    %cst_117 = arith.constant dense<0.000000e+00> : vector<8x4xf32>
    %225 = tpu.matmul %223, %224, %cst_117 {dimension_numbers = #tpu.dot_dimension_numbers<[1], [0], [0], [1], [0, 0, 1, 1], [], []>} : vector<8x8xbf16>, vector<8x4xbf16>, vector<8x4xf32> -> vector<8x4xf32>
    %226 = arith.addf %222, %225 : vector<8x4xf32>
    %c0_118 = arith.constant 0 : index
    %c28_119 = arith.constant 28 : index
    %227 = vector.load %arg8[%c0_118, %c28_119] : memref<8x32xf32, #tpu.memory_space<vmem>>, vector<8x4xf32>
    tpu.vector_store %arg8[%c0_118, %c28_119], %226 {strides = array<i32>} : memref<8x32xf32, #tpu.memory_space<vmem>>, vector<8x4xf32>,
    %c0_120 = arith.constant 0 : index
    %c7_121 = arith.constant 7 : index
    %228 = vector.load %arg6[%c0_120, %c7_121] : memref<8x8xf32, #tpu.memory_space<vmem>>, vector<8x1xf32>
    tpu.vector_store %arg6[%c0_120, %c7_121], %208 {strides = array<i32>} : memref<8x8xf32, #tpu.memory_space<vmem>>, vector<8x1xf32>,
    %c0_i32_122 = arith.constant 0 : i32
    %229 = arith.cmpi eq, %arg2, %c0_i32_122 : i32
    %230 = arith.extui %229 : i1 to i32
    %c0_i32_123 = arith.constant 0 : i32
    %231 = arith.cmpi ne, %230, %c0_i32_123 : i32
    scf.if %231 {
      %c0_124 = arith.constant 0 : index
      %c0_125 = arith.constant 0 : index
      %232 = vector.load %arg7[%c0_124, %c0_125] : memref<8x8xf32, #tpu.memory_space<vmem>>, vector<8x8xf32>
      %233 = tpu.reciprocal %232 {approx = true} : vector<8x8xf32> -> vector<8x8xf32>
      %c0_126 = arith.constant 0 : index
      %c0_127 = arith.constant 0 : index
      %234 = vector.load %arg8[%c0_126, %c0_127] : memref<8x32xf32, #tpu.memory_space<vmem>>, vector<8x4xf32>
      %235 = vector.extract_strided_slice %233 {offsets = [0, 0], sizes = [8, 1], strides = [1, 1]} : vector<8x8xf32> to vector<8x1xf32>
      %236 = vector.broadcast %235 : vector<8x1xf32> to vector<8x4xf32>
      %237 = arith.mulf %234, %236 : vector<8x4xf32>
      %238 = arith.truncf %237 : vector<8x4xf32> to vector<8x4xbf16>
      %c0_128 = arith.constant 0 : index
      %c0_129 = arith.constant 0 : index
      %c0_130 = arith.constant 0 : index
      %239 = vector.load %arg5[%c0_128, %c0_129, %c0_130] : memref<1x8x32xbf16, #tpu.memory_space<vmem>>, vector<1x8x4xbf16>
      %240 = vector.shape_cast %239 : vector<1x8x4xbf16> to vector<8x4xbf16>
      %241 = vector.shape_cast %238 : vector<8x4xbf16> to vector<1x8x4xbf16>
      tpu.vector_store %arg5[%c0_128, %c0_129, %c0_130], %241 {strides = array<i32>} : memref<1x8x32xbf16, #tpu.memory_space<vmem>>, vector<1x8x4xbf16>,
      %c0_131 = arith.constant 0 : index
      %c4_132 = arith.constant 4 : index
      %242 = vector.load %arg8[%c0_131, %c4_132] : memref<8x32xf32, #tpu.memory_space<vmem>>, vector<8x4xf32>
      %243 = vector.extract_strided_slice %233 {offsets = [0, 1], sizes = [8, 1], strides = [1, 1]} : vector<8x8xf32> to vector<8x1xf32>
      %244 = vector.broadcast %243 : vector<8x1xf32> to vector<8x4xf32>
      %245 = arith.mulf %242, %244 : vector<8x4xf32>
      %246 = arith.truncf %245 : vector<8x4xf32> to vector<8x4xbf16>
      %c0_133 = arith.constant 0 : index
      %c0_134 = arith.constant 0 : index
      %c4_135 = arith.constant 4 : index
      %247 = vector.load %arg5[%c0_133, %c0_134, %c4_135] : memref<1x8x32xbf16, #tpu.memory_space<vmem>>, vector<1x8x4xbf16>
      %248 = vector.shape_cast %247 : vector<1x8x4xbf16> to vector<8x4xbf16>
      %249 = vector.shape_cast %246 : vector<8x4xbf16> to vector<1x8x4xbf16>
      tpu.vector_store %arg5[%c0_133, %c0_134, %c4_135], %249 {strides = array<i32>} : memref<1x8x32xbf16, #tpu.memory_space<vmem>>, vector<1x8x4xbf16>,
      %c0_136 = arith.constant 0 : index
      %c8_137 = arith.constant 8 : index
      %250 = vector.load %arg8[%c0_136, %c8_137] : memref<8x32xf32, #tpu.memory_space<vmem>>, vector<8x4xf32>
      %251 = vector.extract_strided_slice %233 {offsets = [0, 2], sizes = [8, 1], strides = [1, 1]} : vector<8x8xf32> to vector<8x1xf32>
      %252 = vector.broadcast %251 : vector<8x1xf32> to vector<8x4xf32>
      %253 = arith.mulf %250, %252 : vector<8x4xf32>
      %254 = arith.truncf %253 : vector<8x4xf32> to vector<8x4xbf16>
      %c0_138 = arith.constant 0 : index
      %c0_139 = arith.constant 0 : index
      %c8_140 = arith.constant 8 : index
      %255 = vector.load %arg5[%c0_138, %c0_139, %c8_140] : memref<1x8x32xbf16, #tpu.memory_space<vmem>>, vector<1x8x4xbf16>
      %256 = vector.shape_cast %255 : vector<1x8x4xbf16> to vector<8x4xbf16>
      %257 = vector.shape_cast %254 : vector<8x4xbf16> to vector<1x8x4xbf16>
      tpu.vector_store %arg5[%c0_138, %c0_139, %c8_140], %257 {strides = array<i32>} : memref<1x8x32xbf16, #tpu.memory_space<vmem>>, vector<1x8x4xbf16>,
      %c0_141 = arith.constant 0 : index
      %c12_142 = arith.constant 12 : index
      %258 = vector.load %arg8[%c0_141, %c12_142] : memref<8x32xf32, #tpu.memory_space<vmem>>, vector<8x4xf32>
      %259 = vector.extract_strided_slice %233 {offsets = [0, 3], sizes = [8, 1], strides = [1, 1]} : vector<8x8xf32> to vector<8x1xf32>
      %260 = vector.broadcast %259 : vector<8x1xf32> to vector<8x4xf32>
      %261 = arith.mulf %258, %260 : vector<8x4xf32>
      %262 = arith.truncf %261 : vector<8x4xf32> to vector<8x4xbf16>
      %c0_143 = arith.constant 0 : index
      %c0_144 = arith.constant 0 : index
      %c12_145 = arith.constant 12 : index
      %263 = vector.load %arg5[%c0_143, %c0_144, %c12_145] : memref<1x8x32xbf16, #tpu.memory_space<vmem>>, vector<1x8x4xbf16>
      %264 = vector.shape_cast %263 : vector<1x8x4xbf16> to vector<8x4xbf16>
      %265 = vector.shape_cast %262 : vector<8x4xbf16> to vector<1x8x4xbf16>
      tpu.vector_store %arg5[%c0_143, %c0_144, %c12_145], %265 {strides = array<i32>} : memref<1x8x32xbf16, #tpu.memory_space<vmem>>, vector<1x8x4xbf16>,
      %c0_146 = arith.constant 0 : index
      %c16_147 = arith.constant 16 : index
      %266 = vector.load %arg8[%c0_146, %c16_147] : memref<8x32xf32, #tpu.memory_space<vmem>>, vector<8x4xf32>
      %267 = vector.extract_strided_slice %233 {offsets = [0, 4], sizes = [8, 1], strides = [1, 1]} : vector<8x8xf32> to vector<8x1xf32>
      %268 = vector.broadcast %267 : vector<8x1xf32> to vector<8x4xf32>
      %269 = arith.mulf %266, %268 : vector<8x4xf32>
      %270 = arith.truncf %269 : vector<8x4xf32> to vector<8x4xbf16>
      %c0_148 = arith.constant 0 : index
      %c0_149 = arith.constant 0 : index
      %c16_150 = arith.constant 16 : index
      %271 = vector.load %arg5[%c0_148, %c0_149, %c16_150] : memref<1x8x32xbf16, #tpu.memory_space<vmem>>, vector<1x8x4xbf16>
      %272 = vector.shape_cast %271 : vector<1x8x4xbf16> to vector<8x4xbf16>
      %273 = vector.shape_cast %270 : vector<8x4xbf16> to vector<1x8x4xbf16>
      tpu.vector_store %arg5[%c0_148, %c0_149, %c16_150], %273 {strides = array<i32>} : memref<1x8x32xbf16, #tpu.memory_space<vmem>>, vector<1x8x4xbf16>,
      %c0_151 = arith.constant 0 : index
      %c20_152 = arith.constant 20 : index
      %274 = vector.load %arg8[%c0_151, %c20_152] : memref<8x32xf32, #tpu.memory_space<vmem>>, vector<8x4xf32>
      %275 = vector.extract_strided_slice %233 {offsets = [0, 5], sizes = [8, 1], strides = [1, 1]} : vector<8x8xf32> to vector<8x1xf32>
      %276 = vector.broadcast %275 : vector<8x1xf32> to vector<8x4xf32>
      %277 = arith.mulf %274, %276 : vector<8x4xf32>
      %278 = arith.truncf %277 : vector<8x4xf32> to vector<8x4xbf16>
      %c0_153 = arith.constant 0 : index
      %c0_154 = arith.constant 0 : index
      %c20_155 = arith.constant 20 : index
      %279 = vector.load %arg5[%c0_153, %c0_154, %c20_155] : memref<1x8x32xbf16, #tpu.memory_space<vmem>>, vector<1x8x4xbf16>
      %280 = vector.shape_cast %279 : vector<1x8x4xbf16> to vector<8x4xbf16>
      %281 = vector.shape_cast %278 : vector<8x4xbf16> to vector<1x8x4xbf16>
      tpu.vector_store %arg5[%c0_153, %c0_154, %c20_155], %281 {strides = array<i32>} : memref<1x8x32xbf16, #tpu.memory_space<vmem>>, vector<1x8x4xbf16>,
      %c0_156 = arith.constant 0 : index
      %c24_157 = arith.constant 24 : index
      %282 = vector.load %arg8[%c0_156, %c24_157] : memref<8x32xf32, #tpu.memory_space<vmem>>, vector<8x4xf32>
      %283 = vector.extract_strided_slice %233 {offsets = [0, 6], sizes = [8, 1], strides = [1, 1]} : vector<8x8xf32> to vector<8x1xf32>
      %284 = vector.broadcast %283 : vector<8x1xf32> to vector<8x4xf32>
      %285 = arith.mulf %282, %284 : vector<8x4xf32>
      %286 = arith.truncf %285 : vector<8x4xf32> to vector<8x4xbf16>
      %c0_158 = arith.constant 0 : index
      %c0_159 = arith.constant 0 : index
      %c24_160 = arith.constant 24 : index
      %287 = vector.load %arg5[%c0_158, %c0_159, %c24_160] : memref<1x8x32xbf16, #tpu.memory_space<vmem>>, vector<1x8x4xbf16>
      %288 = vector.shape_cast %287 : vector<1x8x4xbf16> to vector<8x4xbf16>
      %289 = vector.shape_cast %286 : vector<8x4xbf16> to vector<1x8x4xbf16>
      tpu.vector_store %arg5[%c0_158, %c0_159, %c24_160], %289 {strides = array<i32>} : memref<1x8x32xbf16, #tpu.memory_space<vmem>>, vector<1x8x4xbf16>,
      %c0_161 = arith.constant 0 : index
      %c28_162 = arith.constant 28 : index
      %290 = vector.load %arg8[%c0_161, %c28_162] : memref<8x32xf32, #tpu.memory_space<vmem>>, vector<8x4xf32>
      %291 = vector.extract_strided_slice %233 {offsets = [0, 7], sizes = [8, 1], strides = [1, 1]} : vector<8x8xf32> to vector<8x1xf32>
      %292 = vector.broadcast %291 : vector<8x1xf32> to vector<8x4xf32>
      %293 = arith.mulf %290, %292 : vector<8x4xf32>
      %294 = arith.truncf %293 : vector<8x4xf32> to vector<8x4xbf16>
      %c0_163 = arith.constant 0 : index
      %c0_164 = arith.constant 0 : index
      %c28_165 = arith.constant 28 : index
      %295 = vector.load %arg5[%c0_163, %c0_164, %c28_165] : memref<1x8x32xbf16, #tpu.memory_space<vmem>>, vector<1x8x4xbf16>
      %296 = vector.shape_cast %295 : vector<1x8x4xbf16> to vector<8x4xbf16>
      %297 = vector.shape_cast %294 : vector<8x4xbf16> to vector<1x8x4xbf16>
      tpu.vector_store %arg5[%c0_163, %c0_164, %c28_165], %297 {strides = array<i32>} : memref<1x8x32xbf16, #tpu.memory_space<vmem>>, vector<1x8x4xbf16>,
    } else {
    }
    return
  }
  func.func @transform_0(%arg0: i32, %arg1: i32, %arg2: i32) -> (i32, i32, i32) {
    %c0_i32 = arith.constant 0 : i32
    %c0_i32_0 = arith.constant 0 : i32
    return %arg0, %arg1, %c0_i32 : i32, i32, i32
  }
  func.func @transform_1(%arg0: i32, %arg1: i32, %arg2: i32) -> (i32, i32, i32) {
    %c0_i32 = arith.constant 0 : i32
    %c0_i32_0 = arith.constant 0 : i32
    return %arg0, %arg2, %c0_i32 : i32, i32, i32
  }
  func.func @transform_2(%arg0: i32, %arg1: i32, %arg2: i32) -> (i32, i32, i32) {
    %c0_i32 = arith.constant 0 : i32
    %c0_i32_0 = arith.constant 0 : i32
    return %arg0, %arg1, %c0_i32 : i32, i32, i32
  }
}

module attributes {stable_mosaic.version = 11 : i64} {
  func.func @_fused_matmul_kernel(%arg0: i32, %arg1: i32, %arg2: i32, %arg3: memref<16x32xbf16, #tpu.memory_space<vmem>>, %arg4: memref<32x32xbf16, #tpu.memory_space<vmem>>, %arg5: memref<1x32xf32, #tpu.memory_space<vmem>>, %arg6: memref<16x32xbf16, #tpu.memory_space<vmem>>, %arg7: memref<16x32xbf16, #tpu.memory_space<vmem>>) attributes {dimension_semantics = [#tpu.dimension_semantics<parallel>, #tpu.dimension_semantics<parallel>, #tpu.dimension_semantics<arbitrary>], iteration_bounds = array<i64: 1, 1, 1>, scalar_prefetch = 0 : i64, scratch_operands = 0 : i64, tpu.core_type = #tpu.core_type<tc>, window_params = [{transform_indices = @transform_0, window_bounds = array<i64: 16, 32>}, {transform_indices = @transform_1, window_bounds = array<i64: 32, 32>}, {transform_indices = @transform_2, window_bounds = array<i64: 1, 32>}, {transform_indices = @transform_3, window_bounds = array<i64: 16, 32>}, {transform_indices = @transform_4, window_bounds = array<i64: 16, 32>}]} {
    %c0 = arith.constant 0 : index
    %c0_0 = arith.constant 0 : index
    %0 = vector.load %arg3[%c0, %c0_0] : memref<16x32xbf16, #tpu.memory_space<vmem>>, vector<16x32xbf16>
    %c0_1 = arith.constant 0 : index
    %c0_2 = arith.constant 0 : index
    %1 = vector.load %arg4[%c0_1, %c0_2] : memref<32x32xbf16, #tpu.memory_space<vmem>>, vector<32x32xbf16>
    %cst = arith.constant dense<0.000000e+00> : vector<16x32xf32>
    %2 = tpu.matmul %0, %1, %cst {dimension_numbers = #tpu.dot_dimension_numbers<[1], [0], [0], [1], [0, 0, 1, 1], [], []>} : vector<16x32xbf16>, vector<32x32xbf16>, vector<16x32xf32> -> vector<16x32xf32>
    %c0_3 = arith.constant 0 : index
    %c0_4 = arith.constant 0 : index
    %3 = vector.load %arg5[%c0_3, %c0_4] : memref<1x32xf32, #tpu.memory_space<vmem>>, vector<1x32xf32>
    %4 = vector.broadcast %3 : vector<1x32xf32> to vector<16x32xf32>
    %5 = arith.addf %2, %4 : vector<16x32xf32>
    %c0_5 = arith.constant 0 : index
    %c0_6 = arith.constant 0 : index
    %6 = vector.load %arg6[%c0_5, %c0_6] : memref<16x32xbf16, #tpu.memory_space<vmem>>, vector<16x32xbf16>
    %7 = arith.extf %6 : vector<16x32xbf16> to vector<16x32xf32>
    %cst_7 = arith.constant 1.000000e+00 : f32
    %8 = vector.broadcast %cst_7 : f32 to vector<16x32xf32>
    %9 = arith.mulf %8, %7 : vector<16x32xf32>
    %cst_8 = arith.constant 1.000000e+00 : f32
    %10 = vector.broadcast %cst_8 : f32 to vector<16x32xf32>
    %11 = arith.mulf %10, %5 : vector<16x32xf32>
    %12 = arith.addf %9, %11 : vector<16x32xf32>
    %13 = arith.truncf %12 : vector<16x32xf32> to vector<16x32xbf16>
    %c0_9 = arith.constant 0 : index
    %c0_10 = arith.constant 0 : index
    %14 = vector.load %arg7[%c0_9, %c0_10] : memref<16x32xbf16, #tpu.memory_space<vmem>>, vector<16x32xbf16>
    tpu.vector_store %arg7[%c0_9, %c0_10], %13 {strides = array<i32>} : memref<16x32xbf16, #tpu.memory_space<vmem>>, vector<16x32xbf16>,
    return
  }
  func.func @transform_0(%arg0: i32, %arg1: i32, %arg2: i32) -> (i32, i32) {
    %c0_i32 = arith.constant 0 : i32
    return %arg0, %arg2 : i32, i32
  }
  func.func @transform_1(%arg0: i32, %arg1: i32, %arg2: i32) -> (i32, i32) {
    %c0_i32 = arith.constant 0 : i32
    return %arg2, %arg1 : i32, i32
  }
  func.func @transform_2(%arg0: i32, %arg1: i32, %arg2: i32) -> (i32, i32) {
    %c0_i32 = arith.constant 0 : i32
    %c0_i32_0 = arith.constant 0 : i32
    return %c0_i32, %arg1 : i32, i32
  }
  func.func @transform_3(%arg0: i32, %arg1: i32, %arg2: i32) -> (i32, i32) {
    %c0_i32 = arith.constant 0 : i32
    return %arg0, %arg1 : i32, i32
  }
  func.func @transform_4(%arg0: i32, %arg1: i32, %arg2: i32) -> (i32, i32) {
    %c0_i32 = arith.constant 0 : i32
    return %arg0, %arg1 : i32, i32
  }
}

module attributes {stable_mosaic.version = 11 : i64} {
  func.func @_conv_module_kernel(%arg0: i32, %arg1: memref<1x8x32xbf16, #tpu.memory_space<vmem>>, %arg2: memref<1x32xf32, #tpu.memory_space<vmem>>, %arg3: memref<1x32xf32, #tpu.memory_space<vmem>>, %arg4: memref<32x32xbf16, #tpu.memory_space<vmem>>, %arg5: memref<1x32xf32, #tpu.memory_space<vmem>>, %arg6: memref<32x32xbf16, #tpu.memory_space<vmem>>, %arg7: memref<1x32xf32, #tpu.memory_space<vmem>>, %arg8: memref<31x32xf32, #tpu.memory_space<vmem>>, %arg9: memref<1x32xf32, #tpu.memory_space<vmem>>, %arg10: memref<1x32xf32, #tpu.memory_space<vmem>>, %arg11: memref<1x32xf32, #tpu.memory_space<vmem>>, %arg12: memref<32x32xbf16, #tpu.memory_space<vmem>>, %arg13: memref<1x32xf32, #tpu.memory_space<vmem>>, %arg14: memref<1x8x32xbf16, #tpu.memory_space<vmem>>, %arg15: memref<38x32xf32, #tpu.memory_space<vmem>>) attributes {dimension_semantics = [#tpu.dimension_semantics<parallel>], iteration_bounds = array<i64: 2>, scalar_prefetch = 0 : i64, scratch_operands = 1 : i64, tpu.core_type = #tpu.core_type<tc>, window_params = [{transform_indices = @transform_0, window_bounds = array<i64: 1, 8, 32>}, {pipeline_mode = #tpu.pipeline_mode<synchronous>, transform_indices = @transform_1, window_bounds = array<i64: 1, 32>}, {pipeline_mode = #tpu.pipeline_mode<synchronous>, transform_indices = @transform_2, window_bounds = array<i64: 1, 32>}, {pipeline_mode = #tpu.pipeline_mode<synchronous>, transform_indices = @transform_3, window_bounds = array<i64: 32, 32>}, {pipeline_mode = #tpu.pipeline_mode<synchronous>, transform_indices = @transform_4, window_bounds = array<i64: 1, 32>}, {pipeline_mode = #tpu.pipeline_mode<synchronous>, transform_indices = @transform_5, window_bounds = array<i64: 32, 32>}, {pipeline_mode = #tpu.pipeline_mode<synchronous>, transform_indices = @transform_6, window_bounds = array<i64: 1, 32>}, {pipeline_mode = #tpu.pipeline_mode<synchronous>, transform_indices = @transform_7, window_bounds = array<i64: 31, 32>}, {pipeline_mode = #tpu.pipeline_mode<synchronous>, transform_indices = @transform_8, window_bounds = array<i64: 1, 32>}, {pipeline_mode = #tpu.pipeline_mode<synchronous>, transform_indices = @transform_9, window_bounds = array<i64: 1, 32>}, {pipeline_mode = #tpu.pipeline_mode<synchronous>, transform_indices = @transform_10, window_bounds = array<i64: 1, 32>}, {pipeline_mode = #tpu.pipeline_mode<synchronous>, transform_indices = @transform_11, window_bounds = array<i64: 32, 32>}, {pipeline_mode = #tpu.pipeline_mode<synchronous>, transform_indices = @transform_12, window_bounds = array<i64: 1, 32>}, {transform_indices = @transform_13, window_bounds = array<i64: 1, 8, 32>}]} {
    %c0 = arith.constant 0 : index
    %c0_0 = arith.constant 0 : index
    %c0_1 = arith.constant 0 : index
    %0 = vector.load %arg1[%c0, %c0_0, %c0_1] : memref<1x8x32xbf16, #tpu.memory_space<vmem>>, vector<1x8x32xbf16>
    %1 = vector.shape_cast %0 : vector<1x8x32xbf16> to vector<8x32xbf16>
    %2 = arith.extf %1 : vector<8x32xbf16> to vector<8x32xf32>
    %cst = arith.constant dense<0.000000e+00> : vector<8xf32>
    %3 = vector.multi_reduction <add>, %2, %cst [1] : vector<8x32xf32> to vector<8xf32>
    %4 = vector.shape_cast %3 : vector<8xf32> to vector<8x1xf32>
    %cst_2 = arith.constant 3.200000e+01 : f32
    %5 = vector.broadcast %cst_2 : f32 to vector<8x1xf32>
    %6 = arith.divf %4, %5 : vector<8x1xf32>
    %7 = vector.broadcast %6 : vector<8x1xf32> to vector<8x32xf32>
    %8 = arith.subf %2, %7 : vector<8x32xf32>
    %9 = arith.mulf %8, %8 : vector<8x32xf32>
    %cst_3 = arith.constant dense<0.000000e+00> : vector<8xf32>
    %10 = vector.multi_reduction <add>, %9, %cst_3 [1] : vector<8x32xf32> to vector<8xf32>
    %11 = vector.shape_cast %10 : vector<8xf32> to vector<8x1xf32>
    %cst_4 = arith.constant 3.200000e+01 : f32
    %12 = vector.broadcast %cst_4 : f32 to vector<8x1xf32>
    %13 = arith.divf %11, %12 : vector<8x1xf32>
    %14 = vector.broadcast %6 : vector<8x1xf32> to vector<8x32xf32>
    %15 = arith.subf %2, %14 : vector<8x32xf32>
    %cst_5 = arith.constant 9.99999974E-6 : f32
    %16 = vector.broadcast %cst_5 : f32 to vector<8x1xf32>
    %17 = arith.addf %13, %16 : vector<8x1xf32>
    %18 = math.rsqrt %17 : vector<8x1xf32>
    %19 = vector.broadcast %18 : vector<8x1xf32> to vector<8x32xf32>
    %20 = arith.mulf %15, %19 : vector<8x32xf32>
    %c0_6 = arith.constant 0 : index
    %c0_7 = arith.constant 0 : index
    %21 = vector.load %arg2[%c0_6, %c0_7] : memref<1x32xf32, #tpu.memory_space<vmem>>, vector<1x32xf32>
    %22 = vector.broadcast %21 : vector<1x32xf32> to vector<8x32xf32>
    %23 = arith.mulf %20, %22 : vector<8x32xf32>
    %c0_8 = arith.constant 0 : index
    %c0_9 = arith.constant 0 : index
    %24 = vector.load %arg3[%c0_8, %c0_9] : memref<1x32xf32, #tpu.memory_space<vmem>>, vector<1x32xf32>
    %25 = vector.broadcast %24 : vector<1x32xf32> to vector<8x32xf32>
    %26 = arith.addf %23, %25 : vector<8x32xf32>
    %27 = arith.truncf %26 : vector<8x32xf32> to vector<8x32xbf16>
    %c0_10 = arith.constant 0 : index
    %c0_11 = arith.constant 0 : index
    %28 = vector.load %arg4[%c0_10, %c0_11] : memref<32x32xbf16, #tpu.memory_space<vmem>>, vector<32x32xbf16>
    %cst_12 = arith.constant dense<0.000000e+00> : vector<8x32xf32>
    %29 = tpu.matmul %27, %28, %cst_12 {dimension_numbers = #tpu.dot_dimension_numbers<[1], [0], [0], [1], [0, 0, 1, 1], [], []>} : vector<8x32xbf16>, vector<32x32xbf16>, vector<8x32xf32> -> vector<8x32xf32>
    %c0_13 = arith.constant 0 : index
    %c0_14 = arith.constant 0 : index
    %30 = vector.load %arg5[%c0_13, %c0_14] : memref<1x32xf32, #tpu.memory_space<vmem>>, vector<1x32xf32>
    %31 = vector.broadcast %30 : vector<1x32xf32> to vector<8x32xf32>
    %32 = arith.addf %29, %31 : vector<8x32xf32>
    %c0_15 = arith.constant 0 : index
    %c0_16 = arith.constant 0 : index
    %33 = vector.load %arg6[%c0_15, %c0_16] : memref<32x32xbf16, #tpu.memory_space<vmem>>, vector<32x32xbf16>
    %cst_17 = arith.constant dense<0.000000e+00> : vector<8x32xf32>
    %34 = tpu.matmul %27, %33, %cst_17 {dimension_numbers = #tpu.dot_dimension_numbers<[1], [0], [0], [1], [0, 0, 1, 1], [], []>} : vector<8x32xbf16>, vector<32x32xbf16>, vector<8x32xf32> -> vector<8x32xf32>
    %c0_18 = arith.constant 0 : index
    %c0_19 = arith.constant 0 : index
    %35 = vector.load %arg7[%c0_18, %c0_19] : memref<1x32xf32, #tpu.memory_space<vmem>>, vector<1x32xf32>
    %36 = vector.broadcast %35 : vector<1x32xf32> to vector<8x32xf32>
    %37 = arith.addf %34, %36 : vector<8x32xf32>
    %38 = arith.negf %37 : vector<8x32xf32>
    %39 = math.exp %38 : vector<8x32xf32>
    %cst_20 = arith.constant 1.000000e+00 : f32
    %40 = vector.broadcast %cst_20 : f32 to vector<8x32xf32>
    %41 = arith.addf %40, %39 : vector<8x32xf32>
    %42 = arith.divf %40, %41 : vector<8x32xf32>
    %43 = arith.mulf %32, %42 : vector<8x32xf32>
    %cst_21 = arith.constant 0.000000e+00 : f32
    %44 = vector.broadcast %cst_21 : f32 to vector<38x32xf32>
    %c0_22 = arith.constant 0 : index
    %c0_23 = arith.constant 0 : index
    %45 = vector.load %arg15[%c0_22, %c0_23] : memref<38x32xf32, #tpu.memory_space<vmem>>, vector<38x32xf32>
    tpu.vector_store %arg15[%c0_22, %c0_23], %44 {strides = array<i32>} : memref<38x32xf32, #tpu.memory_space<vmem>>, vector<38x32xf32>,
    %c15 = arith.constant 15 : index
    %c0_24 = arith.constant 0 : index
    %46 = vector.load %arg15[%c15, %c0_24] : memref<38x32xf32, #tpu.memory_space<vmem>>, vector<8x32xf32>
    tpu.vector_store %arg15[%c15, %c0_24], %43 {strides = array<i32>} : memref<38x32xf32, #tpu.memory_space<vmem>>, vector<8x32xf32>,
    %cst_25 = arith.constant 0.000000e+00 : f32
    %47 = vector.broadcast %cst_25 : f32 to vector<8x32xf32>
    %c0_26 = arith.constant 0 : index
    %c0_27 = arith.constant 0 : index
    %48 = vector.load %arg15[%c0_26, %c0_27] : memref<38x32xf32, #tpu.memory_space<vmem>>, vector<8x32xf32>
    %c0_28 = arith.constant 0 : index
    %c0_29 = arith.constant 0 : index
    %49 = vector.load %arg8[%c0_28, %c0_29] : memref<31x32xf32, #tpu.memory_space<vmem>>, vector<1x32xf32>
    %50 = vector.broadcast %49 : vector<1x32xf32> to vector<8x32xf32>
    %51 = arith.mulf %48, %50 : vector<8x32xf32>
    %52 = arith.addf %47, %51 : vector<8x32xf32>
    %c1 = arith.constant 1 : index
    %c0_30 = arith.constant 0 : index
    %53 = vector.load %arg15[%c1, %c0_30] : memref<38x32xf32, #tpu.memory_space<vmem>>, vector<8x32xf32>
    %c1_31 = arith.constant 1 : index
    %c0_32 = arith.constant 0 : index
    %54 = vector.load %arg8[%c1_31, %c0_32] : memref<31x32xf32, #tpu.memory_space<vmem>>, vector<1x32xf32>
    %55 = vector.broadcast %54 : vector<1x32xf32> to vector<8x32xf32>
    %56 = arith.mulf %53, %55 : vector<8x32xf32>
    %57 = arith.addf %52, %56 : vector<8x32xf32>
    %c2 = arith.constant 2 : index
    %c0_33 = arith.constant 0 : index
    %58 = vector.load %arg15[%c2, %c0_33] : memref<38x32xf32, #tpu.memory_space<vmem>>, vector<8x32xf32>
    %c2_34 = arith.constant 2 : index
    %c0_35 = arith.constant 0 : index
    %59 = vector.load %arg8[%c2_34, %c0_35] : memref<31x32xf32, #tpu.memory_space<vmem>>, vector<1x32xf32>
    %60 = vector.broadcast %59 : vector<1x32xf32> to vector<8x32xf32>
    %61 = arith.mulf %58, %60 : vector<8x32xf32>
    %62 = arith.addf %57, %61 : vector<8x32xf32>
    %c3 = arith.constant 3 : index
    %c0_36 = arith.constant 0 : index
    %63 = vector.load %arg15[%c3, %c0_36] : memref<38x32xf32, #tpu.memory_space<vmem>>, vector<8x32xf32>
    %c3_37 = arith.constant 3 : index
    %c0_38 = arith.constant 0 : index
    %64 = vector.load %arg8[%c3_37, %c0_38] : memref<31x32xf32, #tpu.memory_space<vmem>>, vector<1x32xf32>
    %65 = vector.broadcast %64 : vector<1x32xf32> to vector<8x32xf32>
    %66 = arith.mulf %63, %65 : vector<8x32xf32>
    %67 = arith.addf %62, %66 : vector<8x32xf32>
    %c4 = arith.constant 4 : index
    %c0_39 = arith.constant 0 : index
    %68 = vector.load %arg15[%c4, %c0_39] : memref<38x32xf32, #tpu.memory_space<vmem>>, vector<8x32xf32>
    %c4_40 = arith.constant 4 : index
    %c0_41 = arith.constant 0 : index
    %69 = vector.load %arg8[%c4_40, %c0_41] : memref<31x32xf32, #tpu.memory_space<vmem>>, vector<1x32xf32>
    %70 = vector.broadcast %69 : vector<1x32xf32> to vector<8x32xf32>
    %71 = arith.mulf %68, %70 : vector<8x32xf32>
    %72 = arith.addf %67, %71 : vector<8x32xf32>
    %c5 = arith.constant 5 : index
    %c0_42 = arith.constant 0 : index
    %73 = vector.load %arg15[%c5, %c0_42] : memref<38x32xf32, #tpu.memory_space<vmem>>, vector<8x32xf32>
    %c5_43 = arith.constant 5 : index
    %c0_44 = arith.constant 0 : index
    %74 = vector.load %arg8[%c5_43, %c0_44] : memref<31x32xf32, #tpu.memory_space<vmem>>, vector<1x32xf32>
    %75 = vector.broadcast %74 : vector<1x32xf32> to vector<8x32xf32>
    %76 = arith.mulf %73, %75 : vector<8x32xf32>
    %77 = arith.addf %72, %76 : vector<8x32xf32>
    %c6 = arith.constant 6 : index
    %c0_45 = arith.constant 0 : index
    %78 = vector.load %arg15[%c6, %c0_45] : memref<38x32xf32, #tpu.memory_space<vmem>>, vector<8x32xf32>
    %c6_46 = arith.constant 6 : index
    %c0_47 = arith.constant 0 : index
    %79 = vector.load %arg8[%c6_46, %c0_47] : memref<31x32xf32, #tpu.memory_space<vmem>>, vector<1x32xf32>
    %80 = vector.broadcast %79 : vector<1x32xf32> to vector<8x32xf32>
    %81 = arith.mulf %78, %80 : vector<8x32xf32>
    %82 = arith.addf %77, %81 : vector<8x32xf32>
    %c7 = arith.constant 7 : index
    %c0_48 = arith.constant 0 : index
    %83 = vector.load %arg15[%c7, %c0_48] : memref<38x32xf32, #tpu.memory_space<vmem>>, vector<8x32xf32>
    %c7_49 = arith.constant 7 : index
    %c0_50 = arith.constant 0 : index
    %84 = vector.load %arg8[%c7_49, %c0_50] : memref<31x32xf32, #tpu.memory_space<vmem>>, vector<1x32xf32>
    %85 = vector.broadcast %84 : vector<1x32xf32> to vector<8x32xf32>
    %86 = arith.mulf %83, %85 : vector<8x32xf32>
    %87 = arith.addf %82, %86 : vector<8x32xf32>
    %c8 = arith.constant 8 : index
    %c0_51 = arith.constant 0 : index
    %88 = vector.load %arg15[%c8, %c0_51] : memref<38x32xf32, #tpu.memory_space<vmem>>, vector<8x32xf32>
    %c8_52 = arith.constant 8 : index
    %c0_53 = arith.constant 0 : index
    %89 = vector.load %arg8[%c8_52, %c0_53] : memref<31x32xf32, #tpu.memory_space<vmem>>, vector<1x32xf32>
    %90 = vector.broadcast %89 : vector<1x32xf32> to vector<8x32xf32>
    %91 = arith.mulf %88, %90 : vector<8x32xf32>
    %92 = arith.addf %87, %91 : vector<8x32xf32>
    %c9 = arith.constant 9 : index
    %c0_54 = arith.constant 0 : index
    %93 = vector.load %arg15[%c9, %c0_54] : memref<38x32xf32, #tpu.memory_space<vmem>>, vector<8x32xf32>
    %c9_55 = arith.constant 9 : index
    %c0_56 = arith.constant 0 : index
    %94 = vector.load %arg8[%c9_55, %c0_56] : memref<31x32xf32, #tpu.memory_space<vmem>>, vector<1x32xf32>
    %95 = vector.broadcast %94 : vector<1x32xf32> to vector<8x32xf32>
    %96 = arith.mulf %93, %95 : vector<8x32xf32>
    %97 = arith.addf %92, %96 : vector<8x32xf32>
    %c10 = arith.constant 10 : index
    %c0_57 = arith.constant 0 : index
    %98 = vector.load %arg15[%c10, %c0_57] : memref<38x32xf32, #tpu.memory_space<vmem>>, vector<8x32xf32>
    %c10_58 = arith.constant 10 : index
    %c0_59 = arith.constant 0 : index
    %99 = vector.load %arg8[%c10_58, %c0_59] : memref<31x32xf32, #tpu.memory_space<vmem>>, vector<1x32xf32>
    %100 = vector.broadcast %99 : vector<1x32xf32> to vector<8x32xf32>
    %101 = arith.mulf %98, %100 : vector<8x32xf32>
    %102 = arith.addf %97, %101 : vector<8x32xf32>
    %c11 = arith.constant 11 : index
    %c0_60 = arith.constant 0 : index
    %103 = vector.load %arg15[%c11, %c0_60] : memref<38x32xf32, #tpu.memory_space<vmem>>, vector<8x32xf32>
    %c11_61 = arith.constant 11 : index
    %c0_62 = arith.constant 0 : index
    %104 = vector.load %arg8[%c11_61, %c0_62] : memref<31x32xf32, #tpu.memory_space<vmem>>, vector<1x32xf32>
    %105 = vector.broadcast %104 : vector<1x32xf32> to vector<8x32xf32>
    %106 = arith.mulf %103, %105 : vector<8x32xf32>
    %107 = arith.addf %102, %106 : vector<8x32xf32>
    %c12 = arith.constant 12 : index
    %c0_63 = arith.constant 0 : index
    %108 = vector.load %arg15[%c12, %c0_63] : memref<38x32xf32, #tpu.memory_space<vmem>>, vector<8x32xf32>
    %c12_64 = arith.constant 12 : index
    %c0_65 = arith.constant 0 : index
    %109 = vector.load %arg8[%c12_64, %c0_65] : memref<31x32xf32, #tpu.memory_space<vmem>>, vector<1x32xf32>
    %110 = vector.broadcast %109 : vector<1x32xf32> to vector<8x32xf32>
    %111 = arith.mulf %108, %110 : vector<8x32xf32>
    %112 = arith.addf %107, %111 : vector<8x32xf32>
    %c13 = arith.constant 13 : index
    %c0_66 = arith.constant 0 : index
    %113 = vector.load %arg15[%c13, %c0_66] : memref<38x32xf32, #tpu.memory_space<vmem>>, vector<8x32xf32>
    %c13_67 = arith.constant 13 : index
    %c0_68 = arith.constant 0 : index
    %114 = vector.load %arg8[%c13_67, %c0_68] : memref<31x32xf32, #tpu.memory_space<vmem>>, vector<1x32xf32>
    %115 = vector.broadcast %114 : vector<1x32xf32> to vector<8x32xf32>
    %116 = arith.mulf %113, %115 : vector<8x32xf32>
    %117 = arith.addf %112, %116 : vector<8x32xf32>
    %c14 = arith.constant 14 : index
    %c0_69 = arith.constant 0 : index
    %118 = vector.load %arg15[%c14, %c0_69] : memref<38x32xf32, #tpu.memory_space<vmem>>, vector<8x32xf32>
    %c14_70 = arith.constant 14 : index
    %c0_71 = arith.constant 0 : index
    %119 = vector.load %arg8[%c14_70, %c0_71] : memref<31x32xf32, #tpu.memory_space<vmem>>, vector<1x32xf32>
    %120 = vector.broadcast %119 : vector<1x32xf32> to vector<8x32xf32>
    %121 = arith.mulf %118, %120 : vector<8x32xf32>
    %122 = arith.addf %117, %121 : vector<8x32xf32>
    %c15_72 = arith.constant 15 : index
    %c0_73 = arith.constant 0 : index
    %123 = vector.load %arg15[%c15_72, %c0_73] : memref<38x32xf32, #tpu.memory_space<vmem>>, vector<8x32xf32>
    %c15_74 = arith.constant 15 : index
    %c0_75 = arith.constant 0 : index
    %124 = vector.load %arg8[%c15_74, %c0_75] : memref<31x32xf32, #tpu.memory_space<vmem>>, vector<1x32xf32>
    %125 = vector.broadcast %124 : vector<1x32xf32> to vector<8x32xf32>
    %126 = arith.mulf %123, %125 : vector<8x32xf32>
    %127 = arith.addf %122, %126 : vector<8x32xf32>
    %c16 = arith.constant 16 : index
    %c0_76 = arith.constant 0 : index
    %128 = vector.load %arg15[%c16, %c0_76] : memref<38x32xf32, #tpu.memory_space<vmem>>, vector<8x32xf32>
    %c16_77 = arith.constant 16 : index
    %c0_78 = arith.constant 0 : index
    %129 = vector.load %arg8[%c16_77, %c0_78] : memref<31x32xf32, #tpu.memory_space<vmem>>, vector<1x32xf32>
    %130 = vector.broadcast %129 : vector<1x32xf32> to vector<8x32xf32>
    %131 = arith.mulf %128, %130 : vector<8x32xf32>
    %132 = arith.addf %127, %131 : vector<8x32xf32>
    %c17 = arith.constant 17 : index
    %c0_79 = arith.constant 0 : index
    %133 = vector.load %arg15[%c17, %c0_79] : memref<38x32xf32, #tpu.memory_space<vmem>>, vector<8x32xf32>
    %c17_80 = arith.constant 17 : index
    %c0_81 = arith.constant 0 : index
    %134 = vector.load %arg8[%c17_80, %c0_81] : memref<31x32xf32, #tpu.memory_space<vmem>>, vector<1x32xf32>
    %135 = vector.broadcast %134 : vector<1x32xf32> to vector<8x32xf32>
    %136 = arith.mulf %133, %135 : vector<8x32xf32>
    %137 = arith.addf %132, %136 : vector<8x32xf32>
    %c18 = arith.constant 18 : index
    %c0_82 = arith.constant 0 : index
    %138 = vector.load %arg15[%c18, %c0_82] : memref<38x32xf32, #tpu.memory_space<vmem>>, vector<8x32xf32>
    %c18_83 = arith.constant 18 : index
    %c0_84 = arith.constant 0 : index
    %139 = vector.load %arg8[%c18_83, %c0_84] : memref<31x32xf32, #tpu.memory_space<vmem>>, vector<1x32xf32>
    %140 = vector.broadcast %139 : vector<1x32xf32> to vector<8x32xf32>
    %141 = arith.mulf %138, %140 : vector<8x32xf32>
    %142 = arith.addf %137, %141 : vector<8x32xf32>
    %c19 = arith.constant 19 : index
    %c0_85 = arith.constant 0 : index
    %143 = vector.load %arg15[%c19, %c0_85] : memref<38x32xf32, #tpu.memory_space<vmem>>, vector<8x32xf32>
    %c19_86 = arith.constant 19 : index
    %c0_87 = arith.constant 0 : index
    %144 = vector.load %arg8[%c19_86, %c0_87] : memref<31x32xf32, #tpu.memory_space<vmem>>, vector<1x32xf32>
    %145 = vector.broadcast %144 : vector<1x32xf32> to vector<8x32xf32>
    %146 = arith.mulf %143, %145 : vector<8x32xf32>
    %147 = arith.addf %142, %146 : vector<8x32xf32>
    %c20 = arith.constant 20 : index
    %c0_88 = arith.constant 0 : index
    %148 = vector.load %arg15[%c20, %c0_88] : memref<38x32xf32, #tpu.memory_space<vmem>>, vector<8x32xf32>
    %c20_89 = arith.constant 20 : index
    %c0_90 = arith.constant 0 : index
    %149 = vector.load %arg8[%c20_89, %c0_90] : memref<31x32xf32, #tpu.memory_space<vmem>>, vector<1x32xf32>
    %150 = vector.broadcast %149 : vector<1x32xf32> to vector<8x32xf32>
    %151 = arith.mulf %148, %150 : vector<8x32xf32>
    %152 = arith.addf %147, %151 : vector<8x32xf32>
    %c21 = arith.constant 21 : index
    %c0_91 = arith.constant 0 : index
    %153 = vector.load %arg15[%c21, %c0_91] : memref<38x32xf32, #tpu.memory_space<vmem>>, vector<8x32xf32>
    %c21_92 = arith.constant 21 : index
    %c0_93 = arith.constant 0 : index
    %154 = vector.load %arg8[%c21_92, %c0_93] : memref<31x32xf32, #tpu.memory_space<vmem>>, vector<1x32xf32>
    %155 = vector.broadcast %154 : vector<1x32xf32> to vector<8x32xf32>
    %156 = arith.mulf %153, %155 : vector<8x32xf32>
    %157 = arith.addf %152, %156 : vector<8x32xf32>
    %c22 = arith.constant 22 : index
    %c0_94 = arith.constant 0 : index
    %158 = vector.load %arg15[%c22, %c0_94] : memref<38x32xf32, #tpu.memory_space<vmem>>, vector<8x32xf32>
    %c22_95 = arith.constant 22 : index
    %c0_96 = arith.constant 0 : index
    %159 = vector.load %arg8[%c22_95, %c0_96] : memref<31x32xf32, #tpu.memory_space<vmem>>, vector<1x32xf32>
    %160 = vector.broadcast %159 : vector<1x32xf32> to vector<8x32xf32>
    %161 = arith.mulf %158, %160 : vector<8x32xf32>
    %162 = arith.addf %157, %161 : vector<8x32xf32>
    %c23 = arith.constant 23 : index
    %c0_97 = arith.constant 0 : index
    %163 = vector.load %arg15[%c23, %c0_97] : memref<38x32xf32, #tpu.memory_space<vmem>>, vector<8x32xf32>
    %c23_98 = arith.constant 23 : index
    %c0_99 = arith.constant 0 : index
    %164 = vector.load %arg8[%c23_98, %c0_99] : memref<31x32xf32, #tpu.memory_space<vmem>>, vector<1x32xf32>
    %165 = vector.broadcast %164 : vector<1x32xf32> to vector<8x32xf32>
    %166 = arith.mulf %163, %165 : vector<8x32xf32>
    %167 = arith.addf %162, %166 : vector<8x32xf32>
    %c24 = arith.constant 24 : index
    %c0_100 = arith.constant 0 : index
    %168 = vector.load %arg15[%c24, %c0_100] : memref<38x32xf32, #tpu.memory_space<vmem>>, vector<8x32xf32>
    %c24_101 = arith.constant 24 : index
    %c0_102 = arith.constant 0 : index
    %169 = vector.load %arg8[%c24_101, %c0_102] : memref<31x32xf32, #tpu.memory_space<vmem>>, vector<1x32xf32>
    %170 = vector.broadcast %169 : vector<1x32xf32> to vector<8x32xf32>
    %171 = arith.mulf %168, %170 : vector<8x32xf32>
    %172 = arith.addf %167, %171 : vector<8x32xf32>
    %c25 = arith.constant 25 : index
    %c0_103 = arith.constant 0 : index
    %173 = vector.load %arg15[%c25, %c0_103] : memref<38x32xf32, #tpu.memory_space<vmem>>, vector<8x32xf32>
    %c25_104 = arith.constant 25 : index
    %c0_105 = arith.constant 0 : index
    %174 = vector.load %arg8[%c25_104, %c0_105] : memref<31x32xf32, #tpu.memory_space<vmem>>, vector<1x32xf32>
    %175 = vector.broadcast %174 : vector<1x32xf32> to vector<8x32xf32>
    %176 = arith.mulf %173, %175 : vector<8x32xf32>
    %177 = arith.addf %172, %176 : vector<8x32xf32>
    %c26 = arith.constant 26 : index
    %c0_106 = arith.constant 0 : index
    %178 = vector.load %arg15[%c26, %c0_106] : memref<38x32xf32, #tpu.memory_space<vmem>>, vector<8x32xf32>
    %c26_107 = arith.constant 26 : index
    %c0_108 = arith.constant 0 : index
    %179 = vector.load %arg8[%c26_107, %c0_108] : memref<31x32xf32, #tpu.memory_space<vmem>>, vector<1x32xf32>
    %180 = vector.broadcast %179 : vector<1x32xf32> to vector<8x32xf32>
    %181 = arith.mulf %178, %180 : vector<8x32xf32>
    %182 = arith.addf %177, %181 : vector<8x32xf32>
    %c27 = arith.constant 27 : index
    %c0_109 = arith.constant 0 : index
    %183 = vector.load %arg15[%c27, %c0_109] : memref<38x32xf32, #tpu.memory_space<vmem>>, vector<8x32xf32>
    %c27_110 = arith.constant 27 : index
    %c0_111 = arith.constant 0 : index
    %184 = vector.load %arg8[%c27_110, %c0_111] : memref<31x32xf32, #tpu.memory_space<vmem>>, vector<1x32xf32>
    %185 = vector.broadcast %184 : vector<1x32xf32> to vector<8x32xf32>
    %186 = arith.mulf %183, %185 : vector<8x32xf32>
    %187 = arith.addf %182, %186 : vector<8x32xf32>
    %c28 = arith.constant 28 : index
    %c0_112 = arith.constant 0 : index
    %188 = vector.load %arg15[%c28, %c0_112] : memref<38x32xf32, #tpu.memory_space<vmem>>, vector<8x32xf32>
    %c28_113 = arith.constant 28 : index
    %c0_114 = arith.constant 0 : index
    %189 = vector.load %arg8[%c28_113, %c0_114] : memref<31x32xf32, #tpu.memory_space<vmem>>, vector<1x32xf32>
    %190 = vector.broadcast %189 : vector<1x32xf32> to vector<8x32xf32>
    %191 = arith.mulf %188, %190 : vector<8x32xf32>
    %192 = arith.addf %187, %191 : vector<8x32xf32>
    %c29 = arith.constant 29 : index
    %c0_115 = arith.constant 0 : index
    %193 = vector.load %arg15[%c29, %c0_115] : memref<38x32xf32, #tpu.memory_space<vmem>>, vector<8x32xf32>
    %c29_116 = arith.constant 29 : index
    %c0_117 = arith.constant 0 : index
    %194 = vector.load %arg8[%c29_116, %c0_117] : memref<31x32xf32, #tpu.memory_space<vmem>>, vector<1x32xf32>
    %195 = vector.broadcast %194 : vector<1x32xf32> to vector<8x32xf32>
    %196 = arith.mulf %193, %195 : vector<8x32xf32>
    %197 = arith.addf %192, %196 : vector<8x32xf32>
    %c30 = arith.constant 30 : index
    %c0_118 = arith.constant 0 : index
    %198 = vector.load %arg15[%c30, %c0_118] : memref<38x32xf32, #tpu.memory_space<vmem>>, vector<8x32xf32>
    %c30_119 = arith.constant 30 : index
    %c0_120 = arith.constant 0 : index
    %199 = vector.load %arg8[%c30_119, %c0_120] : memref<31x32xf32, #tpu.memory_space<vmem>>, vector<1x32xf32>
    %200 = vector.broadcast %199 : vector<1x32xf32> to vector<8x32xf32>
    %201 = arith.mulf %198, %200 : vector<8x32xf32>
    %202 = arith.addf %197, %201 : vector<8x32xf32>
    %c0_121 = arith.constant 0 : index
    %c0_122 = arith.constant 0 : index
    %203 = vector.load %arg9[%c0_121, %c0_122] : memref<1x32xf32, #tpu.memory_space<vmem>>, vector<1x32xf32>
    %204 = vector.broadcast %203 : vector<1x32xf32> to vector<8x32xf32>
    %205 = arith.addf %202, %204 : vector<8x32xf32>
    %c0_123 = arith.constant 0 : index
    %c0_124 = arith.constant 0 : index
    %206 = vector.load %arg10[%c0_123, %c0_124] : memref<1x32xf32, #tpu.memory_space<vmem>>, vector<1x32xf32>
    %207 = vector.broadcast %206 : vector<1x32xf32> to vector<8x32xf32>
    %208 = arith.mulf %205, %207 : vector<8x32xf32>
    %c0_125 = arith.constant 0 : index
    %c0_126 = arith.constant 0 : index
    %209 = vector.load %arg11[%c0_125, %c0_126] : memref<1x32xf32, #tpu.memory_space<vmem>>, vector<1x32xf32>
    %210 = vector.broadcast %209 : vector<1x32xf32> to vector<8x32xf32>
    %211 = arith.addf %208, %210 : vector<8x32xf32>
    %212 = arith.negf %211 : vector<8x32xf32>
    %213 = math.exp %212 : vector<8x32xf32>
    %cst_127 = arith.constant 1.000000e+00 : f32
    %214 = vector.broadcast %cst_127 : f32 to vector<8x32xf32>
    %215 = arith.addf %214, %213 : vector<8x32xf32>
    %216 = arith.divf %214, %215 : vector<8x32xf32>
    %217 = arith.mulf %211, %216 : vector<8x32xf32>
    %218 = arith.truncf %217 : vector<8x32xf32> to vector<8x32xbf16>
    %c0_128 = arith.constant 0 : index
    %c0_129 = arith.constant 0 : index
    %219 = vector.load %arg12[%c0_128, %c0_129] : memref<32x32xbf16, #tpu.memory_space<vmem>>, vector<32x32xbf16>
    %cst_130 = arith.constant dense<0.000000e+00> : vector<8x32xf32>
    %220 = tpu.matmul %218, %219, %cst_130 {dimension_numbers = #tpu.dot_dimension_numbers<[1], [0], [0], [1], [0, 0, 1, 1], [], []>} : vector<8x32xbf16>, vector<32x32xbf16>, vector<8x32xf32> -> vector<8x32xf32>
    %c0_131 = arith.constant 0 : index
    %c0_132 = arith.constant 0 : index
    %221 = vector.load %arg13[%c0_131, %c0_132] : memref<1x32xf32, #tpu.memory_space<vmem>>, vector<1x32xf32>
    %222 = vector.broadcast %221 : vector<1x32xf32> to vector<8x32xf32>
    %223 = arith.addf %220, %222 : vector<8x32xf32>
    %cst_133 = arith.constant 2.000000e+00 : f32
    %224 = vector.broadcast %cst_133 : f32 to vector<8x32xf32>
    %225 = arith.mulf %224, %2 : vector<8x32xf32>
    %226 = arith.addf %225, %223 : vector<8x32xf32>
    %227 = arith.truncf %226 : vector<8x32xf32> to vector<8x32xbf16>
    %c0_134 = arith.constant 0 : index
    %c0_135 = arith.constant 0 : index
    %c0_136 = arith.constant 0 : index
    %228 = vector.load %arg14[%c0_134, %c0_135, %c0_136] : memref<1x8x32xbf16, #tpu.memory_space<vmem>>, vector<1x8x32xbf16>
    %229 = vector.shape_cast %228 : vector<1x8x32xbf16> to vector<8x32xbf16>
    %230 = vector.shape_cast %227 : vector<8x32xbf16> to vector<1x8x32xbf16>
    tpu.vector_store %arg14[%c0_134, %c0_135, %c0_136], %230 {strides = array<i32>} : memref<1x8x32xbf16, #tpu.memory_space<vmem>>, vector<1x8x32xbf16>,
    return
  }
  func.func @transform_0(%arg0: i32) -> (i32, i32, i32) {
    %c0_i32 = arith.constant 0 : i32
    %c0_i32_0 = arith.constant 0 : i32
    %c0_i32_1 = arith.constant 0 : i32
    return %arg0, %c0_i32, %c0_i32_0 : i32, i32, i32
  }
  func.func @transform_1(%arg0: i32) -> (i32, i32) {
    %c0_i32 = arith.constant 0 : i32
    %c0_i32_0 = arith.constant 0 : i32
    %c0_i32_1 = arith.constant 0 : i32
    return %c0_i32, %c0_i32_0 : i32, i32
  }
  func.func @transform_2(%arg0: i32) -> (i32, i32) {
    %c0_i32 = arith.constant 0 : i32
    %c0_i32_0 = arith.constant 0 : i32
    %c0_i32_1 = arith.constant 0 : i32
    return %c0_i32, %c0_i32_0 : i32, i32
  }
  func.func @transform_3(%arg0: i32) -> (i32, i32) {
    %c0_i32 = arith.constant 0 : i32
    %c0_i32_0 = arith.constant 0 : i32
    %c0_i32_1 = arith.constant 0 : i32
    return %c0_i32, %c0_i32_0 : i32, i32
  }
  func.func @transform_4(%arg0: i32) -> (i32, i32) {
    %c0_i32 = arith.constant 0 : i32
    %c0_i32_0 = arith.constant 0 : i32
    %c0_i32_1 = arith.constant 0 : i32
    return %c0_i32, %c0_i32_0 : i32, i32
  }
  func.func @transform_5(%arg0: i32) -> (i32, i32) {
    %c0_i32 = arith.constant 0 : i32
    %c0_i32_0 = arith.constant 0 : i32
    %c0_i32_1 = arith.constant 0 : i32
    return %c0_i32, %c0_i32_0 : i32, i32
  }
  func.func @transform_6(%arg0: i32) -> (i32, i32) {
    %c0_i32 = arith.constant 0 : i32
    %c0_i32_0 = arith.constant 0 : i32
    %c0_i32_1 = arith.constant 0 : i32
    return %c0_i32, %c0_i32_0 : i32, i32
  }
  func.func @transform_7(%arg0: i32) -> (i32, i32) {
    %c0_i32 = arith.constant 0 : i32
    %c0_i32_0 = arith.constant 0 : i32
    %c0_i32_1 = arith.constant 0 : i32
    return %c0_i32, %c0_i32_0 : i32, i32
  }
  func.func @transform_8(%arg0: i32) -> (i32, i32) {
    %c0_i32 = arith.constant 0 : i32
    %c0_i32_0 = arith.constant 0 : i32
    %c0_i32_1 = arith.constant 0 : i32
    return %c0_i32, %c0_i32_0 : i32, i32
  }
  func.func @transform_9(%arg0: i32) -> (i32, i32) {
    %c0_i32 = arith.constant 0 : i32
    %c0_i32_0 = arith.constant 0 : i32
    %c0_i32_1 = arith.constant 0 : i32
    return %c0_i32, %c0_i32_0 : i32, i32
  }
  func.func @transform_10(%arg0: i32) -> (i32, i32) {
    %c0_i32 = arith.constant 0 : i32
    %c0_i32_0 = arith.constant 0 : i32
    %c0_i32_1 = arith.constant 0 : i32
    return %c0_i32, %c0_i32_0 : i32, i32
  }
  func.func @transform_11(%arg0: i32) -> (i32, i32) {
    %c0_i32 = arith.constant 0 : i32
    %c0_i32_0 = arith.constant 0 : i32
    %c0_i32_1 = arith.constant 0 : i32
    return %c0_i32, %c0_i32_0 : i32, i32
  }
  func.func @transform_12(%arg0: i32) -> (i32, i32) {
    %c0_i32 = arith.constant 0 : i32
    %c0_i32_0 = arith.constant 0 : i32
    %c0_i32_1 = arith.constant 0 : i32
    return %c0_i32, %c0_i32_0 : i32, i32
  }
  func.func @transform_13(%arg0: i32) -> (i32, i32, i32) {
    %c0_i32 = arith.constant 0 : i32
    %c0_i32_0 = arith.constant 0 : i32
    %c0_i32_1 = arith.constant 0 : i32
    return %arg0, %c0_i32, %c0_i32_0 : i32, i32, i32
  }
}

module attributes {stable_mosaic.version = 11 : i64} {
  func.func @_ff_module_kernel(%arg0: i32, %arg1: memref<16x32xbf16, #tpu.memory_space<vmem>>, %arg2: memref<32x128xbf16, #tpu.memory_space<vmem>>, %arg3: memref<1x128xf32, #tpu.memory_space<vmem>>, %arg4: memref<128x32xbf16, #tpu.memory_space<vmem>>, %arg5: memref<1x32xf32, #tpu.memory_space<vmem>>, %arg6: memref<1x32xf32, #tpu.memory_space<vmem>>, %arg7: memref<1x32xf32, #tpu.memory_space<vmem>>, %arg8: memref<1x32xf32, #tpu.memory_space<vmem>>, %arg9: memref<1x32xf32, #tpu.memory_space<vmem>>, %arg10: memref<16x32xbf16, #tpu.memory_space<vmem>>) attributes {dimension_semantics = [#tpu.dimension_semantics<parallel>], iteration_bounds = array<i64: 1>, scalar_prefetch = 0 : i64, scratch_operands = 0 : i64, tpu.core_type = #tpu.core_type<tc>, window_params = [{transform_indices = @transform_0, window_bounds = array<i64: 16, 32>}, {pipeline_mode = #tpu.pipeline_mode<synchronous>, transform_indices = @transform_1, window_bounds = array<i64: 32, 128>}, {pipeline_mode = #tpu.pipeline_mode<synchronous>, transform_indices = @transform_2, window_bounds = array<i64: 1, 128>}, {pipeline_mode = #tpu.pipeline_mode<synchronous>, transform_indices = @transform_3, window_bounds = array<i64: 128, 32>}, {pipeline_mode = #tpu.pipeline_mode<synchronous>, transform_indices = @transform_4, window_bounds = array<i64: 1, 32>}, {pipeline_mode = #tpu.pipeline_mode<synchronous>, transform_indices = @transform_5, window_bounds = array<i64: 1, 32>}, {pipeline_mode = #tpu.pipeline_mode<synchronous>, transform_indices = @transform_6, window_bounds = array<i64: 1, 32>}, {pipeline_mode = #tpu.pipeline_mode<synchronous>, transform_indices = @transform_7, window_bounds = array<i64: 1, 32>}, {pipeline_mode = #tpu.pipeline_mode<synchronous>, transform_indices = @transform_8, window_bounds = array<i64: 1, 32>}, {transform_indices = @transform_9, window_bounds = array<i64: 16, 32>}]} {
    %c0 = arith.constant 0 : index
    %c0_0 = arith.constant 0 : index
    %0 = vector.load %arg1[%c0, %c0_0] : memref<16x32xbf16, #tpu.memory_space<vmem>>, vector<16x32xbf16>
    %1 = arith.extf %0 : vector<16x32xbf16> to vector<16x32xf32>
    %cst = arith.constant dense<0.000000e+00> : vector<16xf32>
    %2 = vector.multi_reduction <add>, %1, %cst [1] : vector<16x32xf32> to vector<16xf32>
    %3 = vector.shape_cast %2 : vector<16xf32> to vector<16x1xf32>
    %cst_1 = arith.constant 3.200000e+01 : f32
    %4 = vector.broadcast %cst_1 : f32 to vector<16x1xf32>
    %5 = arith.divf %3, %4 : vector<16x1xf32>
    %6 = vector.broadcast %5 : vector<16x1xf32> to vector<16x32xf32>
    %7 = arith.subf %1, %6 : vector<16x32xf32>
    %8 = arith.mulf %7, %7 : vector<16x32xf32>
    %cst_2 = arith.constant dense<0.000000e+00> : vector<16xf32>
    %9 = vector.multi_reduction <add>, %8, %cst_2 [1] : vector<16x32xf32> to vector<16xf32>
    %10 = vector.shape_cast %9 : vector<16xf32> to vector<16x1xf32>
    %cst_3 = arith.constant 3.200000e+01 : f32
    %11 = vector.broadcast %cst_3 : f32 to vector<16x1xf32>
    %12 = arith.divf %10, %11 : vector<16x1xf32>
    %13 = vector.broadcast %5 : vector<16x1xf32> to vector<16x32xf32>
    %14 = arith.subf %1, %13 : vector<16x32xf32>
    %cst_4 = arith.constant 9.99999974E-6 : f32
    %15 = vector.broadcast %cst_4 : f32 to vector<16x1xf32>
    %16 = arith.addf %12, %15 : vector<16x1xf32>
    %17 = math.rsqrt %16 : vector<16x1xf32>
    %18 = vector.broadcast %17 : vector<16x1xf32> to vector<16x32xf32>
    %19 = arith.mulf %14, %18 : vector<16x32xf32>
    %c0_5 = arith.constant 0 : index
    %c0_6 = arith.constant 0 : index
    %20 = vector.load %arg6[%c0_5, %c0_6] : memref<1x32xf32, #tpu.memory_space<vmem>>, vector<1x32xf32>
    %21 = vector.broadcast %20 : vector<1x32xf32> to vector<16x32xf32>
    %22 = arith.mulf %19, %21 : vector<16x32xf32>
    %c0_7 = arith.constant 0 : index
    %c0_8 = arith.constant 0 : index
    %23 = vector.load %arg7[%c0_7, %c0_8] : memref<1x32xf32, #tpu.memory_space<vmem>>, vector<1x32xf32>
    %24 = vector.broadcast %23 : vector<1x32xf32> to vector<16x32xf32>
    %25 = arith.addf %22, %24 : vector<16x32xf32>
    %26 = arith.truncf %25 : vector<16x32xf32> to vector<16x32xbf16>
    %c0_9 = arith.constant 0 : index
    %c0_10 = arith.constant 0 : index
    %27 = vector.load %arg2[%c0_9, %c0_10] : memref<32x128xbf16, #tpu.memory_space<vmem>>, vector<32x128xbf16>
    %cst_11 = arith.constant dense<0.000000e+00> : vector<16x128xf32>
    %28 = tpu.matmul %26, %27, %cst_11 {dimension_numbers = #tpu.dot_dimension_numbers<[1], [0], [0], [1], [0, 0, 1, 1], [], []>} : vector<16x32xbf16>, vector<32x128xbf16>, vector<16x128xf32> -> vector<16x128xf32>
    %c0_12 = arith.constant 0 : index
    %c0_13 = arith.constant 0 : index
    %29 = vector.load %arg3[%c0_12, %c0_13] : memref<1x128xf32, #tpu.memory_space<vmem>>, vector<1x128xf32>
    %30 = vector.broadcast %29 : vector<1x128xf32> to vector<16x128xf32>
    %31 = arith.addf %28, %30 : vector<16x128xf32>
    %32 = arith.negf %31 : vector<16x128xf32>
    %33 = math.exp %32 : vector<16x128xf32>
    %cst_14 = arith.constant 1.000000e+00 : f32
    %34 = vector.broadcast %cst_14 : f32 to vector<16x128xf32>
    %35 = arith.addf %34, %33 : vector<16x128xf32>
    %36 = arith.divf %34, %35 : vector<16x128xf32>
    %37 = arith.mulf %31, %36 : vector<16x128xf32>
    %38 = arith.truncf %37 : vector<16x128xf32> to vector<16x128xbf16>
    %c0_15 = arith.constant 0 : index
    %c0_16 = arith.constant 0 : index
    %39 = vector.load %arg4[%c0_15, %c0_16] : memref<128x32xbf16, #tpu.memory_space<vmem>>, vector<128x32xbf16>
    %cst_17 = arith.constant dense<0.000000e+00> : vector<16x32xf32>
    %40 = tpu.matmul %38, %39, %cst_17 {dimension_numbers = #tpu.dot_dimension_numbers<[1], [0], [0], [1], [0, 0, 1, 1], [], []>} : vector<16x128xbf16>, vector<128x32xbf16>, vector<16x32xf32> -> vector<16x32xf32>
    %c0_18 = arith.constant 0 : index
    %c0_19 = arith.constant 0 : index
    %41 = vector.load %arg5[%c0_18, %c0_19] : memref<1x32xf32, #tpu.memory_space<vmem>>, vector<1x32xf32>
    %42 = vector.broadcast %41 : vector<1x32xf32> to vector<16x32xf32>
    %43 = arith.addf %40, %42 : vector<16x32xf32>
    %cst_20 = arith.constant 5.000000e-01 : f32
    %44 = vector.broadcast %cst_20 : f32 to vector<16x32xf32>
    %45 = arith.mulf %44, %43 : vector<16x32xf32>
    %46 = arith.addf %1, %45 : vector<16x32xf32>
    %cst_21 = arith.constant dense<0.000000e+00> : vector<16xf32>
    %47 = vector.multi_reduction <add>, %46, %cst_21 [1] : vector<16x32xf32> to vector<16xf32>
    %48 = vector.shape_cast %47 : vector<16xf32> to vector<16x1xf32>
    %cst_22 = arith.constant 3.200000e+01 : f32
    %49 = vector.broadcast %cst_22 : f32 to vector<16x1xf32>
    %50 = arith.divf %48, %49 : vector<16x1xf32>
    %51 = vector.broadcast %50 : vector<16x1xf32> to vector<16x32xf32>
    %52 = arith.subf %46, %51 : vector<16x32xf32>
    %53 = arith.mulf %52, %52 : vector<16x32xf32>
    %cst_23 = arith.constant dense<0.000000e+00> : vector<16xf32>
    %54 = vector.multi_reduction <add>, %53, %cst_23 [1] : vector<16x32xf32> to vector<16xf32>
    %55 = vector.shape_cast %54 : vector<16xf32> to vector<16x1xf32>
    %cst_24 = arith.constant 3.200000e+01 : f32
    %56 = vector.broadcast %cst_24 : f32 to vector<16x1xf32>
    %57 = arith.divf %55, %56 : vector<16x1xf32>
    %58 = vector.broadcast %50 : vector<16x1xf32> to vector<16x32xf32>
    %59 = arith.subf %46, %58 : vector<16x32xf32>
    %cst_25 = arith.constant 9.99999974E-6 : f32
    %60 = vector.broadcast %cst_25 : f32 to vector<16x1xf32>
    %61 = arith.addf %57, %60 : vector<16x1xf32>
    %62 = math.rsqrt %61 : vector<16x1xf32>
    %63 = vector.broadcast %62 : vector<16x1xf32> to vector<16x32xf32>
    %64 = arith.mulf %59, %63 : vector<16x32xf32>
    %c0_26 = arith.constant 0 : index
    %c0_27 = arith.constant 0 : index
    %65 = vector.load %arg8[%c0_26, %c0_27] : memref<1x32xf32, #tpu.memory_space<vmem>>, vector<1x32xf32>
    %66 = vector.broadcast %65 : vector<1x32xf32> to vector<16x32xf32>
    %67 = arith.mulf %64, %66 : vector<16x32xf32>
    %c0_28 = arith.constant 0 : index
    %c0_29 = arith.constant 0 : index
    %68 = vector.load %arg9[%c0_28, %c0_29] : memref<1x32xf32, #tpu.memory_space<vmem>>, vector<1x32xf32>
    %69 = vector.broadcast %68 : vector<1x32xf32> to vector<16x32xf32>
    %70 = arith.addf %67, %69 : vector<16x32xf32>
    %71 = arith.truncf %70 : vector<16x32xf32> to vector<16x32xbf16>
    %c0_30 = arith.constant 0 : index
    %c0_31 = arith.constant 0 : index
    %72 = vector.load %arg10[%c0_30, %c0_31] : memref<16x32xbf16, #tpu.memory_space<vmem>>, vector<16x32xbf16>
    tpu.vector_store %arg10[%c0_30, %c0_31], %71 {strides = array<i32>} : memref<16x32xbf16, #tpu.memory_space<vmem>>, vector<16x32xbf16>,
    return
  }
  func.func @transform_0(%arg0: i32) -> (i32, i32) {
    %c0_i32 = arith.constant 0 : i32
    %c0_i32_0 = arith.constant 0 : i32
    return %arg0, %c0_i32 : i32, i32
  }
  func.func @transform_1(%arg0: i32) -> (i32, i32) {
    %c0_i32 = arith.constant 0 : i32
    %c0_i32_0 = arith.constant 0 : i32
    %c0_i32_1 = arith.constant 0 : i32
    return %c0_i32, %c0_i32_0 : i32, i32
  }
  func.func @transform_2(%arg0: i32) -> (i32, i32) {
    %c0_i32 = arith.constant 0 : i32
    %c0_i32_0 = arith.constant 0 : i32
    %c0_i32_1 = arith.constant 0 : i32
    return %c0_i32, %c0_i32_0 : i32, i32
  }
  func.func @transform_3(%arg0: i32) -> (i32, i32) {
    %c0_i32 = arith.constant 0 : i32
    %c0_i32_0 = arith.constant 0 : i32
    %c0_i32_1 = arith.constant 0 : i32
    return %c0_i32, %c0_i32_0 : i32, i32
  }
  func.func @transform_4(%arg0: i32) -> (i32, i32) {
    %c0_i32 = arith.constant 0 : i32
    %c0_i32_0 = arith.constant 0 : i32
    %c0_i32_1 = arith.constant 0 : i32
    return %c0_i32, %c0_i32_0 : i32, i32
  }
  func.func @transform_5(%arg0: i32) -> (i32, i32) {
    %c0_i32 = arith.constant 0 : i32
    %c0_i32_0 = arith.constant 0 : i32
    %c0_i32_1 = arith.constant 0 : i32
    return %c0_i32, %c0_i32_0 : i32, i32
  }
  func.func @transform_6(%arg0: i32) -> (i32, i32) {
    %c0_i32 = arith.constant 0 : i32
    %c0_i32_0 = arith.constant 0 : i32
    %c0_i32_1 = arith.constant 0 : i32
    return %c0_i32, %c0_i32_0 : i32, i32
  }
  func.func @transform_7(%arg0: i32) -> (i32, i32) {
    %c0_i32 = arith.constant 0 : i32
    %c0_i32_0 = arith.constant 0 : i32
    %c0_i32_1 = arith.constant 0 : i32
    return %c0_i32, %c0_i32_0 : i32, i32
  }
  func.func @transform_8(%arg0: i32) -> (i32, i32) {
    %c0_i32 = arith.constant 0 : i32
    %c0_i32_0 = arith.constant 0 : i32
    %c0_i32_1 = arith.constant 0 : i32
    return %c0_i32, %c0_i32_0 : i32, i32
  }
  func.func @transform_9(%arg0: i32) -> (i32, i32) {
    %c0_i32 = arith.constant 0 : i32
    %c0_i32_0 = arith.constant 0 : i32
    return %arg0, %c0_i32 : i32, i32
  }
}

module attributes {stable_mosaic.version = 11 : i64} {
  func.func @_fused_matmul_kernel(%arg0: i32, %arg1: i32, %arg2: i32, %arg3: memref<16x32xbf16, #tpu.memory_space<vmem>>, %arg4: memref<32x16xbf16, #tpu.memory_space<vmem>>, %arg5: memref<1x16xf32, #tpu.memory_space<vmem>>, %arg6: memref<16x16xf32, #tpu.memory_space<vmem>>) attributes {dimension_semantics = [#tpu.dimension_semantics<parallel>, #tpu.dimension_semantics<parallel>, #tpu.dimension_semantics<arbitrary>], iteration_bounds = array<i64: 1, 1, 1>, scalar_prefetch = 0 : i64, scratch_operands = 0 : i64, tpu.core_type = #tpu.core_type<tc>, window_params = [{transform_indices = @transform_0, window_bounds = array<i64: 16, 32>}, {transform_indices = @transform_1, window_bounds = array<i64: 32, 16>}, {transform_indices = @transform_2, window_bounds = array<i64: 1, 16>}, {transform_indices = @transform_3, window_bounds = array<i64: 16, 16>}]} {
    %c0 = arith.constant 0 : index
    %c0_0 = arith.constant 0 : index
    %0 = vector.load %arg3[%c0, %c0_0] : memref<16x32xbf16, #tpu.memory_space<vmem>>, vector<16x32xbf16>
    %c0_1 = arith.constant 0 : index
    %c0_2 = arith.constant 0 : index
    %1 = vector.load %arg4[%c0_1, %c0_2] : memref<32x16xbf16, #tpu.memory_space<vmem>>, vector<32x16xbf16>
    %cst = arith.constant dense<0.000000e+00> : vector<16x16xf32>
    %2 = tpu.matmul %0, %1, %cst {dimension_numbers = #tpu.dot_dimension_numbers<[1], [0], [0], [1], [0, 0, 1, 1], [], []>} : vector<16x32xbf16>, vector<32x16xbf16>, vector<16x16xf32> -> vector<16x16xf32>
    %c0_3 = arith.constant 0 : index
    %c0_4 = arith.constant 0 : index
    %3 = vector.load %arg5[%c0_3, %c0_4] : memref<1x16xf32, #tpu.memory_space<vmem>>, vector<1x16xf32>
    %4 = vector.broadcast %3 : vector<1x16xf32> to vector<16x16xf32>
    %5 = arith.addf %2, %4 : vector<16x16xf32>
    %cst_5 = arith.constant dense<0xFF800000> : vector<16xf32>
    %6 = vector.multi_reduction <maximumf>, %5, %cst_5 [1] : vector<16x16xf32> to vector<16xf32>
    %7 = vector.shape_cast %6 : vector<16xf32> to vector<16x1xf32>
    %8 = vector.broadcast %7 : vector<16x1xf32> to vector<16x16xf32>
    %9 = arith.subf %5, %8 : vector<16x16xf32>
    %10 = math.exp %9 : vector<16x16xf32>
    %cst_6 = arith.constant dense<0.000000e+00> : vector<16xf32>
    %11 = vector.multi_reduction <add>, %10, %cst_6 [1] : vector<16x16xf32> to vector<16xf32>
    %12 = vector.shape_cast %11 : vector<16xf32> to vector<16x1xf32>
    %13 = math.log %12 : vector<16x1xf32>
    %14 = vector.broadcast %13 : vector<16x1xf32> to vector<16x16xf32>
    %15 = arith.subf %9, %14 : vector<16x16xf32>
    %c0_7 = arith.constant 0 : index
    %c0_8 = arith.constant 0 : index
    %16 = vector.load %arg6[%c0_7, %c0_8] : memref<16x16xf32, #tpu.memory_space<vmem>>, vector<16x16xf32>
    tpu.vector_store %arg6[%c0_7, %c0_8], %15 {strides = array<i32>} : memref<16x16xf32, #tpu.memory_space<vmem>>, vector<16x16xf32>,
    return
  }
  func.func @transform_0(%arg0: i32, %arg1: i32, %arg2: i32) -> (i32, i32) {
    %c0_i32 = arith.constant 0 : i32
    return %arg0, %arg2 : i32, i32
  }
  func.func @transform_1(%arg0: i32, %arg1: i32, %arg2: i32) -> (i32, i32) {
    %c0_i32 = arith.constant 0 : i32
    return %arg2, %arg1 : i32, i32
  }
  func.func @transform_2(%arg0: i32, %arg1: i32, %arg2: i32) -> (i32, i32) {
    %c0_i32 = arith.constant 0 : i32
    %c0_i32_0 = arith.constant 0 : i32
    return %c0_i32, %arg1 : i32, i32
  }
  func.func @transform_3(%arg0: i32, %arg1: i32, %arg2: i32) -> (i32, i32) {
    %c0_i32 = arith.constant 0 : i32
    return %arg0, %arg1 : i32, i32
  }
}

</mosaic_0001>

<bundles_post_ra>
// kernel: _forward_jit.20
= control target key start
LH: loop header
LB: loop body
LE: loop exit
PB: predicated region body
PF: predicated region fallthrough
CT: control target
= control target key end

     0   :  { %v199_v0 = vmov 0.0   ;;  %vm200_vm0 = vmmov 0   ;;  %vm140_vm1 = vcmask 257024   ;;  %s260_s1 = inlined_call_operand.vmem [shape: bf16[128,32], index: 1, kind: input, shape index: {}]   ;;  %s261_s0 = inlined_call_operand.vmem [shape: f32[16,128], index: 0, kind: input, shape index: {}]   ;;  %s262_s2 = inlined_call_operand.vmem [shape: f32[1,32], index: 2, kind: input, shape index: {}]   ;;  %s263_s3 = inlined_call_operand.vmem [shape: bf16[16,32], index: 3, kind: output, shape index: {}]  }
   0x1   :  { %169 = vmatprep.subr.bf16.mxu0 %v199_v0  ;;  %v191_v1 = vld [vmem:[%s260_s1] sm:$0xff]   ;;  %185 = vmatprep.mubr.msk.bf16.mxu0 %vm200_vm0, %v199_v0  ;;  %v192_v2 = vld [vmem:[%s260_s1 + $0x8] sm:$0xff]   ;;  %v193_v3 = vld [vmem:[%s260_s1 + $0x10] sm:$0xff]  }
   0x2   :  { %170 = vmatpush3.bf16.msra.mxu0 %v191_v1  ;;  %v194_v4 = vld [vmem:[%s260_s1 + $0x18] sm:$0xff]   ;;  %v195_v5 = vld [vmem:[%s260_s1 + $0x20] sm:$0xff]   ;;  %v196_v6 = vld [vmem:[%s260_s1 + $0x28] sm:$0xff]  }
   0x3   :  { %171 = vmatprep.subr.bf16.mxu0 %v199_v0  ;;  %v197_v7 = vld [vmem:[%s260_s1 + $0x30] sm:$0xff]   ;;  %v198_v8 = vld [vmem:[%s260_s1 + $0x38] sm:$0xff]   ;;  %v15_v9 = vld [vmem:[%s261_s0] sm:$0xff] }
   0x4   :  { %v16_v10 = vld [vmem:[%s261_s0 + $0x8] sm:$0xff]  ;;  %v147_v12 = vld [vmem:[%s262_s2] ss:$0 sm:$0xff] }
   0x5   :  { %v17_v11 = vpack.c.bf16 %v16_v10, %v15_v9 }
   0x6   :  { %172 = vmatpush3.bf16.msra.mxu0 %v192_v2 }
   0x7   :  { %173 = vmatprep.subr.bf16.mxu0 %v199_v0 }
   0xa   :  { %174 = vmatpush3.bf16.msra.mxu0 %v193_v3 }
   0xb   :  { %175 = vmatprep.subr.bf16.mxu0 %v199_v0 }
   0xe   :  { %176 = vmatpush3.bf16.msra.mxu0 %v194_v4 }
   0xf   :  { %177 = vmatprep.subr.bf16.mxu0 %v199_v0 }
  0x12   :  { %178 = vmatpush3.bf16.msra.mxu0 %v195_v5 }
  0x13   :  { %179 = vmatprep.subr.bf16.mxu0 %v199_v0 }
  0x16   :  { %180 = vmatpush3.bf16.msra.mxu0 %v196_v6 }
  0x17   :  { %181 = vmatprep.subr.bf16.mxu0 %v199_v0 }
  0x1a   :  { %182 = vmatpush3.bf16.msra.mxu0 %v197_v7 }
  0x1b   :  { %183 = vmatprep.subr.bf16.mxu0 %v199_v0 }
  0x1e   :  { %184 = vmatpush3.bf16.msra.mxu0 %v198_v8 }
  0x21   :  { %186 = vmatmul.mubr.bf16.vlgmr.msra.gmra.mrb[0].mxu0 %v17_v11 }
  0xf4   :  { %v123_v13 = vpop.f32.mrb[0].mxu0 }
  0xf5   :  { %v124_v14 = vadd.f32 %v147_v12, %v123_v13  ;;  %v187_v15 = vpop.f32.mrb[1].mxu0 }
  0xf6   :  { %v126_v16 = vpop.f32.mrb[2].mxu0 }
  0xf7   :  { %v130_v17 = vmax.f32 %v124_v14, 0.0  ;;  %v127_v18 = vadd.f32 %v147_v12, %v126_v16  ;;  %v188_v19 = vpop.f32.mrb[3].mxu0 }
  0xf9   :  { %v158_v20 = vpack.c.bf16 %v130_v17, %v130_v17  ;;  %v131_v21 = vmax.f32 %v127_v18, 0.0 }
  0xfb   :  { %141 = vst.msk [vmem:[%s263_s3] sm:$0xf] %vm140_vm1, %v158_v20  ;;  %v159_v22 = vpack.c.bf16 %v131_v21, %v131_v21 }
  0xfd   :  { %142 = vst.msk [vmem:[%s263_s3 + $0x4] sm:$0xf] %vm140_vm1, %v159_v22 }

// kernel: _forward_jit.22
= control target key start
LH: loop header
LB: loop body
LE: loop exit
PB: predicated region body
PF: predicated region fallthrough
CT: control target
= control target key end

     0   :  { %vm25_vm0 = vcmask 261120   ;;  %v187_v16 = vmov 0.0   ;;  %vm188_vm1 = vmmov 0   ;;  %vm147_vm2 = vcmask 781312   ;;  %s248_s0 = inlined_call_operand.vmem [shape: bf16[16,32], index: 0, kind: input, shape index: {}]   ;;  %s249_s1 = inlined_call_operand.vmem [shape: bf16[32,96], index: 1, kind: input, shape index: {}]   ;;  %s250_s3 = inlined_call_operand.vmem [shape: f32[1,32], index: 3, kind: input, shape index: {}]   ;;  %s251_s4 = inlined_call_operand.vmem [shape: f32[1,32], index: 4, kind: input, shape index: {}]   ;;  %s252_s2 = inlined_call_operand.vmem [shape: f32[1,96], index: 2, kind: input, shape index: {}]   ;;  %s253_s5 = inlined_call_operand.vmem [shape: bf16[16,96], index: 5, kind: output, shape index: {}]  }
   0x1   :  { %v165_v0 = vld [vmem:[%s248_s0] sm:$0xff]   ;;  %171 = vmatprep.subr.bf16.mxu0 %v187_v16  ;;  %v182_v17 = vld [vmem:[%s249_s1 + $0x8] sm:$0xff]   ;;  %175 = vmatprep.mubr.msk.bf16.mxu0 %vm188_vm1, %v187_v16 }
   0x2   :  { %v166_v1 = vunpack.c.l.bf16 %v165_v0  ;;  %v167_v2 = vunpack.c.h.bf16 %v165_v0  ;;  %v181_v15 = vld [vmem:[%s249_s1] sm:$0xff]  }
   0x3   :  { %172 = vmatpush3.bf16.msra.mxu0 %v181_v15  ;;  %v154_v26 = vld [vmem:[%s250_s3] ss:$0 sm:$0xff] }
   0x4   :  { %v26_v3 = vsel %vm25_vm0, %v166_v1, 0.0  ;;  %v29_v4 = vsel %vm25_vm0, %v167_v2, 0.0  ;;  %173 = vmatprep.subr.bf16.mxu0 %v187_v16  ;;  %v155_v30 = vld [vmem:[%s251_s4] ss:$0 sm:$0xff] }
   0x5   :  { %27 = vadd.xlane.f32.xlu0 %v26_v3  ;;  %v156_v35 = vld [vmem:[%s252_s2] ss:$0 sm:$0xff] }
   0x7   :  { %174 = vmatpush3.bf16.msra.mxu0 %v182_v17 }
   0x9   :  { %30 = vadd.xlane.f32.xlu0 %v29_v4 }
  0x92   :  { %v28_v5 = vpop.xlane.xlu0 %27 }
  0x93   :  { %v33_v6 = vmul.f32 0.03125, %v28_v5 }
  0x95   :  { %v35_v7 = vsub.f32 %v166_v1, %v33_v6 }
  0x96   :  { %v31_v8 = vpop.xlane.xlu0 %30 }
  0x97   :  { %v34_v9 = vmul.f32 0.03125, %v31_v8  ;;  %v37_v10 = vmul.f32 %v35_v7, %v35_v7 }
  0x99   :  { %v36_v11 = vsub.f32 %v167_v2, %v34_v9  ;;  %v39_v12 = vsel %vm25_vm0, %v37_v10, 0.0 }
  0x9a   :  { %40 = vadd.xlane.f32.xlu1 %v39_v12 }
  0x9b   :  { %v38_v13 = vmul.f32 %v36_v11, %v36_v11 }
  0x9d   :  { %v42_v14 = vsel %vm25_vm0, %v38_v13, 0.0 }
  0x9e   :  { %43 = vadd.xlane.f32.xlu1 %v42_v14 }
 0x127   :  { %v41_v18 = vpop.xlane.xlu1 %40 }
 0x128   :  { %v45_v19 = vmul.f32 0.03125, %v41_v18 }
 0x12a   :  { %v47_v20 = vadd.f32 1e-05, %v45_v19 }
 0x12b   :  { %v44_v21 = vpop.xlane.xlu1 %43 }
 0x12c   :  { %183 = vrsqrt.f32 %v47_v20  ;;  %v46_v22 = vmul.f32 0.03125, %v44_v21 }
 0x12e   :  { %v48_v23 = vadd.f32 1e-05, %v46_v22 }
 0x130   :  { %185 = vrsqrt.f32 %v48_v23 }
 0x136   :  { %v184_v24 = vpop.eup %183 }
 0x137   :  { %v51_v25 = vmul.f32 %v184_v24, %v35_v7 }
 0x139   :  { %v60_v29 = vmul.f32 %v154_v26, %v51_v25 }
 0x13a   :  { %v186_v27 = vpop.eup %185 }
 0x13b   :  { %v52_v28 = vmul.f32 %v186_v27, %v36_v11  ;;  %v69_v32 = vadd.f32 %v155_v30, %v60_v29 }
 0x13d   :  { %v61_v31 = vmul.f32 %v154_v26, %v52_v28 }
 0x13f   :  { %v70_v33 = vadd.f32 %v155_v30, %v61_v31 }
 0x141   :  { %v71_v34 = vpack.c.bf16 %v70_v33, %v69_v32 }
 0x143   :  { %176 = vmatmul.mubr.msk.bf16.vlgmr.msra.gmra.mrb[0].mxu0 %vm25_vm0, %v71_v34 }
 0x216   :  { %v132_v36 = vpop.f32.mrb[0].mxu0 }
 0x217   :  { %v133_v37 = vadd.f32 %v156_v35, %v132_v36  ;;  %v177_v38 = vpop.f32.mrb[1].mxu0 }
 0x218   :  { %v135_v39 = vpop.f32.mrb[2].mxu0 }
 0x219   :  { %v162_v40 = vpack.c.bf16 %v133_v37, %v133_v37  ;;  %v136_v41 = vadd.f32 %v156_v35, %v135_v39  ;;  %v178_v42 = vpop.f32.mrb[3].mxu0 }
 0x21b   :  { %148 = vst.msk [vmem:[%s253_s5] sm:$0xf] %vm147_vm2, %v162_v40  ;;  %v163_v43 = vpack.c.bf16 %v136_v41, %v136_v41 }
 0x21d   :  { %149 = vst.msk [vmem:[%s253_s5 + $0x4] sm:$0xf] %vm147_vm2, %v163_v43 }

// kernel: _forward_jit.21
= control target key start
LH: loop header
LB: loop body
LE: loop exit
PB: predicated region body
PF: predicated region fallthrough
CT: control target
= control target key end

     0   :  { %vm31_vm0 = vcmask 261120   ;;  %v380_v16 = vmov 0.0   ;;  %vm381_vm1 = vmmov 0   ;;  %vm284_vm2 = vcmask 257024   ;;  %s488_s0 = inlined_call_operand.vmem [shape: bf16[16,32], index: 0, kind: input, shape index: {}]   ;;  %s489_s1 = inlined_call_operand.vmem [shape: bf16[32,128], index: 1, kind: input, shape index: {}]   ;;  %s490_s5 = inlined_call_operand.vmem [shape: f32[1,32], index: 5, kind: input, shape index: {}]   ;;  %s491_s6 = inlined_call_operand.vmem [shape: f32[1,32], index: 6, kind: input, shape index: {}]   ;;  %s492_s3 = inlined_call_operand.vmem [shape: bf16[128,32], index: 3, kind: input, shape index: {}]   ;;  %s493_s2 = inlined_call_operand.vmem [shape: f32[1,128], index: 2, kind: input, shape index: {}]   ;;  %s494_s4 = inlined_call_operand.vmem [shape: f32[1,32], index: 4, kind: input, shape index: {}]   ;;  %s495_s7 = inlined_call_operand.vmem [shape: bf16[16,32], index: 7, kind: output, shape index: {}]  }
   0x1   :  { %v313_v0 = vld [vmem:[%s488_s0] sm:$0xff]   ;;  %328 = vmatprep.subr.bf16.mxu0 %v380_v16  ;;  %336 = vmatprep.subr.bf16.mxu1 %v380_v16  ;;  %v359_v17 = vld [vmem:[%s489_s1 + $0x8] sm:$0xff]   ;;  %v362_v37 = vld [vmem:[%s492_s3 + $0x10] sm:$0xff]  }
   0x2   :  { %v425_v1 = vunpack.c.l.bf16 %v313_v0  ;;  %v427_v2 = vunpack.c.h.bf16 %v313_v0  ;;  %v358_v15 = vld [vmem:[%s489_s1] sm:$0xff]   ;;  %332 = vmatprep.mubr.msk.bf16.mxu0 %vm381_vm1, %v380_v16  ;;  %352 = vmatprep.mubr.msk.bf16.mxu1 %vm381_vm1, %v380_v16  ;;  %v361_v36 = vld [vmem:[%s492_s3 + $0x8] sm:$0xff]   ;;  %v363_v38 = vld [vmem:[%s492_s3 + $0x18] sm:$0xff]  }
   0x3   :  { %329 = vmatpush3.bf16.msra.mxu0 %v358_v15  ;;  %v291_v26 = vld [vmem:[%s490_s5] ss:$0 sm:$0xff]  ;;  %v365_v40 = vld [vmem:[%s492_s3 + $0x28] sm:$0xff]   ;;  %v366_v41 = vld [vmem:[%s492_s3 + $0x30] sm:$0xff]  }
   0x4   :  { %v32_v3 = vsel %vm31_vm0, %v425_v1, 0.0  ;;  %v35_v4 = vsel %vm31_vm0, %v427_v2, 0.0  ;;  %330 = vmatprep.subr.bf16.mxu0 %v380_v16  ;;  %v292_v30 = vld [vmem:[%s491_s6] ss:$0 sm:$0xff]  ;;  %v367_v42 = vld [vmem:[%s492_s3 + $0x38] sm:$0xff]  }
   0x5   :  { %33 = vadd.xlane.f32.xlu0 %v32_v3  ;;  %v360_v35 = vld [vmem:[%s492_s3] sm:$0xff]  }
   0x6   :  { %337 = vmatpush3.bf16.msra.mxu1 %v360_v35  ;;  %v364_v39 = vld [vmem:[%s492_s3 + $0x20] sm:$0xff]  }
   0x7   :  { %331 = vmatpush3.bf16.msra.mxu0 %v359_v17  ;;  %338 = vmatprep.subr.bf16.mxu1 %v380_v16  ;;  %v293_v43 = vld [vmem:[%s493_s2] ss:$0 sm:$0xff] }
   0x8   :  { %v299_v61 = vld [vmem:[%s494_s4] ss:$0 sm:$0xff] }
   0x9   :  { %36 = vadd.xlane.f32.xlu0 %v35_v4 }
   0xa   :  { %339 = vmatpush3.bf16.msra.mxu1 %v361_v36 }
   0xb   :  { %340 = vmatprep.subr.bf16.mxu1 %v380_v16 }
   0xe   :  { %341 = vmatpush3.bf16.msra.mxu1 %v362_v37 }
   0xf   :  { %342 = vmatprep.subr.bf16.mxu1 %v380_v16 }
  0x12   :  { %343 = vmatpush3.bf16.msra.mxu1 %v363_v38 }
  0x13   :  { %344 = vmatprep.subr.bf16.mxu1 %v380_v16 }
  0x16   :  { %345 = vmatpush3.bf16.msra.mxu1 %v364_v39 }
  0x17   :  { %346 = vmatprep.subr.bf16.mxu1 %v380_v16 }
  0x1a   :  { %347 = vmatpush3.bf16.msra.mxu1 %v365_v40 }
  0x1b   :  { %348 = vmatprep.subr.bf16.mxu1 %v380_v16 }
  0x1e   :  { %349 = vmatpush3.bf16.msra.mxu1 %v366_v41 }
  0x1f   :  { %350 = vmatprep.subr.bf16.mxu1 %v380_v16 }
  0x22   :  { %351 = vmatpush3.bf16.msra.mxu1 %v367_v42 }
  0x92   :  { %v34_v5 = vpop.xlane.xlu0 %33 }
  0x93   :  { %v39_v6 = vmul.f32 0.03125, %v34_v5 }
  0x95   :  { %v41_v7 = vsub.f32 %v425_v1, %v39_v6 }
  0x96   :  { %v37_v8 = vpop.xlane.xlu0 %36 }
  0x97   :  { %v40_v9 = vmul.f32 0.03125, %v37_v8  ;;  %v43_v10 = vmul.f32 %v41_v7, %v41_v7 }
  0x99   :  { %v42_v11 = vsub.f32 %v427_v2, %v40_v9  ;;  %v45_v12 = vsel %vm31_vm0, %v43_v10, 0.0 }
  0x9a   :  { %46 = vadd.xlane.f32.xlu1 %v45_v12 }
  0x9b   :  { %v44_v13 = vmul.f32 %v42_v11, %v42_v11 }
  0x9d   :  { %v48_v14 = vsel %vm31_vm0, %v44_v13, 0.0 }
  0x9e   :  { %49 = vadd.xlane.f32.xlu1 %v48_v14 }
 0x127   :  { %v47_v18 = vpop.xlane.xlu1 %46 }
 0x128   :  { %v51_v19 = vmul.f32 0.03125, %v47_v18 }
 0x12a   :  { %v53_v20 = vadd.f32 1e-05, %v51_v19 }
 0x12b   :  { %v50_v21 = vpop.xlane.xlu1 %49 }
 0x12c   :  { %368 = vrsqrt.f32 %v53_v20  ;;  %v52_v22 = vmul.f32 0.03125, %v50_v21 }
 0x12e   :  { %v54_v23 = vadd.f32 1e-05, %v52_v22 }
 0x130   :  { %370 = vrsqrt.f32 %v54_v23 }
 0x136   :  { %v369_v24 = vpop.eup %368 }
 0x137   :  { %v57_v25 = vmul.f32 %v369_v24, %v41_v7 }
 0x139   :  { %v66_v29 = vmul.f32 %v291_v26, %v57_v25 }
 0x13a   :  { %v371_v27 = vpop.eup %370 }
 0x13b   :  { %v58_v28 = vmul.f32 %v371_v27, %v42_v11  ;;  %v75_v32 = vadd.f32 %v292_v30, %v66_v29 }
 0x13d   :  { %v67_v31 = vmul.f32 %v291_v26, %v58_v28 }
 0x13f   :  { %v76_v33 = vadd.f32 %v292_v30, %v67_v31 }
 0x141   :  { %v77_v34 = vpack.c.bf16 %v76_v33, %v75_v32 }
 0x143   :  { %333 = vmatmul.mubr.msk.bf16.vlgmr.msra.gmra.mrb[0].mxu0 %vm31_vm0, %v77_v34 }
 0x216   :  { %v138_v44 = vpop.f32.mrb[0].mxu0 }
 0x217   :  { %v139_v45 = vadd.f32 %v293_v43, %v138_v44  ;;  %v334_v46 = vpop.f32.mrb[1].mxu0 }
 0x218   :  { %v141_v47 = vpop.f32.mrb[2].mxu0 }
 0x219   :  { %v297_v48 = vmul.f32 -1.442695, %v139_v45  ;;  %v142_v49 = vadd.f32 %v293_v43, %v141_v47  ;;  %v335_v50 = vpop.f32.mrb[3].mxu0 }
 0x21b   :  { %372 = vpow2.f32 %v297_v48  ;;  %v298_v51 = vmul.f32 -1.442695, %v142_v49 }
 0x21d   :  { %374 = vpow2.f32 %v298_v51 }
 0x225   :  { %v373_v52 = vpop.eup %372 }
 0x226   :  { %v151_v53 = vadd.f32 1.0, %v373_v52 }
 0x227   :  { %v375_v54 = vpop.eup %374 }
 0x228   :  { %376 = vrcp.f32 %v151_v53  ;;  %v152_v55 = vadd.f32 1.0, %v375_v54 }
 0x22a   :  { %378 = vrcp.f32 %v152_v55 }
 0x232   :  { %v377_v56 = vpop.eup %376 }
 0x233   :  { %v157_v58 = vmul.f32 %v377_v56, %v139_v45 }
 0x234   :  { %v379_v57 = vpop.eup %378 }
 0x235   :  { %v158_v59 = vmul.f32 %v379_v57, %v142_v49 }
 0x237   :  { %v159_v60 = vpack.c.bf16 %v158_v59, %v157_v58 }
 0x239   :  { %353 = vmatmul.mubr.bf16.vlgmr.msra.gmra.mrb[0].mxu1 %v159_v60 }
 0x30c   :  { %v265_v62 = vpop.f32.mrb[0].mxu1 }
 0x30d   :  { %v266_v63 = vadd.f32 %v299_v61, %v265_v62  ;;  %v354_v0 = vpop.f32.mrb[1].mxu1 }
 0x30e   :  { %v268_v3 = vpop.f32.mrb[2].mxu1 }
 0x30f   :  { %v272_v4 = vmul.f32 0.5, %v266_v63  ;;  %v269_v5 = vadd.f32 %v299_v61, %v268_v3  ;;  %v355_v6 = vpop.f32.mrb[3].mxu1 }
 0x311   :  { %v274_v7 = vadd.f32 %v425_v1, %v272_v4  ;;  %v273_v8 = vmul.f32 0.5, %v269_v5 }
 0x313   :  { %v310_v9 = vpack.c.bf16 %v274_v7, %v274_v7  ;;  %v275_v10 = vadd.f32 %v427_v2, %v273_v8 }
 0x315   :  { %285 = vst.msk [vmem:[%s495_s7] sm:$0xf] %vm284_vm2, %v310_v9  ;;  %v311_v11 = vpack.c.bf16 %v275_v10, %v275_v10 }
 0x317   :  { %286 = vst.msk [vmem:[%s495_s7 + $0x4] sm:$0xf] %vm284_vm2, %v311_v11 }

// kernel: _forward_jit.24
= control target key start
LH: loop header
LB: loop body
LE: loop exit
PB: predicated region body
PF: predicated region fallthrough
CT: control target
= control target key end

     0   :  { %v143_v0 = vmov 0.0   ;;  %vm144_vm0 = vmmov 0   ;;  %vm48_vm1 = vcmask 261120   ;;  %vm107_vm2 = vcmask 257024   ;;  %s191_s1 = inlined_call_operand.vmem [shape: bf16[32,32], index: 1, kind: input, shape index: {}]   ;;  %s192_s0 = inlined_call_operand.vmem [shape: bf16[16,32], index: 0, kind: input, shape index: {}]   ;;  %s193_s3 = inlined_call_operand.vmem [shape: bf16[16,32], index: 3, kind: input, shape index: {}]   ;;  %s194_s2 = inlined_call_operand.vmem [shape: f32[1,32], index: 2, kind: input, shape index: {}]   ;;  %s195_s4 = inlined_call_operand.vmem [shape: bf16[16,32], index: 4, kind: output, shape index: {}]  }
   0x1   :  { %130 = vmatprep.subr.bf16.mxu0 %v143_v0  ;;  %v140_v1 = vld [vmem:[%s191_s1] sm:$0xff]   ;;  %134 = vmatprep.mubr.msk.bf16.mxu0 %vm144_vm0, %v143_v0  ;;  %v141_v2 = vld [vmem:[%s191_s1 + $0x8] sm:$0xff]  }
   0x2   :  { %131 = vmatpush3.bf16.msra.mxu0 %v140_v1  ;;  %v142_v3 = vld [vmem:[%s192_s0] sm:$0xff]  }
   0x3   :  { %132 = vmatprep.subr.bf16.mxu0 %v143_v0  ;;  %v124_v4 = vld [vmem:[%s193_s3] sm:$0xff]  }
   0x4   :  { %v114_v5 = vld [vmem:[%s194_s2] ss:$0 sm:$0xff]  ;;  %v125_v6 = vunpack.c.l.bf16 %v124_v4  ;;  %v126_v10 = vunpack.c.h.bf16 %v124_v4 }
   0x6   :  { %133 = vmatpush3.bf16.msra.mxu0 %v141_v2 }
   0x9   :  { %135 = vmatmul.mubr.msk.bf16.vlgmr.msra.gmra.mrb[0].mxu0 %vm48_vm1, %v142_v3 }
  0xdc   :  { %v86_v7 = vpop.f32.mrb[0].mxu0 }
  0xdd   :  { %v87_v8 = vadd.f32 %v114_v5, %v86_v7  ;;  %v136_v9 = vpop.f32.mrb[1].mxu0 }
  0xde   :  { %v89_v11 = vpop.f32.mrb[2].mxu0 }
  0xdf   :  { %v97_v12 = vadd.f32 %v125_v6, %v87_v8  ;;  %v90_v13 = vadd.f32 %v114_v5, %v89_v11  ;;  %v137_v14 = vpop.f32.mrb[3].mxu0 }
  0xe1   :  { %v121_v15 = vpack.c.bf16 %v97_v12, %v97_v12  ;;  %v98_v16 = vadd.f32 %v126_v10, %v90_v13 }
  0xe3   :  { %108 = vst.msk [vmem:[%s195_s4] sm:$0xf] %vm107_vm2, %v121_v15  ;;  %v122_v17 = vpack.c.bf16 %v98_v16, %v98_v16 }
  0xe5   :  { %109 = vst.msk [vmem:[%s195_s4 + $0x4] sm:$0xf] %vm107_vm2, %v122_v17 }

// kernel: _forward_jit.25
= control target key start
LH: loop header
LB: loop body
LE: loop exit
PB: predicated region body
PF: predicated region fallthrough
CT: control target
= control target key end

     0   :  { %s1216_s25 = smov 0   ;;  %s1393_s0 = inlined_call_operand.vmem [shape: bf16[2,8,32], index: 0, kind: input, shape index: {}]   ;;  %s1394_s1 = inlined_call_operand.vmem [shape: f32[1,32], index: 1, kind: input, shape index: {}]   ;;  %s1395_s2 = inlined_call_operand.vmem [shape: f32[1,32], index: 2, kind: input, shape index: {}]   ;;  %s1396_s3 = inlined_call_operand.vmem [shape: bf16[32,32], index: 3, kind: input, shape index: {}]   ;;  %s1397_s4 = inlined_call_operand.vmem [shape: f32[1,32], index: 4, kind: input, shape index: {}]   ;;  %s1398_s5 = inlined_call_operand.vmem [shape: bf16[32,32], index: 5, kind: input, shape index: {}]   ;;  %s1399_s6 = inlined_call_operand.vmem [shape: f32[1,32], index: 6, kind: input, shape index: {}]   ;;  %s1400_s7 = inlined_call_operand.vmem [shape: f32[31,32], index: 7, kind: input, shape index: {}]   ;;  %s1401_s8 = inlined_call_operand.vmem [shape: f32[1,32], index: 8, kind: input, shape index: {}]   ;;  %s1402_s9 = inlined_call_operand.vmem [shape: f32[1,32], index: 9, kind: input, shape index: {}]   ;;  %s1403_s10 = inlined_call_operand.vmem [shape: f32[1,32], index: 10, kind: input, shape index: {}]   ;;  %s1404_s11 = inlined_call_operand.vmem [shape: bf16[32,32], index: 11, kind: input, shape index: {}]   ;;  %s1405_s12 = inlined_call_operand.vmem [shape: f32[1,32], index: 12, kind: input, shape index: {}]   ;;  %s1406_s13 = inlined_call_operand.vmem [shape: bf16[2,8,32], index: 13, kind: output, shape index: {}]  }
   0x1 LB: > { %s1018_s26 = sadd.s32 4294967295, %s1142_s25   ;;  %p1022_p0 = scmp.ge.s32.totalorder %s1142_s25, 1  ;;  %s1142_s25 = sphi %s1216_s25, %s23_s25  }
   0x2   : > { %p386_p1 = scmp.lt.s32.totalorder %s1142_s25, 3 }
   0x4   : > { %p387_p2 = pnand %p1022_p0, %p386_p1 }
   0x5   : > { %p428_p3 = scmp.lt.s32.totalorder (!%p387_p2), %s1018_s26, 1  ;;  %vm439_vm0 = vcmask (!%p387_p2), 261120   ;;  %v1120_v8 = vld [vmem:[%s1396_s3] sm:$0xff] (!%p387_p2)   ;;  %v1144_v10 = vmov (!%p387_p2), 0.0   ;;  %v1122_v11 = vld [vmem:[%s1396_s3 + $0x8] sm:$0xff] (!%p387_p2)   ;;  %vm1145_vm1 = vmmov (!%p387_p2), 0  }
   0x6   : > { %390 = sbr.rel (%p387_p2) target bundleno = 887 (0x377), region = 72  ;;  %v1121_v9 = vld [vmem:[%s1398_s5] sm:$0xff] (!%p387_p2)   ;;  %1086 = vmatprep.subr.bf16.mxu0 (!%p387_p2), %v1144_v10  ;;  %607 = vst.msk [vmem:[#allocation2] sm:$0xff] (!%p387_p2), %vm439_vm0, %v1144_v10  ;;  %608 = vst.msk [vmem:[#allocation2 + $0x8] sm:$0xff] (!%p387_p2), %vm439_vm0, %v1144_v10  ;;  %1094 = vmatprep.subr.bf16.mxu1 (!%p387_p2), %v1144_v10  ;;  %v1123_v12 = vld [vmem:[%s1398_s5 + $0x8] sm:$0xff] (!%p387_p2)   ;;  %vm611_vm2 = vcmask (!%p387_p2), 259072  }
   0x7   : > { %609 = vst.msk [vmem:[#allocation2 + $0x10] sm:$0xff] (!%p387_p2), %vm439_vm0, %v1144_v10  ;;  %610 = vst.msk [vmem:[#allocation2 + $0x18] sm:$0xff] (!%p387_p2), %vm439_vm0, %v1144_v10  ;;  %1087 = vmatpush3.bf16.msra.mxu0 (!%p387_p2), %v1120_v8  ;;  %1095 = vmatpush3.bf16.msra.mxu1 (!%p387_p2), %v1121_v9  ;;  %v1025_v17 = vld [vmem:[%s1394_s1] ss:$0 sm:$0xff] (!%p387_p2)  ;;  %v1125_v24 = vld [vmem:[%s1404_s11 + $0x8] sm:$0xff] (!%p387_p2)   ;;  %vm963_vm3 = vcmask (!%p387_p2), 257024  }
   0x8   : > { %1088 = vmatprep.subr.bf16.mxu0 (!%p387_p2), %v1144_v10  ;;  %1096 = vmatprep.subr.bf16.mxu1 (!%p387_p2), %v1144_v10  ;;  %v1026_v19 = vld [vmem:[%s1395_s2] ss:$0 sm:$0xff] (!%p387_p2)  ;;  %612 = vst.msk [vmem:[#allocation2 + $0x20] sm:$0x3f] (!%p387_p2), %vm611_vm2, %v1144_v10  ;;  %v1037_v39 = vld [vmem:[%s1400_s7 + $0x1] ss:$0 sm:$0xff] (!%p387_p2) }
   0x9   : > { %1090 = vmatprep.mubr.msk.bf16.mxu0 (!%p387_p2), %vm1145_vm1, %v1144_v10  ;;  %1098 = vmatprep.mubr.msk.bf16.mxu1 (!%p387_p2), %vm1145_vm1, %v1144_v10  ;;  %v1124_v23 = vld [vmem:[%s1404_s11] sm:$0xff] (!%p387_p2)   ;;  %v1044_v9 = vld [vmem:[%s1400_s7 + $0x8] ss:$0 sm:$0xff] (!%p387_p2) }
   0xa   : > { %v1031_v25 = vld [vmem:[%s1399_s6] ss:$0 sm:$0xff] (!%p387_p2)  ;;  %v1038_v43 = vld [vmem:[%s1400_s7 + $0x2] ss:$0 sm:$0xff] (!%p387_p2)  ;;  %v1039_v47 = vld [vmem:[%s1400_s7 + $0x3] ss:$0 sm:$0xff] (!%p387_p2) }
   0xb   : > { %1089 = vmatpush3.bf16.msra.mxu0 (!%p387_p2), %v1122_v11  ;;  %1097 = vmatpush3.bf16.msra.mxu1 (!%p387_p2), %v1123_v12  ;;  %v1036_v37 = vld [vmem:[%s1400_s7] ss:$0 sm:$0xff] (!%p387_p2)  ;;  %v1040_v53 = vld [vmem:[%s1400_s7 + $0x4] ss:$0 sm:$0xff] (!%p387_p2)  ;;  %v1041_v57 = vld [vmem:[%s1400_s7 + $0x5] ss:$0 sm:$0xff] (!%p387_p2) }
   0xc   : > { %1102 = vmatprep.subr.bf16.mxu0 (!%p387_p2), %v1144_v10  ;;  %v1027_v58 = vld [vmem:[%s1397_s4] ss:$0 sm:$0xff] (!%p387_p2)  ;;  %v1042_v62 = vld [vmem:[%s1400_s7 + $0x6] ss:$0 sm:$0xff] (!%p387_p2) }
   0xd   : > { %s1408_s26 = smov (!%p428_p3, %s1018_s26), 1  ;;  %v614_v36 = vld [vmem:[#allocation2] sm:$0xff] }
   0xe   : > { %s1023_s27 = sshll.u32 %s1408_s26, 2  ;;  %v622_v38 = vld [vmem:[#allocation2 + $0x1] sm:$0xff]  ;;  %v620_v40 = vmul.f32 %v1036_v37, %v614_v36  ;;  %v1051_v36 = vld [vmem:[%s1400_s7 + $0xf] ss:$0 sm:$0xff] }
   0xf   : > { %s431_s30 = scalar_lea.vmem %s1393_s0, %s1023_s27  ;;  %v628_v41 = vmul.f32 %v1037_v39, %v622_v38  ;;  %v630_v42 = vld [vmem:[#allocation2 + $0x2] sm:$0xff]  ;;  %s435_s22 = scalar_lea.vmem %s1406_s13, %s1023_s27 }
  0x10   : > { %v437_v0 = vld [vmem:[%s431_s30] sm:$0xf]  ;;  %v636_v45 = vmul.f32 %v1038_v43, %v630_v42  ;;  %v646_v52 = vld [vmem:[#allocation2 + $0x4] sm:$0xff] }
  0x11   : > { %v1232_v1 = vunpack.c.l.bf16 %v437_v0  ;;  %v629_v44 = vadd.f32 %v628_v41, %v620_v40  ;;  %v638_v46 = vld [vmem:[#allocation2 + $0x3] sm:$0xff]  ;;  %v652_v55 = vmul.f32 %v1040_v53, %v646_v52  ;;  %v1052_v40 = vld [vmem:[%s1400_s7 + $0x10] ss:$0 sm:$0xff]  ;;  %v1055_v52 = vld [vmem:[%s1400_s7 + $0x13] ss:$0 sm:$0xff] }
  0x12   : > { %v644_v51 = vmul.f32 %v1039_v47, %v638_v46  ;;  %v654_v56 = vld [vmem:[#allocation2 + $0x5] sm:$0xff] }
  0x13   : > { %v440_v2 = vsel %vm439_vm0, %v1232_v1, 0.0  ;;  %v637_v50 = vadd.f32 %v636_v45, %v629_v44  ;;  %v660_v60 = vmul.f32 %v1041_v57, %v654_v56  ;;  %v662_v61 = vld [vmem:[#allocation2 + $0x6] sm:$0xff]  ;;  %v1053_v44 = vld [vmem:[%s1400_s7 + $0x11] ss:$0 sm:$0xff]  ;;  %v1056_v56 = vld [vmem:[%s1400_s7 + $0x14] ss:$0 sm:$0xff] }
  0x14   : > { %441 = vadd.xlane.f32.xlu0 %v440_v2 }
  0x15   : > { %v645_v54 = vadd.f32 %v644_v51, %v637_v50 }
  0x17   : > { %v653_v59 = vadd.f32 %v652_v55, %v645_v54 }
  0xa1   : > { %v442_v3 = vpop.xlane.xlu0 %441 }
  0xa2   : > { %v444_v4 = vmul.f32 0.03125, %v442_v3  ;;  %v661_v3 = vadd.f32 %v660_v60, %v653_v59  ;;  %v1057_v60 = vld [vmem:[%s1400_s7 + $0x15] ss:$0 sm:$0xff] }
  0xa4   : > { %v445_v5 = vsub.f32 %v1232_v1, %v444_v4  ;;  %v668_v4 = vmul.f32 %v1042_v62, %v662_v61 }
  0xa6   : > { %v446_v6 = vmul.f32 %v445_v5, %v445_v5 }
  0xa8   : > { %v447_v7 = vsel %vm439_vm0, %v446_v6, 0.0  ;;  %v1043_v6 = vld [vmem:[%s1400_s7 + $0x7] ss:$0 sm:$0xff] }
  0xa9   : > { %448 = vadd.xlane.f32.xlu0 %v447_v7  ;;  %v669_v7 = vadd.f32 %v668_v4, %v661_v3  ;;  %v1059_v3 = vld [vmem:[%s1400_s7 + $0x17] ss:$0 sm:$0xff] }
 0x136   : > { %v449_v13 = vpop.xlane.xlu0 %448 }
 0x137   : > { %v450_v14 = vmul.f32 0.03125, %v449_v13  ;;  %v1045_v13 = vld [vmem:[%s1400_s7 + $0x9] ss:$0 sm:$0xff] }
 0x139   : > { %v451_v15 = vadd.f32 1e-05, %v450_v14 }
 0x13b   : > { %1126 = vrsqrt.f32 %v451_v15 }
 0x145   : > { %v1127_v16 = vpop.eup %1126 }
 0x146   : > { %v453_v18 = vmul.f32 %v1127_v16, %v445_v5  ;;  %v670_v5 = vld [vmem:[#allocation2 + $0x7] sm:$0xff] }
 0x147   : > { %v676_v8 = vmul.f32 %v1043_v6, %v670_v5  ;;  %v1046_v16 = vld [vmem:[%s1400_s7 + $0xa] ss:$0 sm:$0xff]  ;;  %v806_v6 = vld [vmem:[#allocation2 + $0x18] sm:$0xff] }
 0x148   : > { %v461_v20 = vmul.f32 %v1025_v17, %v453_v18 }
 0x14a   : > { %v469_v21 = vadd.f32 %v1026_v19, %v461_v20  ;;  %v1047_v20 = vld [vmem:[%s1400_s7 + $0xb] ss:$0 sm:$0xff] }
 0x14c   : > { %v470_v22 = vpack.c.bf16 %v469_v21, %v469_v21 }
 0x14e   : > { %1091 = vmatmul.mubr.msk.bf16.vlgmr.msra.gmra.mrb[0].mxu0 %vm439_vm0, %v470_v22  ;;  %1099 = vmatmul.mubr.msk.bf16.vlgmr.msra.gmra.mrb[0].mxu1 %vm439_vm0, %v470_v22 }
 0x14f   : > { %1106 = vmatprep.mubr.msk.bf16.mxu0 %vm1145_vm1, %v1144_v10  ;;  %1103 = vmatpush3.bf16.msra.mxu0 %v1124_v23 }
 0x150   : > { %1104 = vmatprep.subr.bf16.mxu0 %v1144_v10  ;;  %v677_v10 = vadd.f32 %v676_v8, %v669_v7  ;;  %v1060_v7 = vld [vmem:[%s1400_s7 + $0x18] ss:$0 sm:$0xff] }
 0x153   : > { %1105 = vmatpush3.bf16.msra.mxu0 %v1125_v24  ;;  %v1048_v24 = vld [vmem:[%s1400_s7 + $0xc] ss:$0 sm:$0xff] }
 0x221   : > { %v531_v26 = vpop.f32.mrb[0].mxu0  ;;  %v594_v27 = vpop.f32.mrb[0].mxu1 }
 0x222   : > { %v595_v28 = vadd.f32 %v1031_v25, %v594_v27  ;;  %v1092_v29 = vpop.f32.mrb[1].mxu0  ;;  %v1100_v30 = vpop.f32.mrb[1].mxu1  ;;  %v532_v63 = vadd.f32 %v1027_v58, %v531_v26 }
 0x223   : > { %v534_v31 = vpop.f32.mrb[2].mxu0  ;;  %v597_v32 = vpop.f32.mrb[2].mxu1 }
 0x224   : > { %v1035_v33 = vmul.f32 -1.442695, %v595_v28  ;;  %v1093_v34 = vpop.f32.mrb[3].mxu0  ;;  %v1101_v35 = vpop.f32.mrb[3].mxu1  ;;  %v1049_v28 = vld [vmem:[%s1400_s7 + $0xd] ss:$0 sm:$0xff] }
 0x225   : > { %v1050_v32 = vld [vmem:[%s1400_s7 + $0xe] ss:$0 sm:$0xff] }
 0x226   : > { %1128 = vpow2.f32 %v1035_v33 }
 0x230   : > { %v1129_v48 = vpop.eup %1128 }
 0x231   : > { %v603_v49 = vadd.f32 1.0, %v1129_v48  ;;  %v1054_v48 = vld [vmem:[%s1400_s7 + $0x12] ss:$0 sm:$0xff] }
 0x233   : > { %1130 = vrcp.f32 %v603_v49 }
 0x23d   : > { %v1131_v0 = vpop.eup %1130 }
 0x23e   : > { %v606_v2 = vmul.f32 %v1131_v0, %v532_v63  ;;  %v1058_v63 = vld [vmem:[%s1400_s7 + $0x16] ss:$0 sm:$0xff] }
 0x240   : > { %613 = vst.msk [vmem:[#allocation2 + $0xf] sm:$0xff] %vm439_vm0, %v606_v2  ;;  %v798_v2 = vld [vmem:[#allocation2 + $0x17] sm:$0xff] }
 0x247   : > { %v678_v11 = vld [vmem:[#allocation2 + $0x8] sm:$0xff]  ;;  %v742_v39 = vld [vmem:[#allocation2 + $0x10] sm:$0xff] }
 0x248   : > { %v686_v12 = vld [vmem:[#allocation2 + $0x9] sm:$0xff]  ;;  %v684_v14 = vmul.f32 %v1044_v9, %v678_v11  ;;  %v750_v43 = vld [vmem:[#allocation2 + $0x11] sm:$0xff]  ;;  %v748_v46 = vmul.f32 %v1052_v40, %v742_v39  ;;  %v814_v11 = vld [vmem:[#allocation2 + $0x19] sm:$0xff] }
 0x249   : > { %v694_v15 = vld [vmem:[#allocation2 + $0xa] sm:$0xff]  ;;  %v692_v18 = vmul.f32 %v1045_v13, %v686_v12  ;;  %v758_v47 = vld [vmem:[#allocation2 + $0x12] sm:$0xff]  ;;  %v756_v50 = vmul.f32 %v1053_v44, %v750_v43  ;;  %v1068_v40 = vld [vmem:[%s1402_s9] ss:$0 sm:$0xff] }
 0x24a   : > { %v685_v17 = vadd.f32 %v684_v14, %v677_v10  ;;  %v702_v19 = vld [vmem:[#allocation2 + $0xb] sm:$0xff]  ;;  %v700_v22 = vmul.f32 %v1046_v16, %v694_v15  ;;  %v766_v51 = vld [vmem:[#allocation2 + $0x13] sm:$0xff]  ;;  %v764_v54 = vmul.f32 %v1054_v48, %v758_v47  ;;  %v804_v10 = vmul.f32 %v1059_v3, %v798_v2 }
 0x24b   : > { %v710_v23 = vld [vmem:[#allocation2 + $0xc] sm:$0xff]  ;;  %v708_v26 = vmul.f32 %v1047_v20, %v702_v19  ;;  %v774_v55 = vld [vmem:[#allocation2 + $0x14] sm:$0xff]  ;;  %v772_v58 = vmul.f32 %v1055_v52, %v766_v51  ;;  %v812_v14 = vmul.f32 %v1060_v7, %v806_v6  ;;  %v1071_v51 = vld [vmem:[%s1405_s12] ss:$0 sm:$0xff]  ;;  %v960_v52 = vmul.f32 2.0, %v1232_v1 }
 0x24c   : > { %v693_v21 = vadd.f32 %v692_v18, %v685_v17  ;;  %v718_v27 = vld [vmem:[#allocation2 + $0xd] sm:$0xff]  ;;  %v716_v29 = vmul.f32 %v1048_v24, %v710_v23  ;;  %v782_v59 = vld [vmem:[#allocation2 + $0x15] sm:$0xff]  ;;  %v780_v62 = vmul.f32 %v1056_v56, %v774_v55 }
 0x24d   : > { %v726_v31 = vld [vmem:[#allocation2 + $0xe] sm:$0xff]  ;;  %v724_v34 = vmul.f32 %v1049_v28, %v718_v27  ;;  %v790_v0 = vld [vmem:[#allocation2 + $0x16] sm:$0xff]  ;;  %v788_v5 = vmul.f32 %v1057_v60, %v782_v59 }
 0x24e   : > { %v701_v25 = vadd.f32 %v700_v22, %v693_v21  ;;  %v734_v35 = vld [vmem:[#allocation2 + $0xf] sm:$0xff]  ;;  %v732_v38 = vmul.f32 %v1050_v32, %v726_v31  ;;  %v796_v9 = vmul.f32 %v1058_v63, %v790_v0  ;;  %v1061_v12 = vld [vmem:[%s1400_s7 + $0x19] ss:$0 sm:$0xff]  ;;  %v822_v15 = vld [vmem:[#allocation2 + $0x1a] sm:$0xff] }
 0x24f   : > { %v740_v42 = vmul.f32 %v1051_v36, %v734_v35  ;;  %v1062_v16 = vld [vmem:[%s1400_s7 + $0x1a] ss:$0 sm:$0xff]  ;;  %v820_v18 = vmul.f32 %v1061_v12, %v814_v11  ;;  %v830_v19 = vld [vmem:[#allocation2 + $0x1b] sm:$0xff] }
 0x250   : > { %v709_v30 = vadd.f32 %v708_v26, %v701_v25  ;;  %v1063_v20 = vld [vmem:[%s1400_s7 + $0x1b] ss:$0 sm:$0xff]  ;;  %v828_v22 = vmul.f32 %v1062_v16, %v822_v15  ;;  %v838_v23 = vld [vmem:[#allocation2 + $0x1c] sm:$0xff] }
 0x251   : > { %v1064_v24 = vld [vmem:[%s1400_s7 + $0x1c] ss:$0 sm:$0xff]  ;;  %v836_v26 = vmul.f32 %v1063_v20, %v830_v19  ;;  %v846_v27 = vld [vmem:[#allocation2 + $0x1d] sm:$0xff] }
 0x252   : > { %v717_v33 = vadd.f32 %v716_v29, %v709_v30  ;;  %v1065_v28 = vld [vmem:[%s1400_s7 + $0x1d] ss:$0 sm:$0xff]  ;;  %v844_v30 = vmul.f32 %v1064_v24, %v838_v23  ;;  %v854_v31 = vld [vmem:[#allocation2 + $0x1e] sm:$0xff] }
 0x253   : > { %v1066_v32 = vld [vmem:[%s1400_s7 + $0x1e] ss:$0 sm:$0xff] }
 0x254   : > { %v725_v37 = vadd.f32 %v724_v34, %v717_v33  ;;  %v852_v34 = vmul.f32 %v1065_v28, %v846_v27  ;;  %v860_v36 = vmul.f32 %v1066_v32, %v854_v31 }
 0x256   : > { %v733_v41 = vadd.f32 %v732_v38, %v725_v37  ;;  %v1067_v38 = vld [vmem:[%s1401_s8] ss:$0 sm:$0xff] }
 0x258   : > { %v741_v45 = vadd.f32 %v740_v42, %v733_v41  ;;  %v1069_v42 = vld [vmem:[%s1403_s10] ss:$0 sm:$0xff] }
 0x25a   : > { %v749_v49 = vadd.f32 %v748_v46, %v741_v45 }
 0x25c   : > { %v757_v53 = vadd.f32 %v756_v50, %v749_v49 }
 0x25e   : > { %v765_v57 = vadd.f32 %v764_v54, %v757_v53 }
 0x260   : > { %v773_v61 = vadd.f32 %v772_v58, %v765_v57 }
 0x262   : > { %v781_v4 = vadd.f32 %v780_v62, %v773_v61 }
 0x264   : > { %v789_v8 = vadd.f32 %v788_v5, %v781_v4 }
 0x266   : > { %v797_v13 = vadd.f32 %v796_v9, %v789_v8 }
 0x268   : > { %v805_v17 = vadd.f32 %v804_v10, %v797_v13 }
 0x26a   : > { %v813_v21 = vadd.f32 %v812_v14, %v805_v17 }
 0x26c   : > { %v821_v25 = vadd.f32 %v820_v18, %v813_v21 }
 0x26e   : > { %v829_v29 = vadd.f32 %v828_v22, %v821_v25 }
 0x270   : > { %v837_v33 = vadd.f32 %v836_v26, %v829_v29 }
 0x272   : > { %v845_v35 = vadd.f32 %v844_v30, %v837_v33 }
 0x274   : > { %v853_v37 = vadd.f32 %v852_v34, %v845_v35 }
 0x276   : > { %v861_v39 = vadd.f32 %v860_v36, %v853_v37 }
 0x278   : > { %v869_v41 = vadd.f32 %v1067_v38, %v861_v39 }
 0x27a   : > { %v877_v43 = vmul.f32 %v1068_v40, %v869_v41 }
 0x27c   : > { %v885_v44 = vadd.f32 %v1069_v42, %v877_v43 }
 0x27e   : > { %v1070_v45 = vmul.f32 -1.442695, %v885_v44 }
 0x280   : > { %1132 = vpow2.f32 %v1070_v45 }
 0x28a   : > { %v1133_v46 = vpop.eup %1132 }
 0x28b   : > { %v889_v47 = vadd.f32 1.0, %v1133_v46 }
 0x28d   : > { %1134 = vrcp.f32 %v889_v47 }
 0x297   : > { %v1135_v48 = vpop.eup %1134 }
 0x298   : > { %v892_v49 = vmul.f32 %v1135_v48, %v885_v44 }
 0x29a   : > { %v893_v50 = vpack.c.bf16 %v892_v49, %v892_v49 }
 0x29c   : > { %1107 = vmatmul.mubr.msk.bf16.vlgmr.msra.gmra.mrb[4].mxu0 %vm439_vm0, %v893_v50 }
 0x36f   : > { %v954_v53 = vpop.f32.mrb[4].mxu0 }
 0x370   : > { %v955_v54 = vadd.f32 %v1071_v51, %v954_v53  ;;  %v1108_v55 = vpop.f32.mrb[5].mxu0 }
 0x371   : > { %v957_v56 = vpop.f32.mrb[6].mxu0 }
 0x372   : > { %v961_v57 = vadd.f32 %v960_v52, %v955_v54  ;;  %v1109_v58 = vpop.f32.mrb[7].mxu0 }
 0x374   : > { %v962_v59 = vpack.c.bf16 %v961_v57, %v961_v57 }
 0x376   : > { %964 = vst.msk [vmem:[%s435_s22] sm:$0xf] %vm963_vm3, %v962_v59 }
 0x377 PF: > { %s23_s25 = sadd.s32 1, %s1142_s25  }
 0x378   : > { %p20_p4 = scmp.ge.s32.totalorder %s23_s25, 4  }
 0x37a   :  { %22 = sbr.rel (!%p20_p4) target bundleno = 1 (0x1), region = 102 }

// kernel: _forward_jit.39
= control target key start
LH: loop header
LB: loop body
LE: loop exit
PB: predicated region body
PF: predicated region fallthrough
CT: control target
= control target key end

     0   :  { %v150_v0 = vmov 0.0   ;;  %vm151_vm0 = vmmov 0   ;;  %vm45_vm1 = vcmask 261120   ;;  %vm90_vm2 = vcmask 130048   ;;  %s196_s1 = inlined_call_operand.vmem [shape: bf16[32,16], index: 1, kind: input, shape index: {}]   ;;  %s197_s0 = inlined_call_operand.vmem [shape: bf16[16,32], index: 0, kind: input, shape index: {}]   ;;  %s198_s2 = inlined_call_operand.vmem [shape: f32[1,16], index: 2, kind: input, shape index: {}]   ;;  %s199_s3 = inlined_call_operand.vmem [shape: f32[16,16], index: 3, kind: output, shape index: {}]  }
   0x1   :  { %129 = vmatprep.subr.bf16.mxu0 %v150_v0  ;;  %v139_v1 = vld [vmem:[%s196_s1] sm:$0xff]   ;;  %133 = vmatprep.mubr.msk.bf16.mxu0 %vm151_vm0, %v150_v0  ;;  %v140_v2 = vld [vmem:[%s196_s1 + $0x8] sm:$0xff]  }
   0x2   :  { %130 = vmatpush3.bf16.msra.mxu0 %v139_v1  ;;  %v141_v3 = vld [vmem:[%s197_s0] sm:$0xff]  }
   0x3   :  { %131 = vmatprep.subr.bf16.mxu0 %v150_v0  ;;  %v121_v4 = vld [vmem:[%s198_s2] ss:$0 sm:$0xff] }
   0x6   :  { %132 = vmatpush3.bf16.msra.mxu0 %v140_v2 }
   0x9   :  { %134 = vmatmul.mubr.msk.bf16.vlgmr.msra.gmra.mrb[0].mxu0 %vm45_vm1, %v141_v3 }
  0xdc   :  { %v83_v5 = vpop.f32.mrb[0].mxu0 }
  0xdd   :  { %v84_v6 = vadd.f32 %v121_v4, %v83_v5  ;;  %v135_v7 = vpop.f32.mrb[1].mxu0 }
  0xde   :  { %v86_v8 = vpop.f32.mrb[2].mxu0 }
  0xdf   :  { %v87_v9 = vadd.f32 %v121_v4, %v86_v8  ;;  %v136_v10 = vpop.f32.mrb[3].mxu0  ;;  %v91_v11 = vsel %vm90_vm2, %v84_v6, -inf }
  0xe0   :  { %92 = vmax.xlane.f32.xlu0 %v91_v11 }
  0xe1   :  { %v94_v12 = vsel %vm90_vm2, %v87_v9, -inf }
  0xe4   :  { %95 = vmax.xlane.f32.xlu0 %v94_v12 }
 0x16d   :  { %v93_v13 = vpop.xlane.xlu0 %92 }
 0x16e   :  { %v97_v14 = vsub.f32 %v84_v6, %v93_v13 }
 0x170   :  { %v99_v15 = vmul.f32 1.442695, %v97_v14 }
 0x171   :  { %v96_v16 = vpop.xlane.xlu0 %95 }
 0x172   :  { %142 = vpow2.f32 %v99_v15  ;;  %v98_v17 = vsub.f32 %v87_v9, %v96_v16 }
 0x174   :  { %v101_v18 = vmul.f32 1.442695, %v98_v17 }
 0x176   :  { %144 = vpow2.f32 %v101_v18 }
 0x17c   :  { %v143_v19 = vpop.eup %142 }
 0x17d   :  { %v103_v20 = vsel %vm90_vm2, %v143_v19, 0.0 }
 0x17e   :  { %104 = vadd.xlane.f32.xlu1 %v103_v20 }
 0x180   :  { %v145_v21 = vpop.eup %144 }
 0x181   :  { %v106_v22 = vsel %vm90_vm2, %v145_v21, 0.0 }
 0x182   :  { %107 = vadd.xlane.f32.xlu1 %v106_v22 }
 0x20b   :  { %v105_v23 = vpop.xlane.xlu1 %104 }
 0x20c   :  { %146 = vlog2.f32 %v105_v23 }
 0x20f   :  { %v108_v24 = vpop.xlane.xlu1 %107 }
 0x210   :  { %148 = vlog2.f32 %v108_v24 }
 0x216   :  { %v147_v25 = vpop.eup %146 }
 0x217   :  { %v110_v26 = vmul.f32 0.6931472, %v147_v25 }
 0x219   :  { %v113_v27 = vsub.f32 %v97_v14, %v110_v26 }
 0x21a   :  { %v149_v28 = vpop.eup %148 }
 0x21b   :  { %115 = vst.msk [vmem:[%s199_s3] sm:$0xff] %vm90_vm2, %v113_v27  ;;  %v112_v29 = vmul.f32 0.6931472, %v149_v28 }
 0x21d   :  { %v114_v30 = vsub.f32 %v98_v17, %v112_v29 }
 0x21f   :  { %116 = vst.msk [vmem:[%s199_s3 + $0x8] sm:$0xff] %vm90_vm2, %v114_v30 }

// kernel: _forward_jit.23
= control target key start
LH: loop header
LB: loop body
LE: loop exit
PB: predicated region body
PF: predicated region fallthrough
CT: control target
= control target key end

     0   :  { %s1852_s9 = smov 0   ;;  %s1854_s10 = smov 0   ;;  %s2183_s0 = inlined_call_operand.vmem [shape: bf16[2,8,96], index: 0, kind: input, shape index: {}, may-alias: {0,1}]   ;;  %s2184_s1 = inlined_call_operand.vmem [shape: bf16[2,8,96], index: 1, kind: input, shape index: {}, may-alias: {0,1}]   ;;  %s2185_s2 = inlined_call_operand.vmem [shape: bf16[2,8,32], index: 2, kind: output, shape index: {}]  }
   0x1   :  { %s1856_s11 = smov 0  }
   0x2 LB: > { %s31_s12 = sadd.s32 1, %s1790_s10  ;;  %p1498_p0 = scmp.ge.s32.totalorder %s1794_s11, 1  ;;  %s1794_s11 = sphi %s1856_s11, %s12_s11   ;;  %s1790_s10 = sphi %s1854_s10, %s2187_s10   ;;  %s1786_s9 = sphi %s1852_s9, %s2186_s9  }
   0x3   : > { %p33_p1 = scmp.ge.s32.totalorder %s31_s12, 2  ;;  %p151_p2 = scmp.lt.s32.totalorder %s1794_s11, 3 }
   0x5   : > { %s2189_s12 = smov (%p33_p1, %s31_s12), 0  ;;  %p152_p3 = pnand %p1498_p0, %p151_p2 }
   0x6   : > { %p184_p4 = scmp.lt.s32.totalorder (!%p152_p3), %s1786_s9, 1  ;;  %v1796_v0 = vmov (!%p152_p3), 0.0   ;;  %vm1797_vm0 = vmmov (!%p152_p3), 0   ;;  %s1798_s17 = smov (!%p152_p3), 96   ;;  %vm225_vm1 = vcmask (!%p152_p3), 31744   ;;  %vm210_vm2 = vcmask (!%p152_p3), 64512  }
   0x7   : > { %155 = sbr.rel (%p152_p3) target bundleno = 1839 (0x72f), region = 28  ;;  %1553 = vmatprep.subr.bf16.mxu0 (!%p152_p3), %v1796_v0  ;;  %1555 = vmatprep.mubr.msk.bf16.mxu0 (!%p152_p3), %vm1797_vm0, %v1796_v0  ;;  %212 = vst.msk [vmem:[#allocation3] sm:$0xff] (!%p152_p3), %vm210_vm2, %v1796_v0  ;;  %v1799_v8 = vmov (!%p152_p3), -inf   ;;  %v1800_v14 = vmov (!%p152_p3), 0   ;;  %s1801_s21 = smov (!%p152_p3), 112   ;;  %vm295_vm3 = vcmask (!%p152_p3), 7168  }
   0x8   : > { %1559 = vmatprep.subr.bf16.mxu1 (!%p152_p3), %v1796_v0  ;;  %1561 = vmatprep.mubr.msk.bf16.mxu1 (!%p152_p3), %vm1797_vm0, %v1796_v0  ;;  %211 = vst.msk [vmem:[#allocation2] sm:$0xff] (!%p152_p3), %vm210_vm2, %v1799_v8  ;;  %s1802_s22 = smov (!%p152_p3), 64   ;;  %s1803_s23 = smov (!%p152_p3), 92   ;;  %vm213_vm4 = vcmask (!%p152_p3), 261120   ;;  %vm310_vm5 = vcmask (!%p152_p3), 1043456   ;;  %vm430_vm6 = vcmask (!%p152_p3), 15368  }
   0x9   : > { %1714 = vset.pattern.permute.xlu1 (!%p152_p3), %v1800_v14  ;;  %s1804_s24 = smov (!%p152_p3), 124   ;;  %s1805_s25 = smov (!%p152_p3), 88   ;;  %214 = vst.msk [vmem:[#allocation4] sm:$0xff] (!%p152_p3), %vm213_vm4, %v1796_v0  ;;  %vm568_vm7 = vcmask (!%p152_p3), 23568   ;;  %vm706_vm8 = vcmask (!%p152_p3), 31768   ;;  %vm844_vm9 = vcmask (!%p152_p3), 39968  }
   0xa   : > { %s1806_s26 = smov (!%p152_p3), 120   ;;  %s1807_s27 = smov (!%p152_p3), 84   ;;  %vm982_vm10 = vcmask (!%p152_p3), 48168   ;;  %vm1120_vm11 = vcmask (!%p152_p3), 56368   ;;  %vm1258_vm12 = vcmask (!%p152_p3), 64568   ;;  %vm493_vm13 = vcmask (!%p152_p3), 64544  }
   0xb   : > { %s1808_s28 = smov (!%p152_p3), 116   ;;  %s1809_s29 = smov (!%p152_p3), 80   ;;  %vm631_vm14 = vcmask (!%p152_p3), 97344   ;;  %vm769_vm15 = vcmask (!%p152_p3), 130144   ;;  %vm1337_vm4 = vcmask (!%p152_p3), 27648  }
   0xc   : > { %s1810_s30 = smov (!%p152_p3), 76   ;;  %s1811_s3 = smov (!%p152_p3), 108  }
   0xd   : > { %s1812_s4 = smov (!%p152_p3), 72   ;;  %s1813_s5 = smov (!%p152_p3), 104  }
   0xe   : > { %s2191_s9 = smov (!%p184_p4, %s1786_s9), 1  ;;  %s1814_s6 = smov 68   ;;  %v289_v50 = vld [vmem:[#allocation3] sm:$0xff] }
   0xf   : > { %s1876_s13 = sshll.u32 %s2191_s9, 2  ;;  %v272_v15 = vld [vmem:[#allocation2] sm:$0xff]  ;;  %s1815_s7 = smov 100  }
  0x10   : > { %s197_s16 = scalar_lea.vmem %s2184_s1, %s1876_s13  ;;  %s190_s20 = scalar_lea.vmem %s2183_s0, %s1876_s13  ;;  %v297_v54 = vld [vmem:[#allocation4] sm:$0xff] }
  0x11   : > { %v1882_v1 = vld [vmem:[%s197_s16] ss:$0 sps:$4 sm:$0xff]   ;;  %s1817_s8 = smov 60   ;;  %s1823_s9 = smov 56  }
  0x12   : > { %223 = vrot.lane.b32.xlu0 %v1882_v1, %s1798_s17  ;;  %v215_v2 = vld [vmem:[%s190_s20] sm:$0xf]  ;;  %s1824_s14 = smov 52   ;;  %s1825_s15 = smov 48  }
  0x13   : > { %v216_v3 = vunpack.c.l.bf16 %v215_v2  ;;  %s1826_s16 = smov 44   ;;  %s1828_s17 = smov 40  }
  0x14   : > { %s1829_s18 = smov 36   ;;  %s1830_s19 = smov 4  }
  0x15   : > { %v217_v6 = vmul.f32 0.5, %v216_v3  ;;  %s1831_s20 = smov 8  }
  0x17   : > { %v218_v7 = vpack.c.bf16 %v217_v6, %v217_v6 }
  0x84   : > { %v224_v4 = vpop.permute.xlu0 %223 }
  0x85   : > { %v230_v5 = vsel %vm225_vm1, %v224_v4, 0 }
  0x86   : > { %1554 = vmatpush3.bf16.xpose.msra.mxu0 %v230_v5 }
  0x87   : > { %1571 = vmatprep.subr.bf16.mxu0 %v1796_v0 }
  0x8d   : > { %1556 = vmatmul.mubr.msk.bf16.vlgmr.msra.gmra.mrb[0].mxu0 %vm225_vm1, %v218_v7 }
  0x8e   : > { %1573 = vmatprep.mubr.msk.bf16.mxu0 %vm1797_vm0, %v1796_v0 }
 0x160   : > { %v266_v9 = vpop.f32.mrb[0].mxu0 }
 0x161   : > { %v1557_v10 = vpop.f32.mrb[1].mxu0  ;;  %v274_v11 = vsel %vm210_vm2, %v266_v9, -inf }
 0x162   : > { %275 = vmax.xlane.f32.xlu0 %v274_v11  ;;  %v269_v12 = vpop.f32.mrb[2].mxu0 }
 0x163   : > { %v1558_v13 = vpop.f32.mrb[3].mxu0  ;;  %v1816_v12 = vmov 1  }
 0x164   : > { %1715 = vset.pattern.permute.xlu0 %v1816_v12 }
 0x178   : > { %772 = vrot.lane.b32.xlu0 %v218_v7, %s1801_s21  ;;  %s1832_s21 = smov 12  }
 0x1ef   : > { %v276_v16 = vpop.xlane.xlu0 %275 }
 0x1f0   : > { %v277_v17 = vmax.f32 %v272_v15, %v276_v16 }
 0x1f2   : > { %356 = vst.msk [vmem:[#allocation2] sm:$0xff] %vm295_vm3, %v277_v17  ;;  %283 = vperm.xlu1 %1714, %v277_v17   ;;  %v278_v18 = vsub.f32 %v272_v15, %v277_v17 }
 0x1f3   : > { %v773_v42 = vpop.permute.xlu0 %772 }
 0x1f4   : > { %v279_v19 = vmul.f32 1.442695, %v278_v18 }
 0x1f6   : > { %305 = vrot.lane.b32.xlu1 %v1882_v1, %s1802_s22  ;;  %1738 = vpow2.f32 %v279_v19  ;;  %s1833_s22 = smov 16  }
 0x1fa   : > { %360 = vrot.lane.b32.xlu1 %v1882_v1, %s1803_s23  ;;  %s1834_s23 = smov 20  }
 0x1fe   : > { %358 = vrot.lane.b32.xlu1 %v218_v7, %s1804_s24  ;;  %s1835_s24 = smov 24  }
 0x200   : > { %v1909_v20 = vpop.eup %1738 }
 0x201   : > { %v290_v51 = vmul.f32 %v1909_v20, %v289_v50 }
 0x202   : > { %498 = vrot.lane.b32.xlu1 %v1882_v1, %s1805_s25  ;;  %s1836_s25 = smov 28  }
 0x206   : > { %496 = vrot.lane.b32.xlu1 %v218_v7, %s1806_s26 }
 0x20a   : > { %636 = vrot.lane.b32.xlu1 %v1882_v1, %s1807_s27 }
 0x20e   : > { %634 = vrot.lane.b32.xlu1 %v218_v7, %s1808_s28  ;;  %s2164_s28 = scalar_lea.vmem %s2185_s2, %s1876_s13 }
 0x212   : > { %774 = vrot.lane.b32.xlu1 %v1882_v1, %s1809_s29 }
 0x216   : > { %912 = vrot.lane.b32.xlu1 %v1882_v1, %s1810_s30 }
 0x21a   : > { %910 = vrot.lane.b32.xlu1 %v218_v7, %s1811_s3 }
 0x21e   : > { %1050 = vrot.lane.b32.xlu1 %v1882_v1, %s1812_s4 }
 0x222   : > { %1048 = vrot.lane.b32.xlu1 %v218_v7, %s1813_s5 }
 0x226   : > { %1188 = vrot.lane.b32.xlu1 %v1882_v1, %s1814_s6 }
 0x22a   : > { %1186 = vrot.lane.b32.xlu1 %v218_v7, %s1815_s7 }
 0x22e   : > { %300 = vperm.xlu1 %1714, %v1909_v20  }
 0x232   : > { %1717 = vset.pattern.permute.xlu1 %v1816_v12 }
 0x271   : > { %v284_v21 = vpop.permute.xlu1 %283 }
 0x272   : > { %v286_v22 = vsub.f32 %v266_v9, %v284_v21 }
 0x274   : > { %v287_v23 = vmul.f32 1.442695, %v286_v22 }
 0x275   : > { %v306_v24 = vpop.permute.xlu1 %305 }
 0x276   : > { %1740 = vpow2.f32 %v287_v23  ;;  %v312_v25 = vsel %vm310_vm5, %v306_v24, 0 }
 0x277   : > { %1560 = vmatpush3.bf16.msra.mxu1 %v312_v25 }
 0x278   : > { %1565 = vmatprep.subr.bf16.mxu1 %v1796_v0 }
 0x279   : > { %v361_v26 = vpop.permute.xlu1 %360 }
 0x27a   : > { %v366_v29 = vsel %vm225_vm1, %v361_v26, 0 }
 0x27d   : > { %v359_v27 = vpop.permute.xlu1 %358 }
 0x280   : > { %v1741_v28 = vpop.eup %1740 }
 0x281   : > { %v499_v30 = vpop.permute.xlu1 %498  ;;  %v291_v31 = vsel %vm210_vm2, %v1741_v28, 0.0  ;;  %v304_v32 = vpack.c.bf16 %v1741_v28, %v1741_v28 }
 0x282   : > { %292 = vadd.xlane.f32.xlu0 %v291_v31  ;;  %v504_v34 = vsel %vm225_vm1, %v499_v30, 0 }
 0x283   : > { %1562 = vmatmul.mubr.msk.bf16.vlgmr.msra.gmra.mrb[0].mxu1 %vm210_vm2, %v304_v32 }
 0x284   : > { %1566 = vmatpush3.bf16.xpose.msra.mxu1 %v366_v29  ;;  %1567 = vmatprep.mubr.msk.bf16.mxu1 %vm1797_vm0, %v1796_v0 }
 0x285   : > { %v497_v33 = vpop.permute.xlu1 %496  ;;  %1577 = vmatprep.subr.bf16.mxu1 %v1796_v0 }
 0x289   : > { %v637_v35 = vpop.permute.xlu1 %636 }
 0x28a   : > { %v642_v37 = vsel %vm225_vm1, %v637_v35, 0 }
 0x28b   : > { %1568 = vmatmul.mubr.msk.bf16.vlgmr.msra.gmra.mrb[4].mxu1 %vm225_vm1, %v359_v27 }
 0x28c   : > { %1578 = vmatpush3.bf16.xpose.msra.mxu1 %v504_v34  ;;  %1579 = vmatprep.mubr.msk.bf16.mxu1 %vm1797_vm0, %v1796_v0 }
 0x28d   : > { %v635_v36 = vpop.permute.xlu1 %634  ;;  %1589 = vmatprep.subr.bf16.mxu1 %v1796_v0 }
 0x291   : > { %v775_v38 = vpop.permute.xlu1 %774 }
 0x292   : > { %v780_v40 = vsel %vm225_vm1, %v775_v38, 0 }
 0x293   : > { %1580 = vmatmul.mubr.msk.bf16.vlgmr.msra.gmra.mrb[8].mxu1 %vm225_vm1, %v497_v33 }
 0x294   : > { %1590 = vmatpush3.bf16.xpose.msra.mxu1 %v642_v37  ;;  %1591 = vmatprep.mubr.msk.bf16.mxu1 %vm1797_vm0, %v1796_v0 }
 0x295   : > { %1601 = vmatprep.subr.bf16.mxu1 %v1796_v0  ;;  %v913_v39 = vpop.permute.xlu1 %912 }
 0x296   : > { %v918_v43 = vsel %vm225_vm1, %v913_v39, 0 }
 0x299   : > { %v911_v41 = vpop.permute.xlu1 %910 }
 0x29b   : > { %1592 = vmatmul.mubr.msk.bf16.vlgmr.msra.gmra.mrb[12].mxu1 %vm225_vm1, %v635_v36  ;;  %v408_v36 = vld [vmem:[#allocation2] sm:$0xff] }
 0x29c   : > { %1602 = vmatpush3.bf16.xpose.msra.mxu1 %v780_v40  ;;  %1603 = vmatprep.mubr.msk.bf16.mxu1 %vm1797_vm0, %v1796_v0 }
 0x29d   : > { %1613 = vmatprep.subr.bf16.mxu1 %v1796_v0  ;;  %v1051_v44 = vpop.permute.xlu1 %1050 }
 0x29e   : > { %v1056_v45 = vsel %vm225_vm1, %v1051_v44, 0 }
 0x2a1   : > { %v1049_v46 = vpop.permute.xlu1 %1048 }
 0x2a3   : > { %1604 = vmatmul.mubr.msk.bf16.vlgmr.msra.gmra.mrb[16].mxu1 %vm225_vm1, %v773_v42 }
 0x2a4   : > { %1614 = vmatpush3.bf16.xpose.msra.mxu1 %v918_v43  ;;  %1615 = vmatprep.mubr.msk.bf16.mxu1 %vm1797_vm0, %v1796_v0  ;;  %v1818_v43 = vmov 2  }
 0x2a5   : > { %1625 = vmatprep.subr.bf16.mxu1 %v1796_v0  ;;  %v1189_v47 = vpop.permute.xlu1 %1188 }
 0x2a6   : > { %v1194_v48 = vsel %vm225_vm1, %v1189_v47, 0 }
 0x2a9   : > { %v1187_v49 = vpop.permute.xlu1 %1186 }
 0x2ab   : > { %1616 = vmatmul.mubr.msk.bf16.vlgmr.msra.gmra.mrb[20].mxu1 %vm225_vm1, %v911_v41 }
 0x2ac   : > { %1626 = vmatpush3.bf16.xpose.msra.mxu1 %v1056_v45  ;;  %1627 = vmatprep.mubr.msk.bf16.mxu1 %vm1797_vm0, %v1796_v0  ;;  %v1819_v45 = vmov 3  }
 0x2ad   : > { %1637 = vmatprep.subr.bf16.mxu1 %v1796_v0  ;;  %v301_v55 = vpop.permute.xlu1 %300 }
 0x2ae   : > { %v303_v56 = vmul.f32 %v301_v55, %v297_v54 }
 0x2b3   : > { %1628 = vmatmul.mubr.msk.bf16.vlgmr.msra.gmra.mrb[24].mxu1 %vm225_vm1, %v1049_v46 }
 0x2b4   : > { %1638 = vmatpush3.bf16.xpose.msra.mxu1 %v1194_v48  ;;  %1639 = vmatprep.mubr.msk.bf16.mxu1 %vm1797_vm0, %v1796_v0 }
 0x2bb   : > { %1640 = vmatmul.mubr.msk.bf16.vlgmr.msra.gmra.mrb[28].mxu1 %vm225_vm1, %v1187_v49 }
 0x30f   : > { %v293_v52 = vpop.xlane.xlu0 %292 }
 0x310   : > { %v294_v53 = vadd.f32 %v293_v52, %v290_v51 }
 0x312   : > { %296 = vst.msk [vmem:[#allocation3] sm:$0xff] %vm295_vm3, %v294_v53  ;;  %v1820_v53 = vmov 4   ;;  %vm1321_vm3 = vcmask 261344  }
 0x356   : > { %v348_v57 = vpop.f32.mrb[0].mxu1 }
 0x357   : > { %v354_v58 = vadd.f32 %v348_v57, %v303_v56  ;;  %v1563_v59 = vpop.f32.mrb[1].mxu1  ;;  %v1821_v57 = vmov 5  }
 0x358   : > { %v351_v60 = vpop.f32.mrb[2].mxu1 }
 0x359   : > { %355 = vst.msk [vmem:[#allocation4] sm:$0xff] %vm225_vm1, %v354_v58  ;;  %v1564_v61 = vpop.f32.mrb[3].mxu1  ;;  %vm1045_vm1 = vcmask 195744  }
 0x35e   : > { %v1953_v62 = vpop.f32.mrb[4].mxu1 }
 0x35f   : > { %v1569_v63 = vpop.f32.mrb[5].mxu1  ;;  %v409_v2 = vsel %vm210_vm2, %v1953_v62, -inf }
 0x360   : > { %v405_v3 = vpop.f32.mrb[6].mxu1  ;;  %410 = vmax.xlane.f32.xlu1 %v409_v2 }
 0x361   : > { %v1570_v4 = vpop.f32.mrb[7].mxu1  ;;  %v1822_v3 = vmov 6  }
 0x366   : > { %v1957_v5 = vpop.f32.mrb[8].mxu1 }
 0x367   : > { %v1581_v6 = vpop.f32.mrb[9].mxu1  ;;  %v547_v32 = vsel %vm210_vm2, %v1957_v5, -inf }
 0x368   : > { %v543_v7 = vpop.f32.mrb[10].mxu1 }
 0x369   : > { %v1582_v8 = vpop.f32.mrb[11].mxu1 }
 0x36e   : > { %v1959_v9 = vpop.f32.mrb[12].mxu1 }
 0x36f   : > { %v685_v10 = vsel %vm210_vm2, %v1959_v9, -inf  ;;  %v1593_v11 = vpop.f32.mrb[13].mxu1 }
 0x370   : > { %686 = vmax.xlane.f32.xlu0 %v685_v10  ;;  %v681_v13 = vpop.f32.mrb[14].mxu1 }
 0x371   : > { %440 = vrot.lane.b32.xlu1 %v1882_v1, %s1817_s8  ;;  %v1594_v15 = vpop.f32.mrb[15].mxu1 }
 0x376   : > { %v1966_v16 = vpop.f32.mrb[16].mxu1 }
 0x377   : > { %v1605_v17 = vpop.f32.mrb[17].mxu1  ;;  %v823_v33 = vsel %vm210_vm2, %v1966_v16, -inf }
 0x378   : > { %v819_v18 = vpop.f32.mrb[18].mxu1 }
 0x379   : > { %v1606_v19 = vpop.f32.mrb[19].mxu1 }
 0x37a   : > { %v1827_v19 = vmov 7  }
 0x37e   : > { %v1968_v20 = vpop.f32.mrb[20].mxu1 }
 0x37f   : > { %v1617_v21 = vpop.f32.mrb[21].mxu1  ;;  %v961_v34 = vsel %vm210_vm2, %v1968_v20, -inf }
 0x380   : > { %v957_v22 = vpop.f32.mrb[22].mxu1 }
 0x381   : > { %v1618_v23 = vpop.f32.mrb[23].mxu1 }
 0x386   : > { %v1970_v24 = vpop.f32.mrb[24].mxu1 }
 0x387   : > { %v1629_v25 = vpop.f32.mrb[25].mxu1  ;;  %v1099_v61 = vsel %vm210_vm2, %v1970_v24, -inf }
 0x388   : > { %v1095_v26 = vpop.f32.mrb[26].mxu1 }
 0x389   : > { %v1630_v27 = vpop.f32.mrb[27].mxu1 }
 0x38e   : > { %v1972_v28 = vpop.f32.mrb[28].mxu1 }
 0x38f   : > { %v1641_v29 = vpop.f32.mrb[29].mxu1  ;;  %v1237_v35 = vsel %vm210_vm2, %v1972_v28, -inf }
 0x390   : > { %v1233_v30 = vpop.f32.mrb[30].mxu1 }
 0x391   : > { %v1642_v31 = vpop.f32.mrb[31].mxu1 }
 0x395   : > { %548 = vmax.xlane.f32.xlu1 %v547_v32 }
 0x399   : > { %824 = vmax.xlane.f32.xlu1 %v823_v33 }
 0x39d   : > { %962 = vmax.xlane.f32.xlu1 %v961_v34 }
 0x3a1   : > { %1238 = vmax.xlane.f32.xlu1 %v1237_v35 }
 0x3ed   : > { %v411_v37 = vpop.xlane.xlu1 %410 }
 0x3ee   : > { %v412_v38 = vmax.f32 %v408_v36, %v411_v37 }
 0x3f0   : > { %v413_v39 = vsub.f32 %v408_v36, %v412_v38  ;;  %495 = vst.msk [vmem:[#allocation2] sm:$0xff] %vm430_vm6, %v412_v38  ;;  %418 = vperm.xlu0 %1715, %v412_v38  }
 0x3f1   : > { %v441_v40 = vpop.permute.xlu1 %440 }
 0x3f2   : > { %v414_v41 = vmul.f32 1.442695, %v413_v39  ;;  %v446_v42 = vsel %vm310_vm5, %v441_v40, 0 }
 0x3f3   : > { %1572 = vmatpush3.bf16.msra.mxu0 %v446_v42 }
 0x3f4   : > { %1742 = vpow2.f32 %v414_v41  ;;  %1716 = vset.pattern.permute.xlu0 %v1818_v43  ;;  %1583 = vmatprep.subr.bf16.mxu0 %v1796_v0 }
 0x3f7   : > { %v546_v46 = vld [vmem:[#allocation2] sm:$0xff] }
 0x3fd   : > { %v687_v49 = vpop.xlane.xlu0 %686 }
 0x3fe   : > { %v1986_v44 = vpop.eup %1742 }
 0x3ff   : > { %435 = vperm.xlu1 %1717, %v1986_v44  }
 0x403   : > { %1718 = vset.pattern.permute.xlu1 %v1819_v45 }
 0x422   : > { %v549_v47 = vpop.xlane.xlu1 %548 }
 0x423   : > { %v550_v48 = vmax.f32 %v546_v46, %v549_v47 }
 0x425   : > { %633 = vst.msk [vmem:[#allocation2] sm:$0xff] %vm568_vm7, %v550_v48  ;;  %556 = vperm.xlu0 %1716, %v550_v48   ;;  %v551_v63 = vsub.f32 %v546_v46, %v550_v48 }
 0x426   : > { %v825_v54 = vpop.xlane.xlu1 %824 }
 0x427   : > { %v552_v2 = vmul.f32 1.442695, %v551_v63 }
 0x429   : > { %1744 = vpow2.f32 %v552_v2 }
 0x42a   : > { %v963_v58 = vpop.xlane.xlu1 %962 }
 0x42c   : > { %v1991_v50 = vld [vmem:[#allocation2] sm:$0xff] }
 0x42d   : > { %v1994_v51 = vmax.f32 %v1991_v50, %v687_v49 }
 0x42f   : > { %v689_v52 = vsub.f32 %v1991_v50, %v1994_v51  ;;  %771 = vst.msk [vmem:[#allocation2] sm:$0xff] %vm706_vm8, %v1994_v51  ;;  %694 = vperm.xlu1 %1718, %v1994_v51  }
 0x431   : > { %v690_v42 = vmul.f32 1.442695, %v689_v52 }
 0x433   : > { %1719 = vset.pattern.permute.xlu1 %v1820_v53  ;;  %v2009_v6 = vpop.eup %1744 }
 0x436   : > { %v822_v55 = vld [vmem:[#allocation2] sm:$0xff] }
 0x437   : > { %v826_v56 = vmax.f32 %v822_v55, %v825_v54 }
 0x439   : > { %909 = vst.msk [vmem:[#allocation2] sm:$0xff] %vm844_vm9, %v826_v56  ;;  %832 = vperm.xlu1 %1719, %v826_v56   ;;  %v827_v4 = vsub.f32 %v822_v55, %v826_v56 }
 0x43b   : > { %v828_v7 = vmul.f32 1.442695, %v827_v4 }
 0x43d   : > { %1720 = vset.pattern.permute.xlu1 %v1821_v57  ;;  %1746 = vpow2.f32 %v828_v7 }
 0x440   : > { %v960_v59 = vld [vmem:[#allocation2] sm:$0xff] }
 0x441   : > { %v964_v60 = vmax.f32 %v960_v59, %v963_v58 }
 0x443   : > { %1047 = vst.msk [vmem:[#allocation2] sm:$0xff] %vm982_vm10, %v964_v60  ;;  %970 = vperm.xlu1 %1720, %v964_v60   ;;  %v965_v8 = vsub.f32 %v960_v59, %v964_v60 }
 0x444   : > { %1100 = vmax.xlane.f32.xlu0 %v1099_v61 }
 0x445   : > { %v966_v10 = vmul.f32 1.442695, %v965_v8 }
 0x447   : > { %1721 = vset.pattern.permute.xlu1 %v1822_v3  ;;  %1748 = vpow2.f32 %v966_v10  ;;  %v2016_v11 = vpop.eup %1746 }
 0x44a   : > { %v2037_v34 = vld [vmem:[#allocation2] sm:$0xff] }
 0x451   : > { %v2020_v17 = vpop.eup %1748 }
 0x45a   : > { %578 = vrot.lane.b32.xlu0 %v1882_v1, %s1823_s9 }
 0x45e   : > { %573 = vperm.xlu0 %1716, %v2009_v6  }
 0x462   : > { %716 = vrot.lane.b32.xlu0 %v1882_v1, %s1824_s14 }
 0x463   : > { %1724 = vset.pattern.permute.xlu0 %v1820_v53 }
 0x466   : > { %854 = vrot.lane.b32.xlu0 %v1882_v1, %s1825_s15 }
 0x46a   : > { %992 = vrot.lane.b32.xlu0 %v1882_v1, %s1826_s16 }
 0x46e   : > { %849 = vperm.xlu0 %1724, %v2016_v11  }
 0x46f   : > { %v419_v13 = vpop.permute.xlu0 %418 }
 0x470   : > { %v421_v15 = vsub.f32 %v1953_v62, %v419_v13  ;;  %v1239_v62 = vpop.xlane.xlu1 %1238 }
 0x472   : > { %v422_v18 = vmul.f32 1.442695, %v421_v15  ;;  %1725 = vset.pattern.permute.xlu0 %v1821_v57 }
 0x473   : > { %987 = vperm.xlu0 %1725, %v2020_v17  }
 0x474   : > { %1750 = vpow2.f32 %v422_v18 }
 0x477   : > { %1727 = vset.pattern.permute.xlu0 %v1827_v19 }
 0x47e   : > { %v2025_v21 = vpop.eup %1750  ;;  %v2032_v23 = vpop.permute.xlu1 %435 }
 0x47f   : > { %v439_v22 = vpack.c.bf16 %v2025_v21, %v2025_v21  ;;  %v426_v7 = vsel %vm210_vm2, %v2025_v21, 0.0 }
 0x481   : > { %1574 = vmatmul.mubr.msk.bf16.vlgmr.msra.gmra.mrb[4].mxu0 %vm210_vm2, %v439_v22 }
 0x482   : > { %1585 = vmatprep.mubr.msk.bf16.mxu0 %vm1797_vm0, %v1796_v0 }
 0x4a4   : > { %v557_v31 = vpop.permute.xlu0 %556 }
 0x4a5   : > { %v559_v32 = vsub.f32 %v1957_v5, %v557_v31 }
 0x4a7   : > { %v560_v33 = vmul.f32 1.442695, %v559_v32 }
 0x4ae   : > { %v695_v25 = vpop.permute.xlu1 %694 }
 0x4af   : > { %v697_v26 = vsub.f32 %v1959_v9, %v695_v25 }
 0x4b1   : > { %v698_v27 = vmul.f32 1.442695, %v697_v26 }
 0x4b3   : > { %1752 = vpow2.f32 %v698_v27 }
 0x4b4   : > { %1754 = vpow2.f32 %v560_v33 }
 0x4b5   : > { %1756 = vpow2.f32 %v690_v42 }
 0x4b8   : > { %v833_v37 = vpop.permute.xlu1 %832 }
 0x4b9   : > { %v835_v40 = vsub.f32 %v1966_v16, %v833_v37 }
 0x4bb   : > { %v836_v46 = vmul.f32 1.442695, %v835_v40 }
 0x4bd   : > { %v1753_v29 = vpop.eup %1752  ;;  %1758 = vpow2.f32 %v836_v46 }
 0x4be   : > { %v702_v30 = vsel %vm210_vm2, %v1753_v29, 0.0  ;;  %v1755_v38 = vpop.eup %1754  ;;  %v715_v56 = vpack.c.bf16 %v1753_v29, %v1753_v29 }
 0x4bf   : > { %703 = vadd.xlane.f32.xlu0 %v702_v30  ;;  %v577_v41 = vpack.c.bf16 %v1755_v38, %v1755_v38  ;;  %v564_v8 = vsel %vm210_vm2, %v1755_v38, 0.0  ;;  %v424_v38 = vld [vmem:[#allocation3] sm:$0xff] }
 0x4c2   : > { %v971_v16 = vpop.permute.xlu1 %970 }
 0x4c3   : > { %v973_v51 = vsub.f32 %v1968_v20, %v971_v16  ;;  %v2079_v20 = vpop.eup %1756 }
 0x4c5   : > { %v974_v55 = vmul.f32 1.442695, %v973_v51 }
 0x4c7   : > { %1760 = vpow2.f32 %v974_v55  ;;  %v1759_v60 = vpop.eup %1758 }
 0x4c8   : > { %v853_v2 = vpack.c.bf16 %v1759_v60, %v1759_v60  ;;  %v840_v10 = vsel %vm210_vm2, %v1759_v60, 0.0 }
 0x4d1   : > { %v1101_v35 = vpop.xlane.xlu0 %1100 }
 0x4d2   : > { %v2040_v36 = vmax.f32 %v2037_v34, %v1101_v35 }
 0x4d4   : > { %v1103_v9 = vsub.f32 %v2037_v34, %v2040_v36  ;;  %1185 = vst.msk [vmem:[#allocation2] sm:$0xff] %vm1120_vm11, %v2040_v36  ;;  %1108 = vperm.xlu1 %1721, %v2040_v36  }
 0x4d5   : > { %v579_v5 = vpop.permute.xlu0 %578 }
 0x4d6   : > { %v584_v39 = vsel %vm310_vm5, %v579_v5, 0  ;;  %v1104_v15 = vmul.f32 1.442695, %v1103_v9  ;;  %v425_v5 = vmul.f32 %v1986_v44, %v424_v38 }
 0x4d7   : > { %1584 = vmatpush3.bf16.msra.mxu0 %v584_v39 }
 0x4d8   : > { %1722 = vset.pattern.permute.xlu1 %v1827_v19  ;;  %1595 = vmatprep.subr.bf16.mxu0 %v1796_v0  ;;  %1762 = vpow2.f32 %v1104_v15 }
 0x4da   : > { %1586 = vmatmul.mubr.msk.bf16.vlgmr.msra.gmra.mrb[8].mxu0 %vm210_vm2, %v577_v41 }
 0x4db   : > { %v2055_v47 = vld [vmem:[#allocation2] sm:$0xff]  ;;  %1597 = vmatprep.mubr.msk.bf16.mxu0 %vm1797_vm0, %v1796_v0 }
 0x4dc   : > { %v2060_v48 = vmax.f32 %v2055_v47, %v1239_v62 }
 0x4dd   : > { %v2062_v49 = vpop.permute.xlu0 %573 }
 0x4de   : > { %1246 = vperm.xlu1 %1722, %v2060_v48   ;;  %v1241_v50 = vsub.f32 %v2055_v47, %v2060_v48  ;;  %1323 = vst.msk [vmem:[#allocation2] sm:$0xff] %vm1258_vm12, %v2060_v48 }
 0x4e1   : > { %v717_v52 = vpop.permute.xlu0 %716 }
 0x4e2   : > { %v722_v54 = vsel %vm310_vm5, %v717_v52, 0  ;;  %1130 = vrot.lane.b32.xlu1 %v1882_v1, %s1828_s17 }
 0x4e3   : > { %1596 = vmatpush3.bf16.msra.mxu0 %v722_v54  ;;  %1723 = vset.pattern.permute.xlu1 %v1819_v45 }
 0x4e4   : > { %1607 = vmatprep.subr.bf16.mxu0 %v1796_v0 }
 0x4e5   : > { %v855_v58 = vpop.permute.xlu0 %854 }
 0x4e6   : > { %v860_v59 = vsel %vm310_vm5, %v855_v58, 0  ;;  %1268 = vrot.lane.b32.xlu1 %v1882_v1, %s1829_s18  ;;  %1598 = vmatmul.mubr.msk.bf16.vlgmr.msra.gmra.mrb[12].mxu0 %vm210_vm2, %v715_v56  ;;  %v1761_v1 = vpop.eup %1760 }
 0x4e7   : > { %1608 = vmatpush3.bf16.msra.mxu0 %v860_v59  ;;  %1609 = vmatprep.mubr.msk.bf16.mxu0 %vm1797_vm0, %v1796_v0  ;;  %v991_v4 = vpack.c.bf16 %v1761_v1, %v1761_v1  ;;  %v978_v13 = vsel %vm210_vm2, %v1761_v1, 0.0  ;;  %v2101_v29 = vpop.eup %1762 }
 0x4e8   : > { %1619 = vmatprep.subr.bf16.mxu0 %v1796_v0 }
 0x4e9   : > { %v993_v61 = vpop.permute.xlu0 %992 }
 0x4ea   : > { %711 = vperm.xlu1 %1723, %v2079_v20   ;;  %v998_v63 = vsel %vm310_vm5, %v993_v61, 0 }
 0x4ed   : > { %v2126_v16 = vpop.permute.xlu0 %849 }
 0x4ee   : > { %1610 = vmatmul.mubr.msk.bf16.vlgmr.msra.gmra.mrb[16].mxu0 %vm210_vm2, %v853_v2  ;;  %1726 = vset.pattern.permute.xlu1 %v1822_v3 }
 0x4ef   : > { %1620 = vmatpush3.bf16.msra.mxu0 %v998_v63  ;;  %1621 = vmatprep.mubr.msk.bf16.mxu0 %vm1797_vm0, %v1796_v0 }
 0x4f0   : > { %1631 = vmatprep.subr.bf16.mxu0 %v1796_v0 }
 0x4f2   : > { %v2129_v54 = vpop.permute.xlu0 %987 }
 0x4f6   : > { %1622 = vmatmul.mubr.msk.bf16.vlgmr.msra.gmra.mrb[20].mxu0 %vm210_vm2, %v991_v4 }
 0x4f7   : > { %1633 = vmatprep.mubr.msk.bf16.mxu0 %vm1797_vm0, %v1796_v0 }
 0x50e   : > { %427 = vadd.xlane.f32.xlu1 %v426_v7 }
 0x512   : > { %565 = vadd.xlane.f32.xlu1 %v564_v8 }
 0x516   : > { %841 = vadd.xlane.f32.xlu1 %v840_v10 }
 0x51a   : > { %979 = vadd.xlane.f32.xlu1 %v978_v13 }
 0x54c   : > { %v704_v59 = vpop.xlane.xlu0 %703 }
 0x553   : > { %v1109_v18 = vpop.permute.xlu1 %1108 }
 0x554   : > { %v1111_v22 = vsub.f32 %v1970_v24, %v1109_v18  ;;  %v482_v62 = vpop.f32.mrb[4].mxu0 }
 0x555   : > { %489 = vrot.lane.b32.xlu1 %v482_v62, %s1830_s19  ;;  %v1575_v21 = vpop.f32.mrb[5].mxu0 }
 0x556   : > { %v1112_v25 = vmul.f32 1.442695, %v1111_v22  ;;  %v485_v26 = vpop.f32.mrb[6].mxu0  ;;  %v432_v22 = vld [vmem:[#allocation4] sm:$0xff] }
 0x557   : > { %v1576_v27 = vpop.f32.mrb[7].mxu0  ;;  %v438_v62 = vmul.f32 %v2032_v23, %v432_v22  ;;  %v1242_v23 = vmul.f32 1.442695, %v1241_v50 }
 0x558   : > { %1764 = vpow2.f32 %v1112_v25 }
 0x559   : > { %1125 = vperm.xlu1 %1726, %v2101_v29  }
 0x55d   : > { %v1247_v30 = vpop.permute.xlu1 %1246  ;;  %1729 = vset.pattern.permute.xlu1 %v1816_v12 }
 0x55e   : > { %v1249_v31 = vsub.f32 %v1972_v28, %v1247_v30 }
 0x560   : > { %v1250_v32 = vmul.f32 1.442695, %v1249_v31 }
 0x561   : > { %v1131_v33 = vpop.permute.xlu1 %1130 }
 0x562   : > { %v2106_v24 = vpop.eup %1764  ;;  %1766 = vpow2.f32 %v1250_v32  ;;  %v1136_v34 = vsel %vm310_vm5, %v1131_v33, 0 }
 0x563   : > { %1632 = vmatpush3.bf16.msra.mxu0 %v1136_v34  ;;  %v1129_v35 = vpack.c.bf16 %v2106_v24, %v2106_v24  ;;  %v1116_v34 = vsel %vm210_vm2, %v2106_v24, 0.0  ;;  %1768 = vpow2.f32 %v1242_v23 }
 0x564   : > { %1643 = vmatprep.subr.bf16.mxu0 %v1796_v0 }
 0x565   : > { %v1269_v36 = vpop.permute.xlu1 %1268 }
 0x566   : > { %v1274_v37 = vsel %vm310_vm5, %v1269_v36, 0  ;;  %1634 = vmatmul.mubr.msk.bf16.vlgmr.msra.gmra.mrb[24].mxu0 %vm210_vm2, %v1129_v35  ;;  %vm1346_vm5 = vcmask 60448  }
 0x567   : > { %1644 = vmatpush3.bf16.msra.mxu0 %v1274_v37  ;;  %1645 = vmatprep.mubr.msk.bf16.mxu0 %vm1797_vm0, %v1796_v0  ;;  %vm907_vm0 = vcmask 162944  }
 0x569   : > { %v2121_v9 = vpop.permute.xlu1 %711 }
 0x56c   : > { %v2116_v12 = vpop.eup %1766 }
 0x56d   : > { %v1267_v28 = vpack.c.bf16 %v2116_v12, %v2116_v12  ;;  %v1769_v35 = vpop.eup %1768 }
 0x56f   : > { %1646 = vmatmul.mubr.msk.bf16.vlgmr.msra.gmra.mrb[28].mxu0 %vm210_vm2, %v1267_v28 }
 0x59b   : > { %v428_v39 = vpop.xlane.xlu1 %427 }
 0x59c   : > { %v429_v40 = vadd.f32 %v428_v39, %v425_v5 }
 0x59e   : > { %431 = vst.msk [vmem:[#allocation3] sm:$0xff] %vm430_vm6, %v429_v40  ;;  %vm1355_vm6 = vcmask 93248  }
 0x59f   : > { %v566_v0 = vpop.xlane.xlu1 %565 }
 0x5a3   : > { %v842_v1 = vpop.xlane.xlu1 %841 }
 0x5a5   : > { %v562_v41 = vld [vmem:[#allocation3] sm:$0xff] }
 0x5a6   : > { %v563_v42 = vmul.f32 %v2009_v6, %v562_v41 }
 0x5a7   : > { %v980_v13 = vpop.xlane.xlu1 %979 }
 0x5a8   : > { %v567_v46 = vadd.f32 %v566_v0, %v563_v42 }
 0x5aa   : > { %569 = vst.msk [vmem:[#allocation3] sm:$0xff] %vm568_vm7, %v567_v46  ;;  %vm1364_vm7 = vcmask 126048  }
 0x5ad   : > { %v620_v51 = vpop.f32.mrb[8].mxu0 }
 0x5ae   : > { %627 = vrot.lane.b32.xlu0 %v620_v51, %s1831_s20  ;;  %v1587_v52 = vpop.f32.mrb[9].mxu0 }
 0x5af   : > { %v623_v44 = vpop.f32.mrb[10].mxu0 }
 0x5b0   : > { %v1588_v55 = vpop.f32.mrb[11].mxu0 }
 0x5b1   : > { %v700_v56 = vld [vmem:[#allocation3] sm:$0xff] }
 0x5b2   : > { %v701_v58 = vmul.f32 %v2079_v20, %v700_v56 }
 0x5b4   : > { %v705_v60 = vadd.f32 %v704_v59, %v701_v58 }
 0x5b6   : > { %707 = vst.msk [vmem:[#allocation3] sm:$0xff] %vm706_vm8, %v705_v60  ;;  %vm1373_vm8 = vcmask 158848  }
 0x5b9   : > { %v758_v6 = vpop.f32.mrb[12].mxu0 }
 0x5ba   : > { %765 = vrot.lane.b32.xlu1 %v758_v6, %s1832_s21  ;;  %v1599_v61 = vpop.f32.mrb[13].mxu0 }
 0x5bb   : > { %v761_v63 = vpop.f32.mrb[14].mxu0 }
 0x5bc   : > { %v1600_v2 = vpop.f32.mrb[15].mxu0 }
 0x5bd   : > { %v838_v4 = vld [vmem:[#allocation3] sm:$0xff] }
 0x5be   : > { %v839_v7 = vmul.f32 %v2016_v11, %v838_v4 }
 0x5c0   : > { %v843_v8 = vadd.f32 %v842_v1, %v839_v7 }
 0x5c1   : > { %v896_v10 = vpop.f32.mrb[16].mxu0 }
 0x5c2   : > { %845 = vst.msk [vmem:[#allocation3] sm:$0xff] %vm844_vm9, %v843_v8  ;;  %903 = vrot.lane.b32.xlu1 %v896_v10, %s1833_s22  ;;  %v1611_v20 = vpop.f32.mrb[17].mxu0  ;;  %vm1382_vm9 = vcmask 191648  }
 0x5c3   : > { %v899_v15 = vpop.f32.mrb[18].mxu0 }
 0x5c4   : > { %v1612_v18 = vpop.f32.mrb[19].mxu0 }
 0x5c7   : > { %v490_v21 = vpop.permute.xlu1 %489 }
 0x5c8   : > { %v492_v25 = vadd.f32 %v490_v21, %v438_v62 }
 0x5c9   : > { %v976_v26 = vld [vmem:[#allocation3] sm:$0xff]  ;;  %v1034_v27 = vpop.f32.mrb[20].mxu0 }
 0x5ca   : > { %v977_v11 = vmul.f32 %v2020_v17, %v976_v26  ;;  %494 = vst.msk [vmem:[#allocation4] sm:$0xff] %vm493_vm13, %v492_v25  ;;  %v1623_v30 = vpop.f32.mrb[21].mxu0  ;;  %v1254_v17 = vsel %vm210_vm2, %v2116_v12, 0.0  ;;  %vm1183_vm2 = vcmask 228544  }
 0x5cb   : > { %v1037_v31 = vpop.f32.mrb[22].mxu0 }
 0x5cc   : > { %v981_v32 = vadd.f32 %v980_v13, %v977_v11  ;;  %v1624_v33 = vpop.f32.mrb[23].mxu0 }
 0x5cd   : > { %1117 = vadd.xlane.f32.xlu0 %v1116_v34 }
 0x5ce   : > { %983 = vst.msk [vmem:[#allocation3] sm:$0xff] %vm982_vm10, %v981_v32  ;;  %vm1391_vm10 = vcmask 224448  }
 0x5d1   : > { %v570_v36 = vld [vmem:[#allocation4] sm:$0xff] }
 0x5d2   : > { %v576_v24 = vmul.f32 %v2062_v49, %v570_v36 }
 0x5d8   : > { %v1126_v47 = vpop.permute.xlu1 %1125 }
 0x5e3   : > { %1263 = vperm.xlu0 %1727, %v1769_v35  }
 0x5e6   : > { %1255 = vadd.xlane.f32.xlu1 %v1254_v17 }
 0x5e7   : > { %1041 = vrot.lane.b32.xlu0 %v1034_v27, %s1834_s23 }
 0x5e8   : > { %1728 = vset.pattern.permute.xlu0 %v1800_v14 }
 0x620   : > { %v628_v37 = vpop.permute.xlu0 %627 }
 0x621   : > { %v630_v28 = vadd.f32 %v628_v37, %v576_v24 }
 0x623   : > { %632 = vst.msk [vmem:[#allocation4] sm:$0xff] %vm631_vm14, %v630_v28 }
 0x62a   : > { %v708_v48 = vld [vmem:[#allocation4] sm:$0xff] }
 0x62b   : > { %v714_v50 = vmul.f32 %v2121_v9, %v708_v48  ;;  %v1114_v9 = vld [vmem:[#allocation3] sm:$0xff] }
 0x62c   : > { %v766_v38 = vpop.permute.xlu1 %765  ;;  %v1115_v55 = vmul.f32 %v2101_v29, %v1114_v9 }
 0x62d   : > { %v768_v5 = vadd.f32 %v766_v38, %v714_v50 }
 0x62f   : > { %770 = vst.msk [vmem:[#allocation4] sm:$0xff] %vm769_vm15, %v768_v5 }
 0x634   : > { %v904_v14 = vpop.permute.xlu1 %903 }
 0x636   : > { %v846_v12 = vld [vmem:[#allocation4] sm:$0xff] }
 0x637   : > { %v852_v39 = vmul.f32 %v2126_v16, %v846_v12 }
 0x639   : > { %v906_v40 = vadd.f32 %v904_v14, %v852_v39  ;;  %v1172_v41 = vpop.f32.mrb[24].mxu0 }
 0x63a   : > { %v1635_v49 = vpop.f32.mrb[25].mxu0 }
 0x63b   : > { %908 = vst.msk [vmem:[#allocation4] sm:$0xff] %vm907_vm0, %v906_v40  ;;  %v1175_v42 = vpop.f32.mrb[26].mxu0 }
 0x63c   : > { %v1636_v0 = vpop.f32.mrb[27].mxu0 }
 0x642   : > { %v1310_v46 = vpop.f32.mrb[28].mxu0  ;;  %v984_v59 = vld [vmem:[#allocation4] sm:$0xff] }
 0x643   : > { %v1647_v51 = vpop.f32.mrb[29].mxu0  ;;  %v990_v60 = vmul.f32 %v2129_v54, %v984_v59 }
 0x644   : > { %v1313_v52 = vpop.f32.mrb[30].mxu0 }
 0x645   : > { %v1648_v44 = vpop.f32.mrb[31].mxu0 }
 0x65a   : > { %v1118_v56 = vpop.xlane.xlu0 %1117 }
 0x65b   : > { %v1119_v58 = vadd.f32 %v1118_v56, %v1115_v55 }
 0x65d   : > { %1121 = vst.msk [vmem:[#allocation3] sm:$0xff] %vm1120_vm11, %v1119_v58  ;;  %vm1400_vm11 = vcmask 257248  }
 0x662   : > { %v1264_v16 = vpop.permute.xlu0 %1263 }
 0x664   : > { %v1252_v63 = vld [vmem:[#allocation3] sm:$0xff] }
 0x665   : > { %v1253_v2 = vmul.f32 %v1769_v35, %v1252_v63 }
 0x666   : > { %v1042_v6 = vpop.permute.xlu0 %1041 }
 0x667   : > { %v1044_v61 = vadd.f32 %v1042_v6, %v990_v60 }
 0x669   : > { %1046 = vst.msk [vmem:[#allocation4] sm:$0xff] %vm1045_vm1, %v1044_v61 }
 0x670   : > { %v1122_v54 = vld [vmem:[#allocation4] sm:$0xff] }
 0x673   : > { %v1256_v1 = vpop.xlane.xlu1 %1255 }
 0x674   : > { %v1257_v4 = vadd.f32 %v1256_v1, %v1253_v2 }
 0x676   : > { %1259 = vst.msk [vmem:[#allocation3] sm:$0xff] %vm1258_vm12, %v1257_v4 }
 0x67d   : > { %v1327_v7 = vld [vmem:[#allocation3] sm:$0xff] }
 0x67e   : > { %1770 = vrcp.f32 %v1327_v7 }
 0x688   : > { %v1771_v29 = vpop.eup %1770 }
 0x689   : > { %1341 = vperm.xlu1 %1729, %v1771_v29   ;;  %1332 = vperm.xlu0 %1728, %v1771_v29  }
 0x68d   : > { %1732 = vset.pattern.permute.xlu1 %v1820_v53  ;;  %1179 = vrot.lane.b32.xlu0 %v1172_v41, %s1835_s24 }
 0x68e   : > { %1368 = vperm.xlu1 %1732, %v1771_v29   ;;  %1730 = vset.pattern.permute.xlu0 %v1818_v43  ;;  %v1128_v43 = vmul.f32 %v1126_v47, %v1122_v54 }
 0x691   : > { %1350 = vperm.xlu0 %1730, %v1771_v29  }
 0x692   : > { %1734 = vset.pattern.permute.xlu1 %v1822_v3 }
 0x693   : > { %1386 = vperm.xlu1 %1734, %v1771_v29  }
 0x695   : > { %1317 = vrot.lane.b32.xlu0 %v1310_v46, %s1836_s25 }
 0x696   : > { %1731 = vset.pattern.permute.xlu0 %v1819_v45 }
 0x697   : > { %1735 = vset.pattern.permute.xlu1 %v1827_v19 }
 0x698   : > { %1395 = vperm.xlu1 %1735, %v1771_v29  }
 0x699   : > { %1359 = vperm.xlu0 %1731, %v1771_v29  }
 0x69d   : > { %1733 = vset.pattern.permute.xlu0 %v1821_v57 }
 0x69e   : > { %1377 = vperm.xlu0 %1733, %v1771_v29  }
 0x6a2   : > { %1736 = vset.pattern.permute.xlu0 %v1827_v19 }
 0x708   : > { %v1333_v53 = vpop.permute.xlu0 %1332  ;;  %v1342_v20 = vpop.permute.xlu1 %1341 }
 0x70c   : > { %v1180_v8 = vpop.permute.xlu0 %1179 }
 0x70d   : > { %v1182_v3 = vadd.f32 %v1180_v8, %v1128_v43  ;;  %v1369_v22 = vpop.permute.xlu1 %1368 }
 0x70f   : > { %1184 = vst.msk [vmem:[#allocation4] sm:$0xff] %vm1183_vm2, %v1182_v3 }
 0x710   : > { %v1351_v10 = vpop.permute.xlu0 %1350 }
 0x712   : > { %v1387_v62 = vpop.permute.xlu1 %1386 }
 0x714   : > { %v1318_v15 = vpop.permute.xlu0 %1317 }
 0x716   : > { %v1260_v45 = vld [vmem:[#allocation4] sm:$0xff] }
 0x717   : > { %v1266_v13 = vmul.f32 %v1264_v16, %v1260_v45  ;;  %v1396_v34 = vpop.permute.xlu1 %1395 }
 0x718   : > { %v1360_v57 = vpop.permute.xlu0 %1359 }
 0x719   : > { %v1320_v18 = vadd.f32 %v1318_v15, %v1266_v13 }
 0x71b   : > { %1322 = vst.msk [vmem:[#allocation4] sm:$0xff] %vm1321_vm3, %v1320_v18 }
 0x71d   : > { %v1378_v32 = vpop.permute.xlu0 %1377 }
 0x722   : > { %v1393_v19 = vld [vmem:[#allocation4] sm:$0xff] }
 0x723   : > { %v1335_v21 = vmul.f32 %v1393_v19, %v1333_v53  ;;  %v1344_v25 = vmul.f32 %v1393_v19, %v1342_v20  ;;  %v1353_v26 = vmul.f32 %v1393_v19, %v1351_v10  ;;  %v1362_v27 = vmul.f32 %v1393_v19, %v1360_v57 }
 0x724   : > { %v1371_v31 = vmul.f32 %v1393_v19, %v1369_v22  ;;  %v1380_v33 = vmul.f32 %v1393_v19, %v1378_v32  ;;  %v1389_v35 = vmul.f32 %v1393_v19, %v1387_v62  ;;  %v1398_v17 = vmul.f32 %v1396_v34, %v1393_v19 }
 0x725   : > { %v1336_v11 = vpack.c.bf16 %v1335_v21, %v1335_v21  ;;  %v1345_v30 = vpack.c.bf16 %v1344_v25, %v1344_v25  ;;  %v1354_v23 = vpack.c.bf16 %v1353_v26, %v1353_v26  ;;  %v1363_v36 = vpack.c.bf16 %v1362_v27, %v1362_v27 }
 0x726   : > { %v1372_v24 = vpack.c.bf16 %v1371_v31, %v1371_v31  ;;  %v1381_v37 = vpack.c.bf16 %v1380_v33, %v1380_v33  ;;  %v1390_v28 = vpack.c.bf16 %v1389_v35, %v1389_v35  ;;  %v1399_v47 = vpack.c.bf16 %v1398_v17, %v1398_v17 }
 0x727   : > { %1338 = vst.msk [vmem:[%s2164_s28] sm:$0xf] %vm1337_vm4, %v1336_v11 }
 0x728   : > { %1347 = vst.msk [vmem:[%s2164_s28] sm:$0xf] %vm1346_vm5, %v1345_v30 }
 0x729   : > { %1356 = vst.msk [vmem:[%s2164_s28] sm:$0xf] %vm1355_vm6, %v1354_v23 }
 0x72a   : > { %1365 = vst.msk [vmem:[%s2164_s28] sm:$0xf] %vm1364_vm7, %v1363_v36 }
 0x72b   : > { %1374 = vst.msk [vmem:[%s2164_s28] sm:$0xf] %vm1373_vm8, %v1372_v24 }
 0x72c   : > { %1383 = vst.msk [vmem:[%s2164_s28] sm:$0xf] %vm1382_vm9, %v1381_v37 }
 0x72d   : > { %1392 = vst.msk [vmem:[%s2164_s28] sm:$0xf] %vm1391_vm10, %v1390_v28 }
 0x72e   : > { %1401 = vst.msk [vmem:[%s2164_s28] sm:$0xf] %vm1400_vm11, %v1399_v47 }
 0x72f PF: > { %s12_s11 = sadd.s32 1, %s1794_s11   ;;  %s2186_s9 = smov %s1790_s10 }
 0x730   : > { %p9_p5 = scmp.ge.s32.totalorder %s12_s11, 4   ;;  %s2187_s10 = smov %s2189_s12 }
 0x732   :  { %11 = sbr.rel (!%p9_p5) target bundleno = 2 (0x2), region = 69 }

// kernel: _forward_jit.26
= control target key start
LH: loop header
LB: loop body
LE: loop exit
PB: predicated region body
PF: predicated region fallthrough
CT: control target
= control target key end

     0   :  { %vm37_vm0 = vcmask 261120   ;;  %v436_v16 = vmov 0.0   ;;  %vm437_vm1 = vmmov 0   ;;  %vm334_vm2 = vcmask 257024   ;;  %s564_s0 = inlined_call_operand.vmem [shape: bf16[16,32], index: 0, kind: input, shape index: {}]   ;;  %s565_s1 = inlined_call_operand.vmem [shape: bf16[32,128], index: 1, kind: input, shape index: {}]   ;;  %s566_s5 = inlined_call_operand.vmem [shape: f32[1,32], index: 5, kind: input, shape index: {}]   ;;  %s567_s6 = inlined_call_operand.vmem [shape: f32[1,32], index: 6, kind: input, shape index: {}]   ;;  %s568_s3 = inlined_call_operand.vmem [shape: bf16[128,32], index: 3, kind: input, shape index: {}]   ;;  %s569_s2 = inlined_call_operand.vmem [shape: f32[1,128], index: 2, kind: input, shape index: {}]   ;;  %s570_s4 = inlined_call_operand.vmem [shape: f32[1,32], index: 4, kind: input, shape index: {}]   ;;  %s571_s7 = inlined_call_operand.vmem [shape: f32[1,32], index: 7, kind: input, shape index: {}]   ;;  %s572_s8 = inlined_call_operand.vmem [shape: f32[1,32], index: 8, kind: input, shape index: {}]   ;;  %s573_s9 = inlined_call_operand.vmem [shape: bf16[16,32], index: 9, kind: output, shape index: {}]  }
   0x1   :  { %v365_v0 = vld [vmem:[%s564_s0] sm:$0xff]   ;;  %380 = vmatprep.subr.bf16.mxu0 %v436_v16  ;;  %388 = vmatprep.subr.bf16.mxu1 %v436_v16  ;;  %v411_v17 = vld [vmem:[%s565_s1 + $0x8] sm:$0xff]   ;;  %v414_v37 = vld [vmem:[%s568_s3 + $0x10] sm:$0xff]  }
   0x2   :  { %v491_v1 = vunpack.c.l.bf16 %v365_v0  ;;  %v493_v2 = vunpack.c.h.bf16 %v365_v0  ;;  %v410_v15 = vld [vmem:[%s565_s1] sm:$0xff]   ;;  %384 = vmatprep.mubr.msk.bf16.mxu0 %vm437_vm1, %v436_v16  ;;  %404 = vmatprep.mubr.msk.bf16.mxu1 %vm437_vm1, %v436_v16  ;;  %v413_v36 = vld [vmem:[%s568_s3 + $0x8] sm:$0xff]   ;;  %v415_v38 = vld [vmem:[%s568_s3 + $0x18] sm:$0xff]  }
   0x3   :  { %381 = vmatpush3.bf16.msra.mxu0 %v410_v15  ;;  %v341_v26 = vld [vmem:[%s566_s5] ss:$0 sm:$0xff]  ;;  %v417_v40 = vld [vmem:[%s568_s3 + $0x28] sm:$0xff]   ;;  %v418_v41 = vld [vmem:[%s568_s3 + $0x30] sm:$0xff]  }
   0x4   :  { %v38_v3 = vsel %vm37_vm0, %v491_v1, 0.0  ;;  %v41_v4 = vsel %vm37_vm0, %v493_v2, 0.0  ;;  %382 = vmatprep.subr.bf16.mxu0 %v436_v16  ;;  %v342_v30 = vld [vmem:[%s567_s6] ss:$0 sm:$0xff]  ;;  %v419_v42 = vld [vmem:[%s568_s3 + $0x38] sm:$0xff]  }
   0x5   :  { %39 = vadd.xlane.f32.xlu0 %v38_v3  ;;  %v412_v35 = vld [vmem:[%s568_s3] sm:$0xff]  }
   0x6   :  { %389 = vmatpush3.bf16.msra.mxu1 %v412_v35  ;;  %v416_v39 = vld [vmem:[%s568_s3 + $0x20] sm:$0xff]  }
   0x7   :  { %383 = vmatpush3.bf16.msra.mxu0 %v411_v17  ;;  %390 = vmatprep.subr.bf16.mxu1 %v436_v16  ;;  %v343_v43 = vld [vmem:[%s569_s2] ss:$0 sm:$0xff] }
   0x8   :  { %v349_v61 = vld [vmem:[%s570_s4] ss:$0 sm:$0xff] }
   0x9   :  { %42 = vadd.xlane.f32.xlu0 %v41_v4 }
   0xa   :  { %391 = vmatpush3.bf16.msra.mxu1 %v413_v36 }
   0xb   :  { %392 = vmatprep.subr.bf16.mxu1 %v436_v16 }
   0xe   :  { %393 = vmatpush3.bf16.msra.mxu1 %v414_v37 }
   0xf   :  { %394 = vmatprep.subr.bf16.mxu1 %v436_v16 }
  0x12   :  { %395 = vmatpush3.bf16.msra.mxu1 %v415_v38 }
  0x13   :  { %396 = vmatprep.subr.bf16.mxu1 %v436_v16 }
  0x16   :  { %397 = vmatpush3.bf16.msra.mxu1 %v416_v39 }
  0x17   :  { %398 = vmatprep.subr.bf16.mxu1 %v436_v16 }
  0x1a   :  { %399 = vmatpush3.bf16.msra.mxu1 %v417_v40 }
  0x1b   :  { %400 = vmatprep.subr.bf16.mxu1 %v436_v16 }
  0x1e   :  { %401 = vmatpush3.bf16.msra.mxu1 %v418_v41 }
  0x1f   :  { %402 = vmatprep.subr.bf16.mxu1 %v436_v16 }
  0x22   :  { %403 = vmatpush3.bf16.msra.mxu1 %v419_v42 }
  0x92   :  { %v40_v5 = vpop.xlane.xlu0 %39 }
  0x93   :  { %v45_v6 = vmul.f32 0.03125, %v40_v5 }
  0x95   :  { %v47_v7 = vsub.f32 %v491_v1, %v45_v6 }
  0x96   :  { %v43_v8 = vpop.xlane.xlu0 %42 }
  0x97   :  { %v46_v9 = vmul.f32 0.03125, %v43_v8  ;;  %v49_v10 = vmul.f32 %v47_v7, %v47_v7 }
  0x99   :  { %v48_v11 = vsub.f32 %v493_v2, %v46_v9  ;;  %v51_v12 = vsel %vm37_vm0, %v49_v10, 0.0 }
  0x9a   :  { %52 = vadd.xlane.f32.xlu1 %v51_v12 }
  0x9b   :  { %v50_v13 = vmul.f32 %v48_v11, %v48_v11 }
  0x9d   :  { %v54_v14 = vsel %vm37_vm0, %v50_v13, 0.0 }
  0x9e   :  { %55 = vadd.xlane.f32.xlu1 %v54_v14 }
 0x127   :  { %v53_v18 = vpop.xlane.xlu1 %52 }
 0x128   :  { %v57_v19 = vmul.f32 0.03125, %v53_v18 }
 0x12a   :  { %v59_v20 = vadd.f32 1e-05, %v57_v19 }
 0x12b   :  { %v56_v21 = vpop.xlane.xlu1 %55 }
 0x12c   :  { %420 = vrsqrt.f32 %v59_v20  ;;  %v58_v22 = vmul.f32 0.03125, %v56_v21 }
 0x12e   :  { %v60_v23 = vadd.f32 1e-05, %v58_v22 }
 0x130   :  { %422 = vrsqrt.f32 %v60_v23 }
 0x136   :  { %v421_v24 = vpop.eup %420 }
 0x137   :  { %v63_v25 = vmul.f32 %v421_v24, %v47_v7 }
 0x139   :  { %v72_v29 = vmul.f32 %v341_v26, %v63_v25 }
 0x13a   :  { %v423_v27 = vpop.eup %422 }
 0x13b   :  { %v64_v28 = vmul.f32 %v423_v27, %v48_v11  ;;  %v81_v32 = vadd.f32 %v342_v30, %v72_v29  ;;  %v358_v27 = vld [vmem:[%s571_s7] ss:$0 sm:$0xff] }
 0x13d   :  { %v73_v31 = vmul.f32 %v341_v26, %v64_v28 }
 0x13f   :  { %v82_v33 = vadd.f32 %v342_v30, %v73_v31  ;;  %v359_v30 = vld [vmem:[%s572_s8] ss:$0 sm:$0xff] }
 0x141   :  { %v83_v34 = vpack.c.bf16 %v82_v33, %v81_v32 }
 0x143   :  { %385 = vmatmul.mubr.msk.bf16.vlgmr.msra.gmra.mrb[0].mxu0 %vm37_vm0, %v83_v34 }
 0x216   :  { %v144_v44 = vpop.f32.mrb[0].mxu0 }
 0x217   :  { %v145_v45 = vadd.f32 %v343_v43, %v144_v44  ;;  %v386_v46 = vpop.f32.mrb[1].mxu0 }
 0x218   :  { %v147_v47 = vpop.f32.mrb[2].mxu0 }
 0x219   :  { %v347_v48 = vmul.f32 -1.442695, %v145_v45  ;;  %v148_v49 = vadd.f32 %v343_v43, %v147_v47  ;;  %v387_v50 = vpop.f32.mrb[3].mxu0 }
 0x21b   :  { %424 = vpow2.f32 %v347_v48  ;;  %v348_v51 = vmul.f32 -1.442695, %v148_v49 }
 0x21d   :  { %426 = vpow2.f32 %v348_v51 }
 0x225   :  { %v425_v52 = vpop.eup %424 }
 0x226   :  { %v157_v53 = vadd.f32 1.0, %v425_v52 }
 0x227   :  { %v427_v54 = vpop.eup %426 }
 0x228   :  { %428 = vrcp.f32 %v157_v53  ;;  %v158_v55 = vadd.f32 1.0, %v427_v54 }
 0x22a   :  { %430 = vrcp.f32 %v158_v55 }
 0x232   :  { %v429_v56 = vpop.eup %428 }
 0x233   :  { %v163_v58 = vmul.f32 %v429_v56, %v145_v45 }
 0x234   :  { %v431_v57 = vpop.eup %430 }
 0x235   :  { %v164_v59 = vmul.f32 %v431_v57, %v148_v49 }
 0x237   :  { %v165_v60 = vpack.c.bf16 %v164_v59, %v163_v58 }
 0x239   :  { %405 = vmatmul.mubr.bf16.vlgmr.msra.gmra.mrb[0].mxu1 %v165_v60 }
 0x30c   :  { %v271_v62 = vpop.f32.mrb[0].mxu1 }
 0x30d   :  { %v272_v63 = vadd.f32 %v349_v61, %v271_v62  ;;  %v406_v0 = vpop.f32.mrb[1].mxu1 }
 0x30e   :  { %v274_v3 = vpop.f32.mrb[2].mxu1 }
 0x30f   :  { %v278_v4 = vmul.f32 0.5, %v272_v63  ;;  %v275_v5 = vadd.f32 %v349_v61, %v274_v3  ;;  %v407_v6 = vpop.f32.mrb[3].mxu1 }
 0x311   :  { %v279_v7 = vmul.f32 0.5, %v275_v5  ;;  %v280_v8 = vadd.f32 %v491_v1, %v278_v4 }
 0x313   :  { %v282_v9 = vsel %vm37_vm0, %v280_v8, 0.0  ;;  %v281_v10 = vadd.f32 %v493_v2, %v279_v7 }
 0x314   :  { %283 = vadd.xlane.f32.xlu0 %v282_v9 }
 0x315   :  { %v285_v11 = vsel %vm37_vm0, %v281_v10, 0.0 }
 0x316   :  { %286 = vadd.xlane.f32.xlu1 %v285_v11 }
 0x3a1   :  { %v284_v12 = vpop.xlane.xlu0 %283 }
 0x3a2   :  { %v288_v13 = vmul.f32 0.03125, %v284_v12 }
 0x3a3   :  { %v287_v14 = vpop.xlane.xlu1 %286 }
 0x3a4   :  { %v290_v15 = vsub.f32 %v280_v8, %v288_v13  ;;  %v289_v16 = vmul.f32 0.03125, %v287_v14 }
 0x3a6   :  { %v291_v17 = vsub.f32 %v281_v10, %v289_v16  ;;  %v292_v18 = vmul.f32 %v290_v15, %v290_v15 }
 0x3a8   :  { %v294_v19 = vsel %vm37_vm0, %v292_v18, 0.0  ;;  %v293_v20 = vmul.f32 %v291_v17, %v291_v17 }
 0x3a9   :  { %295 = vadd.xlane.f32.xlu0 %v294_v19 }
 0x3aa   :  { %v297_v1 = vsel %vm37_vm0, %v293_v20, 0.0 }
 0x3ab   :  { %298 = vadd.xlane.f32.xlu1 %v297_v1 }
 0x436   :  { %v296_v21 = vpop.xlane.xlu0 %295 }
 0x437   :  { %v300_v2 = vmul.f32 0.03125, %v296_v21 }
 0x438   :  { %v299_v22 = vpop.xlane.xlu1 %298 }
 0x439   :  { %v302_v23 = vadd.f32 1e-05, %v300_v2  ;;  %v301_v24 = vmul.f32 0.03125, %v299_v22 }
 0x43b   :  { %432 = vrsqrt.f32 %v302_v23  ;;  %v303_v25 = vadd.f32 1e-05, %v301_v24 }
 0x43d   :  { %434 = vrsqrt.f32 %v303_v25 }
 0x445   :  { %v433_v26 = vpop.eup %432 }
 0x446   :  { %v306_v28 = vmul.f32 %v433_v26, %v290_v15 }
 0x447   :  { %v435_v29 = vpop.eup %434 }
 0x448   :  { %v315_v31 = vmul.f32 %v358_v27, %v306_v28  ;;  %v307_v32 = vmul.f32 %v435_v29, %v291_v17 }
 0x44a   :  { %v324_v33 = vadd.f32 %v359_v30, %v315_v31  ;;  %v316_v34 = vmul.f32 %v358_v27, %v307_v32 }
 0x44c   :  { %v362_v35 = vpack.c.bf16 %v324_v33, %v324_v33  ;;  %v325_v36 = vadd.f32 %v359_v30, %v316_v34 }
 0x44e   :  { %335 = vst.msk [vmem:[%s573_s9] sm:$0xf] %vm334_vm2, %v362_v35  ;;  %v363_v37 = vpack.c.bf16 %v325_v36, %v325_v36 }
 0x450   :  { %336 = vst.msk [vmem:[%s573_s9 + $0x4] sm:$0xf] %vm334_vm2, %v363_v37 }

</bundles_post_ra>
